<compile_context>
chip_gen: v7x
topology: tpu7x:2x2x1
jax: 0.10.0
libtpu: 0.0.40
codegen_flags: <defaults>
</compile_context>

<pallas_src>
import functools

import jax
import jax.numpy as jnp
import numpy as np
from jax.experimental import pallas as pl
from jax.experimental.pallas import tpu as pltpu

BN_EPS = 1e-5


# ----------------------------------------------------------------------------
# Fused Pallas kernel: all ASPP branches + projection for one batch image
# ----------------------------------------------------------------------------
def _aspp_fused_kernel(x_ref, w0_ref, wat_ref, wp_ref, wproj_ref,
                       shifts_ref, shift_proj_ref, o_ref, xpad_ref, *,
                       H, W, dmax, rates, c_out):
    """Shapes (R = len(rates), nb = R + 2, mxu dtype = weight dtype):
      x_ref          : (1, H, W, Cin)       UNPADDED NHWC input block (f32)
      w0_ref         : (Cin, Cout)          1x1 conv, BN scale folded (mxu dtype)
      wat_ref        : (R, 9, Cin, Cout)    3x3 dilated convs, folded (mxu dtype)
      wp_ref         : (Cin, Cout)          pooling-branch 1x1 conv (mxu dtype)
      wproj_ref      : (nb*Cout, Cout)      projection 1x1 conv (mxu dtype)
      shifts_ref     : (nb, Cout)           per-branch folded BN shifts (f32)
      shift_proj_ref : (1, Cout)            projection folded BN shift (f32)
      o_ref          : (1, H*W, Cout)       output (f32)
      xpad_ref       : (H+2*dmax, W+2*dmax, Cin) VMEM scratch (f32, padded slab)
    """
    HW = H * W
    c_in = x_ref.shape[-1]
    mxu_dtype = w0_ref.dtype

    # ---- in-kernel zero-pad: halo zeros + centre copy (no padded HBM copy) --
    # Zeroed every step so correctness holds when the batch axis is split
    # across TensorCores; only the halo strips strictly need re-zeroing.
    xpad_ref[...] = jnp.zeros_like(xpad_ref)
    x_img = x_ref[0]                                           # (H, W, Cin) f32
    xpad_ref[dmax:dmax + H, dmax:dmax + W, :] = x_img
    xc = x_img.reshape(HW, c_in)                               # contiguous slab
    xc_mx = xc.astype(mxu_dtype)                               # reused centre tap

    # ---- branch 0: 1x1 conv + BN shift + ReLU, projected immediately -------
    b0 = jnp.maximum(
        jnp.dot(xc_mx, w0_ref[...], preferred_element_type=jnp.float32)
        + shifts_ref[0:1, :], 0.0)
    acc = jnp.dot(b0.astype(mxu_dtype), wproj_ref[0:c_out, :],
                  preferred_element_type=jnp.float32)          # (HW, Cout) f32

    # ---- atrous branches: 9 shifted taps, windowed loads off the scratch ref
    # TODO(synk): once spatial tiling lands, use lax.fori_loop(unroll=True)
    # over taps to bound live ranges at production sizes.
    for i, d in enumerate(rates):
        y = None
        for kh in range(3):
            for kw in range(3):
                if kh == 1 and kw == 1:
                    xt = xc_mx                                 # centre tap reuse
                else:
                    hs = dmax + (kh - 1) * d
                    ws = dmax + (kw - 1) * d
                    xt = xpad_ref[hs:hs + H, ws:ws + W, :].reshape(
                        HW, c_in).astype(mxu_dtype)
                c = jnp.dot(xt, wat_ref[i, kh * 3 + kw, :, :],
                            preferred_element_type=jnp.float32)
                y = c if y is None else y + c
        bi = jnp.maximum(y + shifts_ref[i + 1:i + 2, :], 0.0)
        acc = acc + jnp.dot(bi.astype(mxu_dtype),
                            wproj_ref[(i + 1) * c_out:(i + 2) * c_out, :],
                            preferred_element_type=jnp.float32)

    # ---- pooling branch: global mean -> 1x1 conv -> BN -> ReLU -------------
    # Bilinear upsample from a 1x1 source (align_corners=False) is an exact
    # broadcast, so its projected contribution is a per-batch rank-1 bias.
    n_conv = 1 + len(rates)
    pooled = jnp.mean(xc, axis=0, keepdims=True)               # (1, Cin) f32
    pb = jnp.maximum(
        jnp.dot(pooled.astype(mxu_dtype), wp_ref[...],
                preferred_element_type=jnp.float32)
        + shifts_ref[n_conv:n_conv + 1, :], 0.0)               # (1, Cout)
    pool_bias = jnp.dot(pb.astype(mxu_dtype),
                        wproj_ref[n_conv * c_out:(n_conv + 1) * c_out, :],
                        preferred_element_type=jnp.float32)    # (1, Cout)

    # ---- projection epilogue: BN shift + ReLU (Dropout = identity in eval) -
    out = jnp.maximum(acc + pool_bias + shift_proj_ref[...], 0.0)
    o_ref[0] = out.astype(o_ref.dtype)


# ----------------------------------------------------------------------------
# Host-side glue: BN folding, weight layout, pallas_call wrapper
# ----------------------------------------------------------------------------
def fold_bn(bn):
    gamma, beta, mean, var = bn
    scale = gamma / jnp.sqrt(var + BN_EPS)
    shift = beta - mean * scale
    return scale, shift


def aspp_forward(x_nchw, params, atrous_rates, mxu_dtype=jnp.bfloat16):
    rates = tuple(atrous_rates)
    if not rates:
        raise ValueError("at least one atrous rate is required")
    N, Cin, H, W = x_nchw.shape
    Cout = params["w0_4d"].shape[0]
    n_conv = 1 + len(rates)
    nb = n_conv + 1
    dmax = max(rates)
    Hp, Wp = H + 2 * dmax, W + 2 * dmax
    HW = H * W

    # NHWC, UNPADDED: padding is fused into the kernel (no dmax-padded HBM copy)
    x_nhwc = jnp.transpose(x_nchw, (0, 2, 3, 1)).astype(jnp.float32)

    # Fold BN scales into conv / projection weights; cast MXU operands.
    s0, b0 = fold_bn(params["bn0"])
    w0f = (params["w0_4d"].reshape(Cout, Cin).T * s0[None, :]).astype(mxu_dtype)

    wat, shifts = [], [b0]
    for i, _ in enumerate(rates):
        si, bi = fold_bn(params[f"bn{i + 1}"])
        w4 = params[f"w{i + 1}_4d"]                                # (Cout,Cin,3,3)
        wt = jnp.transpose(w4, (2, 3, 1, 0)).reshape(9, Cin, Cout)  # kh-major
        wat.append(wt * si[None, None, :])
        shifts.append(bi)
    watf = jnp.stack(wat, axis=0).astype(mxu_dtype)                 # (R,9,Cin,Cout)

    sp, bp = fold_bn(params["bnp"])
    wpf = (params["wp_4d"].reshape(Cout, Cin).T * sp[None, :]).astype(mxu_dtype)
    shifts.append(bp)
    shifts_arr = jnp.stack(shifts, axis=0).astype(jnp.float32)      # (nb, Cout)

    sj, bj = fold_bn(params["bn_proj"])
    wprojf = (params["w_proj_4d"].reshape(Cout, nb * Cout).T
              * sj[None, :]).astype(mxu_dtype)                      # (nb*Cout,Cout)
    shift_proj = bj.reshape(1, Cout).astype(jnp.float32)

    kernel = functools.partial(_aspp_fused_kernel, H=H, W=W, dmax=dmax,
                               rates=rates, c_out=Cout)

    # VMEM budget from actual sizes (double-buffered I/O blocks, single-
    # buffered constants, padded scratch, live accumulators/slabs) + headroom.
    itm = jnp.dtype(mxu_dtype).itemsize
    weight_bytes = ((2 * Cin * Cout + len(rates) * 9 * Cin * Cout
                     + nb * Cout * Cout) * itm + (nb + 1) * Cout * 4)
    io_bytes = 2 * HW * Cin * 4 + 2 * HW * Cout * 4
    scratch_bytes = Hp * Wp * Cin * 4
    live_bytes = HW * (3 * Cout * 4 + Cin * (4 + itm))
    vmem_limit = int(min(max(2 * (weight_bytes + io_bytes + scratch_bytes
                                  + live_bytes), 32 * 2**20), 96 * 2**20))

    const_vmem = pl.BlockSpec(memory_space=pltpu.MemorySpace.VMEM)

    out_flat = pl.pallas_call(
        kernel,
        out_shape=jax.ShapeDtypeStruct((N, HW, Cout), jnp.float32),
        grid=(N,),
        in_specs=[
            pl.BlockSpec((1, H, W, Cin), lambda n: (n, 0, 0, 0)),  # image block
            const_vmem,   # w0     (whole array resident, single-buffered)
            const_vmem,   # wat
            const_vmem,   # wp
            const_vmem,   # wproj
            const_vmem,   # shifts
            const_vmem,   # shift_proj
        ],
        out_specs=pl.BlockSpec((1, HW, Cout), lambda n: (n, 0, 0)),
        scratch_shapes=[pltpu.VMEM((Hp, Wp, Cin), jnp.float32)],
        compiler_params=pltpu.CompilerParams(
            dimension_semantics=("parallel",),
            vmem_limit_bytes=vmem_limit),
    )(x_nhwc, w0f, watf, wpf, wprojf, shifts_arr, shift_proj)

    return out_flat.reshape(N, H, W, Cout).transpose(0, 3, 1, 2)    # NCHW


# ----------------------------------------------------------------------------
# Deterministic parameter construction
# ----------------------------------------------------------------------------
def make_params(key, in_channels, out_channels, atrous_rates):
    n_branches = 1 + len(atrous_rates) + 1
    keys = iter(jax.random.split(key, 64))

    def conv_w(shape):
        return (0.1 * jax.random.normal(next(keys), shape)).astype(jnp.float32)

    def bn(c):
        gamma = 1.0 + 0.1 * jax.random.normal(next(keys), (c,))
        beta = 0.1 * jax.random.normal(next(keys), (c,))
        mean = 0.1 * jax.random.normal(next(keys), (c,))
        var = 1.0 + 0.1 * jnp.abs(jax.random.normal(next(keys), (c,)))
        return (gamma.astype(jnp.float32), beta.astype(jnp.float32),
                mean.astype(jnp.float32), var.astype(jnp.float32))

    p = {}
    p["w0_4d"] = conv_w((out_channels, in_channels, 1, 1))
    p["bn0"] = bn(out_channels)
    for i, _ in enumerate(atrous_rates):
        p[f"w{i + 1}_4d"] = conv_w((out_channels, in_channels, 3, 3))
        p[f"bn{i + 1}"] = bn(out_channels)
    p["wp_4d"] = conv_w((out_channels, in_channels, 1, 1))
    p["bnp"] = bn(out_channels)
    p["w_proj_4d"] = conv_w((out_channels, n_branches * out_channels, 1, 1))
    p["bn_proj"] = bn(out_channels)
    return p


# ----------------------------------------------------------------------------
# Pure-JAX reference (lax conv) for correctness check
# ----------------------------------------------------------------------------
def aspp_reference(x, params, atrous_rates):
    def bn_relu(y, bnp):
        g, be, mu, var = bnp
        s = (g / jnp.sqrt(var + BN_EPS))[None, :, None, None]
        return jax.nn.relu((y - mu[None, :, None, None]) * s
                           + be[None, :, None, None])

    def conv(inp, w, d=1, pad=0):
        return jax.lax.conv_general_dilated(
            inp, w, (1, 1), [(pad, pad), (pad, pad)], rhs_dilation=(d, d),
            dimension_numbers=("NCHW", "OIHW", "NCHW"))

    outs = [bn_relu(conv(x, params["w0_4d"]), params["bn0"])]
    for i, d in enumerate(atrous_rates):
        outs.append(bn_relu(conv(x, params[f"w{i + 1}_4d"], d=d, pad=d),
                            params[f"bn{i + 1}"]))
    pooled = jnp.mean(x, axis=(2, 3), keepdims=True)
    pb = bn_relu(conv(pooled, params["wp_4d"]), params["bnp"])
    pb = jnp.broadcast_to(pb, (x.shape[0], pb.shape[1], x.shape[2], x.shape[3]))
    outs.append(pb)
    cat = jnp.concatenate(outs, axis=1)
    return bn_relu(conv(cat, params["w_proj_4d"]), params["bn_proj"])


# ----------------------------------------------------------------------------
if __name__ == "__main__":
    key = jax.random.PRNGKey(0)
    kx, kp = jax.random.split(key)

    # Small shapes; Cout=128 keeps the output / MXU N-dimension lane-dense.
    N, Cin, H, W = 2, 32, 16, 16
    Cout = 128
    atrous_rates = (2, 4)

    x = jax.random.normal(kx, (N, Cin, H, W), dtype=jnp.float32)
    params = make_params(kp, Cin, Cout, atrous_rates)

    ref = jax.block_until_ready(aspp_reference(x, params, atrous_rates))

    # f32 MXU mode: tight numerics check of the fused kernel.
    fwd_f32 = jax.jit(functools.partial(
        aspp_forward, atrous_rates=atrous_rates, mxu_dtype=jnp.float32))
    out_f32 = jax.block_until_ready(fwd_f32(x, params))
    assert out_f32.shape == (N, Cout, H, W), out_f32.shape
    np.testing.assert_allclose(np.asarray(out_f32), np.asarray(ref),
                               atol=2e-4, rtol=2e-4)

    # bf16 MXU mode (production fast path): looser tolerance for bf16 operands.
    fwd_bf16 = jax.jit(functools.partial(
        aspp_forward, atrous_rates=atrous_rates, mxu_dtype=jnp.bfloat16))
    out_bf16 = jax.block_until_ready(fwd_bf16(x, params))
    assert out_bf16.shape == (N, Cout, H, W), out_bf16.shape
    np.testing.assert_allclose(np.asarray(out_bf16), np.asarray(ref),
                               atol=1e-1, rtol=5e-2)

    print("KERNEL_OK")
</pallas_src>

<mosaic_0001>
module attributes {stable_mosaic.version = 11 : i64} {
  func.func @_aspp_fused_kernel(%arg0: i32, %arg1: memref<1x16x16x32xf32, #tpu.memory_space<vmem>>, %arg2: memref<32x128xf32, #tpu.memory_space<vmem>>, %arg3: memref<2x9x32x128xf32, #tpu.memory_space<vmem>>, %arg4: memref<32x128xf32, #tpu.memory_space<vmem>>, %arg5: memref<512x128xf32, #tpu.memory_space<vmem>>, %arg6: memref<4x128xf32, #tpu.memory_space<vmem>>, %arg7: memref<1x128xf32, #tpu.memory_space<vmem>>, %arg8: memref<1x256x128xf32, #tpu.memory_space<vmem>>, %arg9: memref<24x24x32xf32, #tpu.memory_space<vmem>>) attributes {dimension_semantics = [#tpu.dimension_semantics<parallel>], iteration_bounds = array<i64: 2>, scalar_prefetch = 0 : i64, scratch_operands = 1 : i64, tpu.core_type = #tpu.core_type<tc>, window_params = [{transform_indices = @transform_0, window_bounds = array<i64: 1, 16, 16, 32>}, {pipeline_mode = #tpu.pipeline_mode<synchronous>, transform_indices = @transform_1, window_bounds = array<i64: 32, 128>}, {pipeline_mode = #tpu.pipeline_mode<synchronous>, transform_indices = @transform_2, window_bounds = array<i64: 2, 9, 32, 128>}, {pipeline_mode = #tpu.pipeline_mode<synchronous>, transform_indices = @transform_3, window_bounds = array<i64: 32, 128>}, {pipeline_mode = #tpu.pipeline_mode<synchronous>, transform_indices = @transform_4, window_bounds = array<i64: 512, 128>}, {pipeline_mode = #tpu.pipeline_mode<synchronous>, transform_indices = @transform_5, window_bounds = array<i64: 4, 128>}, {pipeline_mode = #tpu.pipeline_mode<synchronous>, transform_indices = @transform_6, window_bounds = array<i64: 1, 128>}, {transform_indices = @transform_7, window_bounds = array<i64: 1, 256, 128>}]} {
    %cst = arith.constant 0.000000e+00 : f32
    %0 = vector.broadcast %cst : f32 to vector<24x24x32xf32>
    %c0 = arith.constant 0 : index
    %c0_0 = arith.constant 0 : index
    %c0_1 = arith.constant 0 : index
    %1 = vector.load %arg9[%c0, %c0_0, %c0_1] : memref<24x24x32xf32, #tpu.memory_space<vmem>>, vector<24x24x32xf32>
    tpu.vector_store %arg9[%c0, %c0_0, %c0_1], %0 {strides = array<i32>} : memref<24x24x32xf32, #tpu.memory_space<vmem>>, vector<24x24x32xf32>,
    %c0_2 = arith.constant 0 : index
    %c0_3 = arith.constant 0 : index
    %c0_4 = arith.constant 0 : index
    %c0_5 = arith.constant 0 : index
    %2 = vector.load %arg1[%c0_2, %c0_3, %c0_4, %c0_5] : memref<1x16x16x32xf32, #tpu.memory_space<vmem>>, vector<1x16x16x32xf32>
    %3 = vector.shape_cast %2 : vector<1x16x16x32xf32> to vector<16x16x32xf32>
    %c4 = arith.constant 4 : index
    %c4_6 = arith.constant 4 : index
    %c0_7 = arith.constant 0 : index
    %4 = vector.load %arg9[%c4, %c4_6, %c0_7] : memref<24x24x32xf32, #tpu.memory_space<vmem>>, vector<16x16x32xf32>
    tpu.vector_store %arg9[%c4, %c4_6, %c0_7], %3 {strides = array<i32>} : memref<24x24x32xf32, #tpu.memory_space<vmem>>, vector<16x16x32xf32>,
    %5 = vector.shape_cast %3 : vector<16x16x32xf32> to vector<256x32xf32>
    %c0_8 = arith.constant 0 : index
    %c0_9 = arith.constant 0 : index
    %6 = vector.load %arg2[%c0_8, %c0_9] : memref<32x128xf32, #tpu.memory_space<vmem>>, vector<32x128xf32>
    %cst_10 = arith.constant dense<0.000000e+00> : vector<256x128xf32>
    %7 = tpu.matmul %5, %6, %cst_10 {dimension_numbers = #tpu.dot_dimension_numbers<[1], [0], [0], [1], [0, 0, 1, 1], [], []>} : vector<256x32xf32>, vector<32x128xf32>, vector<256x128xf32> -> vector<256x128xf32>
    %c0_11 = arith.constant 0 : index
    %c0_12 = arith.constant 0 : index
    %8 = vector.load %arg6[%c0_11, %c0_12] : memref<4x128xf32, #tpu.memory_space<vmem>>, vector<1x128xf32>
    %9 = vector.broadcast %8 : vector<1x128xf32> to vector<256x128xf32>
    %10 = arith.addf %7, %9 : vector<256x128xf32>
    %cst_13 = arith.constant 0.000000e+00 : f32
    %11 = vector.broadcast %cst_13 : f32 to vector<256x128xf32>
    %12 = arith.maximumf %10, %11 : vector<256x128xf32>
    %c0_14 = arith.constant 0 : index
    %c0_15 = arith.constant 0 : index
    %13 = vector.load %arg5[%c0_14, %c0_15] : memref<512x128xf32, #tpu.memory_space<vmem>>, vector<128x128xf32>
    %cst_16 = arith.constant dense<0.000000e+00> : vector<256x128xf32>
    %14 = tpu.matmul %12, %13, %cst_16 {dimension_numbers = #tpu.dot_dimension_numbers<[1], [0], [0], [1], [0, 0, 1, 1], [], []>} : vector<256x128xf32>, vector<128x128xf32>, vector<256x128xf32> -> vector<256x128xf32>
    %c2 = arith.constant 2 : index
    %c2_17 = arith.constant 2 : index
    %c0_18 = arith.constant 0 : index
    %15 = vector.load %arg9[%c2, %c2_17, %c0_18] : memref<24x24x32xf32, #tpu.memory_space<vmem>>, vector<16x16x32xf32>
    %16 = vector.shape_cast %15 : vector<16x16x32xf32> to vector<256x32xf32>
    %c0_19 = arith.constant 0 : index
    %c0_20 = arith.constant 0 : index
    %c0_21 = arith.constant 0 : index
    %c0_22 = arith.constant 0 : index
    %17 = vector.load %arg3[%c0_19, %c0_20, %c0_21, %c0_22] : memref<2x9x32x128xf32, #tpu.memory_space<vmem>>, vector<1x1x32x128xf32>
    %18 = vector.shape_cast %17 : vector<1x1x32x128xf32> to vector<32x128xf32>
    %cst_23 = arith.constant dense<0.000000e+00> : vector<256x128xf32>
    %19 = tpu.matmul %16, %18, %cst_23 {dimension_numbers = #tpu.dot_dimension_numbers<[1], [0], [0], [1], [0, 0, 1, 1], [], []>} : vector<256x32xf32>, vector<32x128xf32>, vector<256x128xf32> -> vector<256x128xf32>
    %c2_24 = arith.constant 2 : index
    %c4_25 = arith.constant 4 : index
    %c0_26 = arith.constant 0 : index
    %20 = vector.load %arg9[%c2_24, %c4_25, %c0_26] : memref<24x24x32xf32, #tpu.memory_space<vmem>>, vector<16x16x32xf32>
    %21 = vector.shape_cast %20 : vector<16x16x32xf32> to vector<256x32xf32>
    %c0_27 = arith.constant 0 : index
    %c1 = arith.constant 1 : index
    %c0_28 = arith.constant 0 : index
    %c0_29 = arith.constant 0 : index
    %22 = vector.load %arg3[%c0_27, %c1, %c0_28, %c0_29] : memref<2x9x32x128xf32, #tpu.memory_space<vmem>>, vector<1x1x32x128xf32>
    %23 = vector.shape_cast %22 : vector<1x1x32x128xf32> to vector<32x128xf32>
    %cst_30 = arith.constant dense<0.000000e+00> : vector<256x128xf32>
    %24 = tpu.matmul %21, %23, %cst_30 {dimension_numbers = #tpu.dot_dimension_numbers<[1], [0], [0], [1], [0, 0, 1, 1], [], []>} : vector<256x32xf32>, vector<32x128xf32>, vector<256x128xf32> -> vector<256x128xf32>
    %25 = arith.addf %19, %24 : vector<256x128xf32>
    %c2_31 = arith.constant 2 : index
    %c6 = arith.constant 6 : index
    %c0_32 = arith.constant 0 : index
    %26 = vector.load %arg9[%c2_31, %c6, %c0_32] : memref<24x24x32xf32, #tpu.memory_space<vmem>>, vector<16x16x32xf32>
    %27 = vector.shape_cast %26 : vector<16x16x32xf32> to vector<256x32xf32>
    %c0_33 = arith.constant 0 : index
    %c2_34 = arith.constant 2 : index
    %c0_35 = arith.constant 0 : index
    %c0_36 = arith.constant 0 : index
    %28 = vector.load %arg3[%c0_33, %c2_34, %c0_35, %c0_36] : memref<2x9x32x128xf32, #tpu.memory_space<vmem>>, vector<1x1x32x128xf32>
    %29 = vector.shape_cast %28 : vector<1x1x32x128xf32> to vector<32x128xf32>
    %cst_37 = arith.constant dense<0.000000e+00> : vector<256x128xf32>
    %30 = tpu.matmul %27, %29, %cst_37 {dimension_numbers = #tpu.dot_dimension_numbers<[1], [0], [0], [1], [0, 0, 1, 1], [], []>} : vector<256x32xf32>, vector<32x128xf32>, vector<256x128xf32> -> vector<256x128xf32>
    %31 = arith.addf %25, %30 : vector<256x128xf32>
    %c4_38 = arith.constant 4 : index
    %c2_39 = arith.constant 2 : index
    %c0_40 = arith.constant 0 : index
    %32 = vector.load %arg9[%c4_38, %c2_39, %c0_40] : memref<24x24x32xf32, #tpu.memory_space<vmem>>, vector<16x16x32xf32>
    %33 = vector.shape_cast %32 : vector<16x16x32xf32> to vector<256x32xf32>
    %c0_41 = arith.constant 0 : index
    %c3 = arith.constant 3 : index
    %c0_42 = arith.constant 0 : index
    %c0_43 = arith.constant 0 : index
    %34 = vector.load %arg3[%c0_41, %c3, %c0_42, %c0_43] : memref<2x9x32x128xf32, #tpu.memory_space<vmem>>, vector<1x1x32x128xf32>
    %35 = vector.shape_cast %34 : vector<1x1x32x128xf32> to vector<32x128xf32>
    %cst_44 = arith.constant dense<0.000000e+00> : vector<256x128xf32>
    %36 = tpu.matmul %33, %35, %cst_44 {dimension_numbers = #tpu.dot_dimension_numbers<[1], [0], [0], [1], [0, 0, 1, 1], [], []>} : vector<256x32xf32>, vector<32x128xf32>, vector<256x128xf32> -> vector<256x128xf32>
    %37 = arith.addf %31, %36 : vector<256x128xf32>
    %c0_45 = arith.constant 0 : index
    %c4_46 = arith.constant 4 : index
    %c0_47 = arith.constant 0 : index
    %c0_48 = arith.constant 0 : index
    %38 = vector.load %arg3[%c0_45, %c4_46, %c0_47, %c0_48] : memref<2x9x32x128xf32, #tpu.memory_space<vmem>>, vector<1x1x32x128xf32>
    %39 = vector.shape_cast %38 : vector<1x1x32x128xf32> to vector<32x128xf32>
    %cst_49 = arith.constant dense<0.000000e+00> : vector<256x128xf32>
    %40 = tpu.matmul %5, %39, %cst_49 {dimension_numbers = #tpu.dot_dimension_numbers<[1], [0], [0], [1], [0, 0, 1, 1], [], []>} : vector<256x32xf32>, vector<32x128xf32>, vector<256x128xf32> -> vector<256x128xf32>
    %41 = arith.addf %37, %40 : vector<256x128xf32>
    %c4_50 = arith.constant 4 : index
    %c6_51 = arith.constant 6 : index
    %c0_52 = arith.constant 0 : index
    %42 = vector.load %arg9[%c4_50, %c6_51, %c0_52] : memref<24x24x32xf32, #tpu.memory_space<vmem>>, vector<16x16x32xf32>
    %43 = vector.shape_cast %42 : vector<16x16x32xf32> to vector<256x32xf32>
    %c0_53 = arith.constant 0 : index
    %c5 = arith.constant 5 : index
    %c0_54 = arith.constant 0 : index
    %c0_55 = arith.constant 0 : index
    %44 = vector.load %arg3[%c0_53, %c5, %c0_54, %c0_55] : memref<2x9x32x128xf32, #tpu.memory_space<vmem>>, vector<1x1x32x128xf32>
    %45 = vector.shape_cast %44 : vector<1x1x32x128xf32> to vector<32x128xf32>
    %cst_56 = arith.constant dense<0.000000e+00> : vector<256x128xf32>
    %46 = tpu.matmul %43, %45, %cst_56 {dimension_numbers = #tpu.dot_dimension_numbers<[1], [0], [0], [1], [0, 0, 1, 1], [], []>} : vector<256x32xf32>, vector<32x128xf32>, vector<256x128xf32> -> vector<256x128xf32>
    %47 = arith.addf %41, %46 : vector<256x128xf32>
    %c6_57 = arith.constant 6 : index
    %c2_58 = arith.constant 2 : index
    %c0_59 = arith.constant 0 : index
    %48 = vector.load %arg9[%c6_57, %c2_58, %c0_59] : memref<24x24x32xf32, #tpu.memory_space<vmem>>, vector<16x16x32xf32>
    %49 = vector.shape_cast %48 : vector<16x16x32xf32> to vector<256x32xf32>
    %c0_60 = arith.constant 0 : index
    %c6_61 = arith.constant 6 : index
    %c0_62 = arith.constant 0 : index
    %c0_63 = arith.constant 0 : index
    %50 = vector.load %arg3[%c0_60, %c6_61, %c0_62, %c0_63] : memref<2x9x32x128xf32, #tpu.memory_space<vmem>>, vector<1x1x32x128xf32>
    %51 = vector.shape_cast %50 : vector<1x1x32x128xf32> to vector<32x128xf32>
    %cst_64 = arith.constant dense<0.000000e+00> : vector<256x128xf32>
    %52 = tpu.matmul %49, %51, %cst_64 {dimension_numbers = #tpu.dot_dimension_numbers<[1], [0], [0], [1], [0, 0, 1, 1], [], []>} : vector<256x32xf32>, vector<32x128xf32>, vector<256x128xf32> -> vector<256x128xf32>
    %53 = arith.addf %47, %52 : vector<256x128xf32>
    %c6_65 = arith.constant 6 : index
    %c4_66 = arith.constant 4 : index
    %c0_67 = arith.constant 0 : index
    %54 = vector.load %arg9[%c6_65, %c4_66, %c0_67] : memref<24x24x32xf32, #tpu.memory_space<vmem>>, vector<16x16x32xf32>
    %55 = vector.shape_cast %54 : vector<16x16x32xf32> to vector<256x32xf32>
    %c0_68 = arith.constant 0 : index
    %c7 = arith.constant 7 : index
    %c0_69 = arith.constant 0 : index
    %c0_70 = arith.constant 0 : index
    %56 = vector.load %arg3[%c0_68, %c7, %c0_69, %c0_70] : memref<2x9x32x128xf32, #tpu.memory_space<vmem>>, vector<1x1x32x128xf32>
    %57 = vector.shape_cast %56 : vector<1x1x32x128xf32> to vector<32x128xf32>
    %cst_71 = arith.constant dense<0.000000e+00> : vector<256x128xf32>
    %58 = tpu.matmul %55, %57, %cst_71 {dimension_numbers = #tpu.dot_dimension_numbers<[1], [0], [0], [1], [0, 0, 1, 1], [], []>} : vector<256x32xf32>, vector<32x128xf32>, vector<256x128xf32> -> vector<256x128xf32>
    %59 = arith.addf %53, %58 : vector<256x128xf32>
    %c6_72 = arith.constant 6 : index
    %c6_73 = arith.constant 6 : index
    %c0_74 = arith.constant 0 : index
    %60 = vector.load %arg9[%c6_72, %c6_73, %c0_74] : memref<24x24x32xf32, #tpu.memory_space<vmem>>, vector<16x16x32xf32>
    %61 = vector.shape_cast %60 : vector<16x16x32xf32> to vector<256x32xf32>
    %c0_75 = arith.constant 0 : index
    %c8 = arith.constant 8 : index
    %c0_76 = arith.constant 0 : index
    %c0_77 = arith.constant 0 : index
    %62 = vector.load %arg3[%c0_75, %c8, %c0_76, %c0_77] : memref<2x9x32x128xf32, #tpu.memory_space<vmem>>, vector<1x1x32x128xf32>
    %63 = vector.shape_cast %62 : vector<1x1x32x128xf32> to vector<32x128xf32>
    %cst_78 = arith.constant dense<0.000000e+00> : vector<256x128xf32>
    %64 = tpu.matmul %61, %63, %cst_78 {dimension_numbers = #tpu.dot_dimension_numbers<[1], [0], [0], [1], [0, 0, 1, 1], [], []>} : vector<256x32xf32>, vector<32x128xf32>, vector<256x128xf32> -> vector<256x128xf32>
    %65 = arith.addf %59, %64 : vector<256x128xf32>
    %c1_79 = arith.constant 1 : index
    %c0_80 = arith.constant 0 : index
    %66 = vector.load %arg6[%c1_79, %c0_80] : memref<4x128xf32, #tpu.memory_space<vmem>>, vector<1x128xf32>
    %67 = vector.broadcast %66 : vector<1x128xf32> to vector<256x128xf32>
    %68 = arith.addf %65, %67 : vector<256x128xf32>
    %cst_81 = arith.constant 0.000000e+00 : f32
    %69 = vector.broadcast %cst_81 : f32 to vector<256x128xf32>
    %70 = arith.maximumf %68, %69 : vector<256x128xf32>
    %c128 = arith.constant 128 : index
    %c0_82 = arith.constant 0 : index
    %71 = vector.load %arg5[%c128, %c0_82] : memref<512x128xf32, #tpu.memory_space<vmem>>, vector<128x128xf32>
    %cst_83 = arith.constant dense<0.000000e+00> : vector<256x128xf32>
    %72 = tpu.matmul %70, %71, %cst_83 {dimension_numbers = #tpu.dot_dimension_numbers<[1], [0], [0], [1], [0, 0, 1, 1], [], []>} : vector<256x128xf32>, vector<128x128xf32>, vector<256x128xf32> -> vector<256x128xf32>
    %73 = arith.addf %14, %72 : vector<256x128xf32>
    %c0_84 = arith.constant 0 : index
    %c0_85 = arith.constant 0 : index
    %c0_86 = arith.constant 0 : index
    %74 = vector.load %arg9[%c0_84, %c0_85, %c0_86] : memref<24x24x32xf32, #tpu.memory_space<vmem>>, vector<16x16x32xf32>
    %75 = vector.shape_cast %74 : vector<16x16x32xf32> to vector<256x32xf32>
    %c1_87 = arith.constant 1 : index
    %c0_88 = arith.constant 0 : index
    %c0_89 = arith.constant 0 : index
    %c0_90 = arith.constant 0 : index
    %76 = vector.load %arg3[%c1_87, %c0_88, %c0_89, %c0_90] : memref<2x9x32x128xf32, #tpu.memory_space<vmem>>, vector<1x1x32x128xf32>
    %77 = vector.shape_cast %76 : vector<1x1x32x128xf32> to vector<32x128xf32>
    %cst_91 = arith.constant dense<0.000000e+00> : vector<256x128xf32>
    %78 = tpu.matmul %75, %77, %cst_91 {dimension_numbers = #tpu.dot_dimension_numbers<[1], [0], [0], [1], [0, 0, 1, 1], [], []>} : vector<256x32xf32>, vector<32x128xf32>, vector<256x128xf32> -> vector<256x128xf32>
    %c0_92 = arith.constant 0 : index
    %c4_93 = arith.constant 4 : index
    %c0_94 = arith.constant 0 : index
    %79 = vector.load %arg9[%c0_92, %c4_93, %c0_94] : memref<24x24x32xf32, #tpu.memory_space<vmem>>, vector<16x16x32xf32>
    %80 = vector.shape_cast %79 : vector<16x16x32xf32> to vector<256x32xf32>
    %c1_95 = arith.constant 1 : index
    %c1_96 = arith.constant 1 : index
    %c0_97 = arith.constant 0 : index
    %c0_98 = arith.constant 0 : index
    %81 = vector.load %arg3[%c1_95, %c1_96, %c0_97, %c0_98] : memref<2x9x32x128xf32, #tpu.memory_space<vmem>>, vector<1x1x32x128xf32>
    %82 = vector.shape_cast %81 : vector<1x1x32x128xf32> to vector<32x128xf32>
    %cst_99 = arith.constant dense<0.000000e+00> : vector<256x128xf32>
    %83 = tpu.matmul %80, %82, %cst_99 {dimension_numbers = #tpu.dot_dimension_numbers<[1], [0], [0], [1], [0, 0, 1, 1], [], []>} : vector<256x32xf32>, vector<32x128xf32>, vector<256x128xf32> -> vector<256x128xf32>
    %84 = arith.addf %78, %83 : vector<256x128xf32>
    %c0_100 = arith.constant 0 : index
    %c8_101 = arith.constant 8 : index
    %c0_102 = arith.constant 0 : index
    %85 = vector.load %arg9[%c0_100, %c8_101, %c0_102] : memref<24x24x32xf32, #tpu.memory_space<vmem>>, vector<16x16x32xf32>
    %86 = vector.shape_cast %85 : vector<16x16x32xf32> to vector<256x32xf32>
    %c1_103 = arith.constant 1 : index
    %c2_104 = arith.constant 2 : index
    %c0_105 = arith.constant 0 : index
    %c0_106 = arith.constant 0 : index
    %87 = vector.load %arg3[%c1_103, %c2_104, %c0_105, %c0_106] : memref<2x9x32x128xf32, #tpu.memory_space<vmem>>, vector<1x1x32x128xf32>
    %88 = vector.shape_cast %87 : vector<1x1x32x128xf32> to vector<32x128xf32>
    %cst_107 = arith.constant dense<0.000000e+00> : vector<256x128xf32>
    %89 = tpu.matmul %86, %88, %cst_107 {dimension_numbers = #tpu.dot_dimension_numbers<[1], [0], [0], [1], [0, 0, 1, 1], [], []>} : vector<256x32xf32>, vector<32x128xf32>, vector<256x128xf32> -> vector<256x128xf32>
    %90 = arith.addf %84, %89 : vector<256x128xf32>
    %c4_108 = arith.constant 4 : index
    %c0_109 = arith.constant 0 : index
    %c0_110 = arith.constant 0 : index
    %91 = vector.load %arg9[%c4_108, %c0_109, %c0_110] : memref<24x24x32xf32, #tpu.memory_space<vmem>>, vector<16x16x32xf32>
    %92 = vector.shape_cast %91 : vector<16x16x32xf32> to vector<256x32xf32>
    %c1_111 = arith.constant 1 : index
    %c3_112 = arith.constant 3 : index
    %c0_113 = arith.constant 0 : index
    %c0_114 = arith.constant 0 : index
    %93 = vector.load %arg3[%c1_111, %c3_112, %c0_113, %c0_114] : memref<2x9x32x128xf32, #tpu.memory_space<vmem>>, vector<1x1x32x128xf32>
    %94 = vector.shape_cast %93 : vector<1x1x32x128xf32> to vector<32x128xf32>
    %cst_115 = arith.constant dense<0.000000e+00> : vector<256x128xf32>
    %95 = tpu.matmul %92, %94, %cst_115 {dimension_numbers = #tpu.dot_dimension_numbers<[1], [0], [0], [1], [0, 0, 1, 1], [], []>} : vector<256x32xf32>, vector<32x128xf32>, vector<256x128xf32> -> vector<256x128xf32>
    %96 = arith.addf %90, %95 : vector<256x128xf32>
    %c1_116 = arith.constant 1 : index
    %c4_117 = arith.constant 4 : index
    %c0_118 = arith.constant 0 : index
    %c0_119 = arith.constant 0 : index
    %97 = vector.load %arg3[%c1_116, %c4_117, %c0_118, %c0_119] : memref<2x9x32x128xf32, #tpu.memory_space<vmem>>, vector<1x1x32x128xf32>
    %98 = vector.shape_cast %97 : vector<1x1x32x128xf32> to vector<32x128xf32>
    %cst_120 = arith.constant dense<0.000000e+00> : vector<256x128xf32>
    %99 = tpu.matmul %5, %98, %cst_120 {dimension_numbers = #tpu.dot_dimension_numbers<[1], [0], [0], [1], [0, 0, 1, 1], [], []>} : vector<256x32xf32>, vector<32x128xf32>, vector<256x128xf32> -> vector<256x128xf32>
    %100 = arith.addf %96, %99 : vector<256x128xf32>
    %c4_121 = arith.constant 4 : index
    %c8_122 = arith.constant 8 : index
    %c0_123 = arith.constant 0 : index
    %101 = vector.load %arg9[%c4_121, %c8_122, %c0_123] : memref<24x24x32xf32, #tpu.memory_space<vmem>>, vector<16x16x32xf32>
    %102 = vector.shape_cast %101 : vector<16x16x32xf32> to vector<256x32xf32>
    %c1_124 = arith.constant 1 : index
    %c5_125 = arith.constant 5 : index
    %c0_126 = arith.constant 0 : index
    %c0_127 = arith.constant 0 : index
    %103 = vector.load %arg3[%c1_124, %c5_125, %c0_126, %c0_127] : memref<2x9x32x128xf32, #tpu.memory_space<vmem>>, vector<1x1x32x128xf32>
    %104 = vector.shape_cast %103 : vector<1x1x32x128xf32> to vector<32x128xf32>
    %cst_128 = arith.constant dense<0.000000e+00> : vector<256x128xf32>
    %105 = tpu.matmul %102, %104, %cst_128 {dimension_numbers = #tpu.dot_dimension_numbers<[1], [0], [0], [1], [0, 0, 1, 1], [], []>} : vector<256x32xf32>, vector<32x128xf32>, vector<256x128xf32> -> vector<256x128xf32>
    %106 = arith.addf %100, %105 : vector<256x128xf32>
    %c8_129 = arith.constant 8 : index
    %c0_130 = arith.constant 0 : index
    %c0_131 = arith.constant 0 : index
    %107 = vector.load %arg9[%c8_129, %c0_130, %c0_131] : memref<24x24x32xf32, #tpu.memory_space<vmem>>, vector<16x16x32xf32>
    %108 = vector.shape_cast %107 : vector<16x16x32xf32> to vector<256x32xf32>
    %c1_132 = arith.constant 1 : index
    %c6_133 = arith.constant 6 : index
    %c0_134 = arith.constant 0 : index
    %c0_135 = arith.constant 0 : index
    %109 = vector.load %arg3[%c1_132, %c6_133, %c0_134, %c0_135] : memref<2x9x32x128xf32, #tpu.memory_space<vmem>>, vector<1x1x32x128xf32>
    %110 = vector.shape_cast %109 : vector<1x1x32x128xf32> to vector<32x128xf32>
    %cst_136 = arith.constant dense<0.000000e+00> : vector<256x128xf32>
    %111 = tpu.matmul %108, %110, %cst_136 {dimension_numbers = #tpu.dot_dimension_numbers<[1], [0], [0], [1], [0, 0, 1, 1], [], []>} : vector<256x32xf32>, vector<32x128xf32>, vector<256x128xf32> -> vector<256x128xf32>
    %112 = arith.addf %106, %111 : vector<256x128xf32>
    %c8_137 = arith.constant 8 : index
    %c4_138 = arith.constant 4 : index
    %c0_139 = arith.constant 0 : index
    %113 = vector.load %arg9[%c8_137, %c4_138, %c0_139] : memref<24x24x32xf32, #tpu.memory_space<vmem>>, vector<16x16x32xf32>
    %114 = vector.shape_cast %113 : vector<16x16x32xf32> to vector<256x32xf32>
    %c1_140 = arith.constant 1 : index
    %c7_141 = arith.constant 7 : index
    %c0_142 = arith.constant 0 : index
    %c0_143 = arith.constant 0 : index
    %115 = vector.load %arg3[%c1_140, %c7_141, %c0_142, %c0_143] : memref<2x9x32x128xf32, #tpu.memory_space<vmem>>, vector<1x1x32x128xf32>
    %116 = vector.shape_cast %115 : vector<1x1x32x128xf32> to vector<32x128xf32>
    %cst_144 = arith.constant dense<0.000000e+00> : vector<256x128xf32>
    %117 = tpu.matmul %114, %116, %cst_144 {dimension_numbers = #tpu.dot_dimension_numbers<[1], [0], [0], [1], [0, 0, 1, 1], [], []>} : vector<256x32xf32>, vector<32x128xf32>, vector<256x128xf32> -> vector<256x128xf32>
    %118 = arith.addf %112, %117 : vector<256x128xf32>
    %c8_145 = arith.constant 8 : index
    %c8_146 = arith.constant 8 : index
    %c0_147 = arith.constant 0 : index
    %119 = vector.load %arg9[%c8_145, %c8_146, %c0_147] : memref<24x24x32xf32, #tpu.memory_space<vmem>>, vector<16x16x32xf32>
    %120 = vector.shape_cast %119 : vector<16x16x32xf32> to vector<256x32xf32>
    %c1_148 = arith.constant 1 : index
    %c8_149 = arith.constant 8 : index
    %c0_150 = arith.constant 0 : index
    %c0_151 = arith.constant 0 : index
    %121 = vector.load %arg3[%c1_148, %c8_149, %c0_150, %c0_151] : memref<2x9x32x128xf32, #tpu.memory_space<vmem>>, vector<1x1x32x128xf32>
    %122 = vector.shape_cast %121 : vector<1x1x32x128xf32> to vector<32x128xf32>
    %cst_152 = arith.constant dense<0.000000e+00> : vector<256x128xf32>
    %123 = tpu.matmul %120, %122, %cst_152 {dimension_numbers = #tpu.dot_dimension_numbers<[1], [0], [0], [1], [0, 0, 1, 1], [], []>} : vector<256x32xf32>, vector<32x128xf32>, vector<256x128xf32> -> vector<256x128xf32>
    %124 = arith.addf %118, %123 : vector<256x128xf32>
    %c2_153 = arith.constant 2 : index
    %c0_154 = arith.constant 0 : index
    %125 = vector.load %arg6[%c2_153, %c0_154] : memref<4x128xf32, #tpu.memory_space<vmem>>, vector<1x128xf32>
    %126 = vector.broadcast %125 : vector<1x128xf32> to vector<256x128xf32>
    %127 = arith.addf %124, %126 : vector<256x128xf32>
    %cst_155 = arith.constant 0.000000e+00 : f32
    %128 = vector.broadcast %cst_155 : f32 to vector<256x128xf32>
    %129 = arith.maximumf %127, %128 : vector<256x128xf32>
    %c256 = arith.constant 256 : index
    %c0_156 = arith.constant 0 : index
    %130 = vector.load %arg5[%c256, %c0_156] : memref<512x128xf32, #tpu.memory_space<vmem>>, vector<128x128xf32>
    %cst_157 = arith.constant dense<0.000000e+00> : vector<256x128xf32>
    %131 = tpu.matmul %129, %130, %cst_157 {dimension_numbers = #tpu.dot_dimension_numbers<[1], [0], [0], [1], [0, 0, 1, 1], [], []>} : vector<256x128xf32>, vector<128x128xf32>, vector<256x128xf32> -> vector<256x128xf32>
    %132 = arith.addf %73, %131 : vector<256x128xf32>
    %cst_158 = arith.constant dense<0.000000e+00> : vector<32xf32>
    %133 = vector.multi_reduction <add>, %5, %cst_158 [0] : vector<256x32xf32> to vector<32xf32>
    %134 = vector.shape_cast %133 : vector<32xf32> to vector<1x32xf32>
    %cst_159 = arith.constant 2.560000e+02 : f32
    %135 = vector.broadcast %cst_159 : f32 to vector<1x32xf32>
    %136 = arith.divf %134, %135 : vector<1x32xf32>
    %c0_160 = arith.constant 0 : index
    %c0_161 = arith.constant 0 : index
    %137 = vector.load %arg4[%c0_160, %c0_161] : memref<32x128xf32, #tpu.memory_space<vmem>>, vector<32x128xf32>
    %cst_162 = arith.constant dense<0.000000e+00> : vector<1x128xf32>
    %138 = tpu.matmul %136, %137, %cst_162 {dimension_numbers = #tpu.dot_dimension_numbers<[1], [0], [0], [1], [0, 0, 1, 1], [], []>} : vector<1x32xf32>, vector<32x128xf32>, vector<1x128xf32> -> vector<1x128xf32>
    %c3_163 = arith.constant 3 : index
    %c0_164 = arith.constant 0 : index
    %139 = vector.load %arg6[%c3_163, %c0_164] : memref<4x128xf32, #tpu.memory_space<vmem>>, vector<1x128xf32>
    %140 = arith.addf %138, %139 : vector<1x128xf32>
    %cst_165 = arith.constant 0.000000e+00 : f32
    %141 = vector.broadcast %cst_165 : f32 to vector<1x128xf32>
    %142 = arith.maximumf %140, %141 : vector<1x128xf32>
    %c384 = arith.constant 384 : index
    %c0_166 = arith.constant 0 : index
    %143 = vector.load %arg5[%c384, %c0_166] : memref<512x128xf32, #tpu.memory_space<vmem>>, vector<128x128xf32>
    %cst_167 = arith.constant dense<0.000000e+00> : vector<1x128xf32>
    %144 = tpu.matmul %142, %143, %cst_167 {dimension_numbers = #tpu.dot_dimension_numbers<[1], [0], [0], [1], [0, 0, 1, 1], [], []>} : vector<1x128xf32>, vector<128x128xf32>, vector<1x128xf32> -> vector<1x128xf32>
    %145 = vector.broadcast %144 : vector<1x128xf32> to vector<256x128xf32>
    %146 = arith.addf %132, %145 : vector<256x128xf32>
    %c0_168 = arith.constant 0 : index
    %c0_169 = arith.constant 0 : index
    %147 = vector.load %arg7[%c0_168, %c0_169] : memref<1x128xf32, #tpu.memory_space<vmem>>, vector<1x128xf32>
    %148 = vector.broadcast %147 : vector<1x128xf32> to vector<256x128xf32>
    %149 = arith.addf %146, %148 : vector<256x128xf32>
    %cst_170 = arith.constant 0.000000e+00 : f32
    %150 = vector.broadcast %cst_170 : f32 to vector<256x128xf32>
    %151 = arith.maximumf %149, %150 : vector<256x128xf32>
    %c0_171 = arith.constant 0 : index
    %c0_172 = arith.constant 0 : index
    %c0_173 = arith.constant 0 : index
    %152 = vector.load %arg8[%c0_171, %c0_172, %c0_173] : memref<1x256x128xf32, #tpu.memory_space<vmem>>, vector<1x256x128xf32>
    %153 = vector.shape_cast %152 : vector<1x256x128xf32> to vector<256x128xf32>
    %154 = vector.shape_cast %151 : vector<256x128xf32> to vector<1x256x128xf32>
    tpu.vector_store %arg8[%c0_171, %c0_172, %c0_173], %154 {strides = array<i32>} : memref<1x256x128xf32, #tpu.memory_space<vmem>>, vector<1x256x128xf32>,
    return
  }
  func.func @transform_0(%arg0: i32) -> (i32, i32, i32, i32) {
    %c0_i32 = arith.constant 0 : i32
    %c0_i32_0 = arith.constant 0 : i32
    %c0_i32_1 = arith.constant 0 : i32
    %c0_i32_2 = arith.constant 0 : i32
    return %arg0, %c0_i32, %c0_i32_0, %c0_i32_1 : i32, i32, i32, i32
  }
  func.func @transform_1(%arg0: i32) -> (i32, i32) {
    %c0_i32 = arith.constant 0 : i32
    %c0_i32_0 = arith.constant 0 : i32
    %c0_i32_1 = arith.constant 0 : i32
    return %c0_i32, %c0_i32_0 : i32, i32
  }
  func.func @transform_2(%arg0: i32) -> (i32, i32, i32, i32) {
    %c0_i32 = arith.constant 0 : i32
    %c0_i32_0 = arith.constant 0 : i32
    %c0_i32_1 = arith.constant 0 : i32
    %c0_i32_2 = arith.constant 0 : i32
    %c0_i32_3 = arith.constant 0 : i32
    return %c0_i32, %c0_i32_0, %c0_i32_1, %c0_i32_2 : i32, i32, i32, i32
  }
  func.func @transform_3(%arg0: i32) -> (i32, i32) {
    %c0_i32 = arith.constant 0 : i32
    %c0_i32_0 = arith.constant 0 : i32
    %c0_i32_1 = arith.constant 0 : i32
    return %c0_i32, %c0_i32_0 : i32, i32
  }
  func.func @transform_4(%arg0: i32) -> (i32, i32) {
    %c0_i32 = arith.constant 0 : i32
    %c0_i32_0 = arith.constant 0 : i32
    %c0_i32_1 = arith.constant 0 : i32
    return %c0_i32, %c0_i32_0 : i32, i32
  }
  func.func @transform_5(%arg0: i32) -> (i32, i32) {
    %c0_i32 = arith.constant 0 : i32
    %c0_i32_0 = arith.constant 0 : i32
    %c0_i32_1 = arith.constant 0 : i32
    return %c0_i32, %c0_i32_0 : i32, i32
  }
  func.func @transform_6(%arg0: i32) -> (i32, i32) {
    %c0_i32 = arith.constant 0 : i32
    %c0_i32_0 = arith.constant 0 : i32
    %c0_i32_1 = arith.constant 0 : i32
    return %c0_i32, %c0_i32_0 : i32, i32
  }
  func.func @transform_7(%arg0: i32) -> (i32, i32, i32) {
    %c0_i32 = arith.constant 0 : i32
    %c0_i32_0 = arith.constant 0 : i32
    %c0_i32_1 = arith.constant 0 : i32
    return %arg0, %c0_i32, %c0_i32_0 : i32, i32, i32
  }
}

</mosaic_0001>

<bundles_post_ra>
// kernel: aspp_forward.1
= control target key start
LH: loop header
LB: loop body
LE: loop exit
PB: predicated region body
PF: predicated region fallthrough
CT: control target
= control target key end

     0   :  { %12 = vsyncpa [#allocation4], 0  ;;  %s15523_s0 = inlined_call_operand.vmem [shape: f32[2,16,16,32], index: 0, kind: input, shape index: {}]   ;;  %s15524_s1 = inlined_call_operand.vmem [shape: f32[32,128], index: 1, kind: input, shape index: {}]   ;;  %s15525_s2 = inlined_call_operand.vmem [shape: f32[2,9,32,128], index: 2, kind: input, shape index: {}]   ;;  %s15526_s3 = inlined_call_operand.vmem [shape: f32[32,128], index: 3, kind: input, shape index: {}]   ;;  %s15527_s4 = inlined_call_operand.vmem [shape: f32[512,128], index: 4, kind: input, shape index: {}]   ;;  %s15528_s5 = inlined_call_operand.vmem [shape: f32[4,128], index: 5, kind: input, shape index: {}]   ;;  %s15529_s6 = inlined_call_operand.vmem [shape: f32[1,128], index: 6, kind: input, shape index: {}]   ;;  %s15530_s7 = inlined_call_operand.hbm [shape: f32[2,256,128], index: 7, kind: output, shape index: {}]  }
   0x1   :  { %14 = vsyncpa [#allocation4 + $0x1], 0  ;;  %s12679_s24 = smov 0   ;;  %s12681_s25 = smov 0  }
   0x2   :  { %s12683_s26 = smov 0   ;;  %s12685_s27 = smov 0  }
   0x3 LB: > { %s12700_s28 = sadd.s32 4294967295, %s12631_s27   ;;  %s8759_s29 = sadd.s32 4294967294, %s12631_s27   ;;  %s12631_s27 = sphi %s12685_s27, %s15876_s27   ;;  %s12627_s26 = sphi %s12683_s26, %s15875_s26   ;;  %s12623_s25 = sphi %s12681_s25, %s15874_s25   ;;  %s12619_s24 = sphi %s12679_s24, %s15873_s24  }
   0x4   : > { %s12704_s30 = sadd.s32 1, %s12631_s27   ;;  %s179_s8 = sadd.s32 1, %s12627_s26 }
   0x5   : > { %s176_s9 = ssub.s32 %s12631_s27, %s12704_s30  ;;  %p189_p0 = scmp.ne.s32.totalorder %s12627_s26, %s12623_s25 }
   0x6   : > { %p177_p1 = scmp.eq.s32.totalorder %s176_s9, 0  ;;  %p190_p2 = scmp.eq.s32.totalorder %s12700_s28, 1 }
   0x7   : > { %p195_p3 = scmp.ne.s32.totalorder %s12623_s25, %s12619_s24  ;;  %p196_p4 = scmp.eq.s32.totalorder %s8759_s29, 1 }
   0x8   : > { %s12715_s10 = scalar_select %p177_p1, %s12627_s26, %s179_s8  }
   0x9   : > { %p12717_p5 = por %p190_p2, %p189_p0  ;;  %p12721_p6 = por %p196_p4, %p195_p3 }
   0xa   : > { %p8762_p7 = scmp.ge.s32.totalorder %s12631_s27, 1  ;;  %p240_p8 = scmp.lt.s32.totalorder %s12631_s27, 3 }
   0xc   : > { %p241_p9 = pnand %p8762_p7, %p240_p8 }
   0xe   : > { %244 = sbr.rel (%p241_p9) target bundleno = 1375 (0x55f), region = 48 }
  0x15   : > { %v415_v0 = vld [vmem:[%s15524_s1] sm:$0xff]  ;;  %v416_v1 = vld [vmem:[%s15524_s1 + $0x8] sm:$0xff]  ;;  %p272_p10 = scmp.lt.s32.totalorder %s12700_s28, 1  ;;  %vm277_vm0 = vcmask 261120   ;;  %v12749_v5 = vld [vmem:[%s15524_s1 + $0x10] sm:$0xff]  ;;  %v15531_v7 = vmov 0.0  }
  0x16   : > { %v12736_v2 = vld [vmem:[%s15525_s2 + $0x20] sm:$0xff]  ;;  %v12739_v3 = vpack.c.bf16 %v416_v1, %v415_v0  ;;  %v12744_v4 = vld [vmem:[%s15525_s2 + $0x28] sm:$0xff]  ;;  %v12754_v6 = vld [vmem:[%s15524_s1 + $0x18] sm:$0xff]  ;;  %290 = vst.msk [vmem:[#allocation2 + $0x60] sm:$0xff] %vm277_vm0, %v15531_v7  ;;  %vm12635_vm1 = vmmov 0   ;;  %s269_s13 = sand.u32 1, %s12623_s25  }
  0x17   : > { %291 = vst.msk [vmem:[#allocation2 + $0x68] sm:$0xff] %vm277_vm0, %v15531_v7  ;;  %278 = vst.msk [vmem:[#allocation2] sm:$0xff] %vm277_vm0, %v15531_v7  ;;  %v11662_v8 = vpack.c.bf16 %v12744_v4, %v12736_v2  ;;  %v11658_v9 = vpack.c.bf16 %v12754_v6, %v12749_v5  ;;  %v8801_v10 = vld [vmem:[%s15525_s2 + $0x30] sm:$0xff]  ;;  %v8802_v11 = vld [vmem:[%s15525_s2 + $0x38] sm:$0xff]  ;;  %s273_s15 = scalar_select %p272_p10, %s12700_s28, 1 }
  0x18   : > { %279 = vst.msk [vmem:[#allocation2 + $0x8] sm:$0xff] %vm277_vm0, %v15531_v7  ;;  %280 = vst.msk [vmem:[#allocation2 + $0x10] sm:$0xff] %vm277_vm0, %v15531_v7  ;;  %11655 = vmatprep.subr.bf16.mxu0 %v12739_v3  ;;  %v11666_v12 = vpack.c.bf16 %v8802_v11, %v8801_v10  ;;  %v826_v13 = vld [vmem:[%s15525_s2] sm:$0xff]  ;;  %v827_v14 = vld [vmem:[%s15525_s2 + $0x8] sm:$0xff]  ;;  %s8763_s14 = sshll.u32 %s269_s13, 8  ;;  %s9453_s16 = sshll.u32 %s12700_s28, 12 }
  0x19   : > { %281 = vst.msk [vmem:[#allocation2 + $0x18] sm:$0xff] %vm277_vm0, %v15531_v7  ;;  %282 = vst.msk [vmem:[#allocation2 + $0x20] sm:$0xff] %vm277_vm0, %v15531_v7  ;;  %11663 = vmatprep.subr.bf16.mxu1 %v11662_v8  ;;  %11657 = vmatpush3.bf16.msra.mxu0 %v12739_v3  ;;  %s9452_s20 = sshll.u32 %s273_s15, 8  ;;  %v828_v15 = vld [vmem:[%s15525_s2 + $0x10] sm:$0xff]  ;;  %v829_v16 = vld [vmem:[%s15525_s2 + $0x18] sm:$0xff]  ;;  %v11670_v19 = vpack.c.bf16 %v827_v14, %v826_v13  ;;  %s15421_s15 = scalar_lea.vmem [#allocation3], %s8763_s14 }
  0x1a   : > { %283 = vst.msk [vmem:[#allocation2 + $0x28] sm:$0xff] %vm277_vm0, %v15531_v7  ;;  %284 = vst.msk [vmem:[#allocation2 + $0x30] sm:$0xff] %vm277_vm0, %v15531_v7  ;;  %11665 = vmatpush3.bf16.msra.mxu1 %v11662_v8  ;;  %11659 = vmatprep.subr.bf16.mxu0 %v11658_v9  ;;  %s12924_s23 = scalar_lea.vmem %s15523_s0, %s9452_s20  ;;  %v8867_v29 = vld [vmem:[%s15525_s2 + $0x40] sm:$0xff]  ;;  %v8868_v30 = vld [vmem:[%s15525_s2 + $0x48] sm:$0xff]  ;;  %v11674_v34 = vpack.c.bf16 %v829_v16, %v828_v15  ;;  %s8697_s17 = sshll.u32 %s15421_s15, 4  ;;  %s15462_s17 = int_to_ptr.vmem [resolvable:$true] %s8697_s17 }
  0x1b   : > { %285 = vst.msk [vmem:[#allocation2 + $0x38] sm:$0xff] %vm277_vm0, %v15531_v7  ;;  %286 = vst.msk [vmem:[#allocation2 + $0x40] sm:$0xff] %vm277_vm0, %v15531_v7  ;;  %11667 = vmatprep.subr.bf16.mxu1 %v11666_v12  ;;  %v12933_v17 = vld [vmem:[%s12924_s23] sm:$0xff]  ;;  %v12936_v18 = vld [vmem:[%s12924_s23 + $0x8] sm:$0xff]  ;;  %v13047_v46 = vpack.c.bf16 %v8868_v30, %v8867_v29  ;;  %s15482_s19 = scalar_lea.sflag [#allocation4], %s269_s13  ;;  %s12569_s20 = scalar_lea.vmem %s15462_s17, 4096 }
  0x1c   : > { %287 = vst.msk [vmem:[#allocation2 + $0x48] sm:$0xff] %vm277_vm0, %v15531_v7  ;;  %288 = vst.msk [vmem:[#allocation2 + $0x50] sm:$0xff] %vm277_vm0, %v15531_v7  ;;  %v12939_v20 = vld [vmem:[%s12924_s23 + $0x10] sm:$0xff]  ;;  %10312 = vmatprep.mubr.msk.f32.mxu0 %vm277_vm0, %v12933_v17  ;;  %v12950_v21 = vld [vmem:[%s12924_s23 + $0x18] sm:$0xff]  ;;  %p12570_p11 = scmp.ne.s32.totalorder %s15462_s17, %s12569_s20  ;;  %s12636_s21 = smov [#allocation3]  }
  0x1d   : > { %289 = vst.msk [vmem:[#allocation2 + $0x58] sm:$0xff] %vm277_vm0, %v15531_v7  ;;  %292 = vst.msk [vmem:[#allocation2 + $0x70] sm:$0xff] %vm277_vm0, %v15531_v7  ;;  %v12953_v22 = vld [vmem:[%s12924_s23 + $0x20] sm:$0xff]  ;;  %v12956_v23 = vld [vmem:[%s12924_s23 + $0x28] sm:$0xff]  ;;  %11661 = vmatpush3.bf16.msra.mxu0 %v11658_v9  ;;  %s12573_s22 = sshll.u32 %s12636_s21, 4  ;;  %s12574_s22 = int_to_ptr.vmem [resolvable:$false] %s12573_s22 }
  0x1e   : > { %293 = vst.msk [vmem:[#allocation2 + $0x78] sm:$0xff] %vm277_vm0, %v15531_v7  ;;  %294 = vst.msk [vmem:[#allocation2 + $0x80] sm:$0xff] %vm277_vm0, %v15531_v7  ;;  %11669 = vmatpush3.bf16.msra.mxu1 %v11666_v12  ;;  %v12966_v27 = vld [vmem:[%s12924_s23 + $0x30] sm:$0xff]  ;;  %v12969_v28 = vld [vmem:[%s12924_s23 + $0x38] sm:$0xff]  ;;  %p12571_p12 = pnand %p12570_p11, %p12717_p5  ;;  %s12575_s29 = scalar_lea.vmem %s12574_s22, 8192 }
  0x1f   : > { %295 = vst.msk [vmem:[#allocation2 + $0x88] sm:$0xff] %vm277_vm0, %v15531_v7  ;;  %296 = vst.msk [vmem:[#allocation2 + $0x90] sm:$0xff] %vm277_vm0, %v15531_v7  ;;  %11671 = vmatprep.subr.bf16.mxu1 %v11670_v19  ;;  %v12982_v31 = vld [vmem:[%s12924_s23 + $0x40] sm:$0xff]  ;;  %v12985_v32 = vld [vmem:[%s12924_s23 + $0x48] sm:$0xff]  ;;  %p12576_p0 = scmp.lt.s32.totalorder %s15462_s17, %s12574_s22  ;;  %p12577_p1 = scmp.lt.s32.totalorder %s12575_s29, %s12569_s20 }
  0x20   : > { %297 = vst.msk [vmem:[#allocation2 + $0x98] sm:$0xff] %vm277_vm0, %v15531_v7  ;;  %298 = vst.msk [vmem:[#allocation2 + $0xa0] sm:$0xff] %vm277_vm0, %v15531_v7  ;;  %v12988_v33 = vld [vmem:[%s12924_s23 + $0x50] sm:$0xff]  ;;  %10313 = vmatmul.mubr.msk.f32.vlgmr.msra.gmra.mrb[0].mxu0 %vm277_vm0, %v12936_v18  ;;  %v12995_v36 = vld [vmem:[%s12924_s23 + $0x58] sm:$0xff]  ;;  %p12572_p13 = pneg %p12571_p12 }
  0x21   : > { %299 = vst.msk [vmem:[#allocation2 + $0xa8] sm:$0xff] %vm277_vm0, %v15531_v7  ;;  %300 = vst.msk [vmem:[#allocation2 + $0xb0] sm:$0xff] %vm277_vm0, %v15531_v7  ;;  %v12998_v37 = vld [vmem:[%s12924_s23 + $0x60] sm:$0xff]  ;;  %v13001_v38 = vld [vmem:[%s12924_s23 + $0x68] sm:$0xff]  ;;  %10315 = vmatprep.mubr.msk.f32.mxu0 %vm277_vm0, %v12939_v20  ;;  %p12578_p2 = por %p12577_p1, %p12576_p0 }
  0x22   : > { %301 = vst.msk [vmem:[#allocation2 + $0xb8] sm:$0xff] %vm277_vm0, %v15531_v7  ;;  %302 = vst.msk [vmem:[#allocation2 + $0xc0] sm:$0xff] %vm277_vm0, %v15531_v7  ;;  %v830_v24 = vld [vmem:[#allocation2 + $0x34] sm:$0xff]  ;;  %v831_v25 = vld [vmem:[#allocation2 + $0x3c] sm:$0xff] }
  0x23   : > { %303 = vst.msk [vmem:[#allocation2 + $0xc8] sm:$0xff] %vm277_vm0, %v15531_v7  ;;  %304 = vst.msk [vmem:[#allocation2 + $0xd0] sm:$0xff] %vm277_vm0, %v15531_v7  ;;  %10368 = vmatprep.mubr.msk.f32.mxu1 %vm277_vm0, %v830_v24  ;;  %v832_v26 = vld [vmem:[#allocation2 + $0x4c] sm:$0xff]  ;;  %v13014_v40 = vld [vmem:[%s12924_s23 + $0x78] sm:$0xff]  ;;  %p12579_p3 = pnand %p12578_p2, %p12572_p13 }
  0x24   : > { %305 = vst.msk [vmem:[#allocation2 + $0xd8] sm:$0xff] %vm277_vm0, %v15531_v7  ;;  %306 = vst.msk [vmem:[#allocation2 + $0xe0] sm:$0xff] %vm277_vm0, %v15531_v7  ;;  %v833_v35 = vld [vmem:[#allocation2 + $0x54] sm:$0xff]  ;;  %10369 = vmatmul.mubr.msk.f32.vlgmr.msra.gmra.mrb[0].mxu1 %vm277_vm0, %v831_v25  ;;  %v13017_v41 = vld [vmem:[%s12924_s23 + $0x80] sm:$0xff]  ;;  %10316 = vmatmul.mubr.msk.f32.gmra.mrb[2].mxu0 %vm277_vm0, %v12950_v21 }
  0x25   : > { %307 = vst.msk [vmem:[#allocation2 + $0xe8] sm:$0xff] %vm277_vm0, %v15531_v7  ;;  %308 = vst.msk [vmem:[#allocation2 + $0xf0] sm:$0xff] %vm277_vm0, %v15531_v7  ;;  %v13011_v39 = vld [vmem:[%s12924_s23 + $0x70] sm:$0xff]  ;;  %11673 = vmatpush3.bf16.msra.mxu1 %v11670_v19  ;;  %10371 = vmatprep.mubr.msk.f32.mxu1 %vm277_vm0, %v832_v26  ;;  %v13027_v42 = vld [vmem:[%s12924_s23 + $0x88] sm:$0xff] }
  0x26   : > { %309 = vst.msk [vmem:[#allocation2 + $0xf8] sm:$0xff] %vm277_vm0, %v15531_v7  ;;  %310 = vst.msk [vmem:[#allocation2 + $0x100] sm:$0xff] %vm277_vm0, %v15531_v7  ;;  %v13030_v43 = vld [vmem:[%s12924_s23 + $0x90] sm:$0xff]  ;;  %v13039_v44 = vld [vmem:[%s12924_s23 + $0x98] sm:$0xff]  ;;  %11675 = vmatprep.subr.bf16.mxu1 %v11674_v34  ;;  %10318 = vmatprep.mubr.msk.f32.mxu0 %vm277_vm0, %v12953_v22 }
  0x27   : > { %311 = vst.msk [vmem:[#allocation2 + $0x108] sm:$0xff] %vm277_vm0, %v15531_v7  ;;  %312 = vst.msk [vmem:[#allocation2 + $0x110] sm:$0xff] %vm277_vm0, %v15531_v7  ;;  %v13055_v47 = vld [vmem:[%s12924_s23 + $0xa0] sm:$0xff]  ;;  %v13058_v48 = vld [vmem:[%s12924_s23 + $0xa8] sm:$0xff] }
  0x28   : > { %313 = vst.msk [vmem:[#allocation2 + $0x118] sm:$0xff] %vm277_vm0, %v15531_v7  ;;  %314 = vst.msk [vmem:[#allocation2 + $0x120] sm:$0xff] %vm277_vm0, %v15531_v7  ;;  %10372 = vmatmul.mubr.msk.f32.gmra.mrb[2].mxu1 %vm277_vm0, %v833_v35  ;;  %v13061_v49 = vld [vmem:[%s12924_s23 + $0xb0] sm:$0xff]  ;;  %v13071_v51 = vld [vmem:[%s12924_s23 + $0xb8] sm:$0xff]  ;;  %10319 = vmatmul.mubr.msk.f32.gmra.mrb[4].mxu0 %vm277_vm0, %v12956_v23 }
  0x29   : > { %315 = vst.msk [vmem:[#allocation2 + $0x128] sm:$0xff] %vm277_vm0, %v15531_v7  ;;  %316 = vst.msk [vmem:[#allocation2 + $0x130] sm:$0xff] %vm277_vm0, %v15531_v7  ;;  %11677 = vmatpush3.bf16.msra.mxu1 %v11674_v34  ;;  %10321 = vmatprep.mubr.msk.f32.mxu0 %vm277_vm0, %v12966_v27  ;;  %v13083_v55 = vld [vmem:[%s12924_s23 + $0xc0] sm:$0xff]  ;;  %v13086_v56 = vld [vmem:[%s12924_s23 + $0xc8] sm:$0xff] }
  0x2a   : > { %317 = vst.msk [vmem:[#allocation2 + $0x138] sm:$0xff] %vm277_vm0, %v15531_v7  ;;  %318 = vst.msk [vmem:[#allocation2 + $0x140] sm:$0xff] %vm277_vm0, %v15531_v7  ;;  %11679 = vmatprep.subr.bf16.mxu1 %v13047_v46  ;;  %v13089_v57 = vld [vmem:[%s12924_s23 + $0xd0] sm:$0xff]  ;;  %v13100_v58 = vld [vmem:[%s12924_s23 + $0xd8] sm:$0xff] }
  0x2b   : > { %319 = vst.msk [vmem:[#allocation2 + $0x148] sm:$0xff] %vm277_vm0, %v15531_v7  ;;  %320 = vst.msk [vmem:[#allocation2 + $0x150] sm:$0xff] %vm277_vm0, %v15531_v7  ;;  %v777_v15 = vld [vmem:[%s15527_s4] sm:$0xff]  ;;  %v778_v16 = vld [vmem:[%s15527_s4 + $0x8] sm:$0xff] }
  0x2c   : > { %321 = vst.msk [vmem:[#allocation2 + $0x158] sm:$0xff] %vm277_vm0, %v15531_v7  ;;  %322 = vst.msk [vmem:[#allocation2 + $0x160] sm:$0xff] %vm277_vm0, %v15531_v7  ;;  %10322 = vmatmul.mubr.msk.f32.gmra.mrb[6].mxu0 %vm277_vm0, %v12969_v28  ;;  %v13224_v24 = vpack.c.bf16 %v778_v16, %v777_v15  ;;  %v779_v30 = vld [vmem:[%s15527_s4 + $0x10] sm:$0xff]  ;;  %v780_v34 = vld [vmem:[%s15527_s4 + $0x18] sm:$0xff] }
  0x2d   : > { %323 = vst.msk [vmem:[#allocation2 + $0x168] sm:$0xff] %vm277_vm0, %v15531_v7  ;;  %324 = vst.msk [vmem:[#allocation2 + $0x170] sm:$0xff] %vm277_vm0, %v15531_v7  ;;  %10324 = vmatprep.mubr.msk.f32.mxu0 %vm277_vm0, %v12982_v31  ;;  %v794_v35 = vld [vmem:[#allocation2 + $0x32] sm:$0xff]  ;;  %v8903_v16 = vld [vmem:[%s15525_s2 + $0x60] sm:$0xff] }
  0x2e   : > { %325 = vst.msk [vmem:[#allocation2 + $0x178] sm:$0xff] %vm277_vm0, %v15531_v7  ;;  %326 = vst.msk [vmem:[#allocation2 + $0x180] sm:$0xff] %vm277_vm0, %v15531_v7  ;;  %11767 = vmatprep.subr.bf16.mxu0 %v13224_v24 }
  0x2f   : > { %327 = vst.msk [vmem:[#allocation2 + $0x188] sm:$0xff] %vm277_vm0, %v15531_v7  ;;  %328 = vst.msk [vmem:[#allocation2 + $0x190] sm:$0xff] %vm277_vm0, %v15531_v7  ;;  %11769 = vmatpush3.bf16.msra.mxu0 %v13224_v24 }
  0x30   : > { %329 = vst.msk [vmem:[#allocation2 + $0x198] sm:$0xff] %vm277_vm0, %v15531_v7  ;;  %330 = vst.msk [vmem:[#allocation2 + $0x1a0] sm:$0xff] %vm277_vm0, %v15531_v7  ;;  %10325 = vmatmul.mubr.msk.f32.gmra.mrb[8].mxu0 %vm277_vm0, %v12985_v32 }
  0x31   : > { %331 = vst.msk [vmem:[#allocation2 + $0x1a8] sm:$0xff] %vm277_vm0, %v15531_v7  ;;  %332 = vst.msk [vmem:[#allocation2 + $0x1b0] sm:$0xff] %vm277_vm0, %v15531_v7  ;;  %10327 = vmatprep.mubr.msk.f32.mxu0 %vm277_vm0, %v12988_v33 }
  0x32   : > { %333 = vst.msk [vmem:[#allocation2 + $0x1b8] sm:$0xff] %vm277_vm0, %v15531_v7  ;;  %334 = vst.msk [vmem:[#allocation2 + $0x1c0] sm:$0xff] %vm277_vm0, %v15531_v7 }
  0x33   : > { %335 = vst.msk [vmem:[#allocation2 + $0x1c8] sm:$0xff] %vm277_vm0, %v15531_v7  ;;  %336 = vst.msk [vmem:[#allocation2 + $0x1d0] sm:$0xff] %vm277_vm0, %v15531_v7 }
  0x34   : > { %337 = vst.msk [vmem:[#allocation2 + $0x1d8] sm:$0xff] %vm277_vm0, %v15531_v7  ;;  %338 = vst.msk [vmem:[#allocation2 + $0x1e0] sm:$0xff] %vm277_vm0, %v15531_v7  ;;  %10328 = vmatmul.mubr.msk.f32.gmra.mrb[10].mxu0 %vm277_vm0, %v12995_v36 }
  0x35   : > { %339 = vst.msk [vmem:[#allocation2 + $0x1e8] sm:$0xff] %vm277_vm0, %v15531_v7  ;;  %340 = vst.msk [vmem:[#allocation2 + $0x1f0] sm:$0xff] %vm277_vm0, %v15531_v7  ;;  %10330 = vmatprep.mubr.msk.f32.mxu0 %vm277_vm0, %v12998_v37 }
  0x36   : > { %341 = vst.msk [vmem:[#allocation2 + $0x1f8] sm:$0xff] %vm277_vm0, %v15531_v7  ;;  %342 = vst.msk [vmem:[#allocation2 + $0x200] sm:$0xff] %vm277_vm0, %v15531_v7 }
  0x37   : > { %343 = vst.msk [vmem:[#allocation2 + $0x208] sm:$0xff] %vm277_vm0, %v15531_v7  ;;  %344 = vst.msk [vmem:[#allocation2 + $0x210] sm:$0xff] %vm277_vm0, %v15531_v7 }
  0x38   : > { %345 = vst.msk [vmem:[#allocation2 + $0x218] sm:$0xff] %vm277_vm0, %v15531_v7  ;;  %346 = vst.msk [vmem:[#allocation2 + $0x220] sm:$0xff] %vm277_vm0, %v15531_v7  ;;  %10331 = vmatmul.mubr.msk.f32.gmra.mrb[12].mxu0 %vm277_vm0, %v13001_v38 }
  0x39   : > { %347 = vst.msk [vmem:[#allocation2 + $0x228] sm:$0xff] %vm277_vm0, %v15531_v7  ;;  %348 = vst.msk [vmem:[#allocation2 + $0x230] sm:$0xff] %vm277_vm0, %v15531_v7  ;;  %10333 = vmatprep.mubr.msk.f32.mxu0 %vm277_vm0, %v13011_v39 }
  0x3a   : > { %349 = vst.msk [vmem:[#allocation2 + $0x238] sm:$0xff] %vm277_vm0, %v15531_v7  ;;  %383 = vst.msk [vmem:[#allocation2 + $0x64] sm:$0xff] %vm277_vm0, %v12933_v17  ;;  %v789_v7 = vld [vmem:[%s15527_s4 + $0x60] sm:$0xff] }
  0x3b   : > { %384 = vst.msk [vmem:[#allocation2 + $0x6c] sm:$0xff] %vm277_vm0, %v12936_v18  ;;  %385 = vst.msk [vmem:[#allocation2 + $0x7c] sm:$0xff] %vm277_vm0, %v12939_v20 }
  0x3c   : > { %386 = vst.msk [vmem:[#allocation2 + $0x84] sm:$0xff] %vm277_vm0, %v12950_v21  ;;  %387 = vst.msk [vmem:[#allocation2 + $0x94] sm:$0xff] %vm277_vm0, %v12953_v22  ;;  %10334 = vmatmul.mubr.msk.f32.gmra.mrb[14].mxu0 %vm277_vm0, %v13014_v40 }
  0x3d   : > { %388 = vst.msk [vmem:[#allocation2 + $0x9c] sm:$0xff] %vm277_vm0, %v12956_v23  ;;  %389 = vst.msk [vmem:[#allocation2 + $0xac] sm:$0xff] %vm277_vm0, %v12966_v27  ;;  %10336 = vmatprep.mubr.msk.f32.mxu0 %vm277_vm0, %v13017_v41 }
  0x3e   : > { %390 = vst.msk [vmem:[#allocation2 + $0xb4] sm:$0xff] %vm277_vm0, %v12969_v28  ;;  %391 = vst.msk [vmem:[#allocation2 + $0xc4] sm:$0xff] %vm277_vm0, %v12982_v31 }
  0x3f   : > { %392 = vst.msk [vmem:[#allocation2 + $0xcc] sm:$0xff] %vm277_vm0, %v12985_v32  ;;  %393 = vst.msk [vmem:[#allocation2 + $0xdc] sm:$0xff] %vm277_vm0, %v12988_v33 }
  0x40   : > { %15644 = vst [vmem:[#allocation6_spill] sm:$0xff] %v13011_v39  ;;  %15645 = vst [vmem:[#allocation7_spill] sm:$0xff] %v13014_v40  ;;  %10337 = vmatmul.mubr.msk.f32.gmra.mrb[16].mxu0 %vm277_vm0, %v13027_v42 }
  0x41   : > { %15646 = vst [vmem:[#allocation8_spill] sm:$0xff] %v13017_v41  ;;  %394 = vst.msk [vmem:[#allocation2 + $0xe4] sm:$0xff] %vm277_vm0, %v12995_v36  ;;  %v834_v45 = vld [vmem:[#allocation2 + $0x64] sm:$0xff]  ;;  %10339 = vmatprep.mubr.msk.f32.mxu0 %vm277_vm0, %v13030_v43 }
  0x42   : > { %395 = vst.msk [vmem:[#allocation2 + $0xf4] sm:$0xff] %vm277_vm0, %v12998_v37  ;;  %396 = vst.msk [vmem:[#allocation2 + $0xfc] sm:$0xff] %vm277_vm0, %v13001_v38  ;;  %10374 = vmatprep.mubr.msk.f32.mxu1 %vm277_vm0, %v834_v45  ;;  %v835_v50 = vld [vmem:[#allocation2 + $0x6c] sm:$0xff]  ;;  %v836_v52 = vld [vmem:[#allocation2 + $0x7c] sm:$0xff]  ;;  %v13241_v45 = vpack.c.bf16 %v780_v34, %v779_v30 }
  0x43   : > { %15647 = vst [vmem:[#allocation9_spill] sm:$0xff] %v13027_v42  ;;  %15648 = vst [vmem:[#allocation10_spill] sm:$0xff] %v13030_v43  ;;  %10375 = vmatmul.mubr.msk.f32.gmra.mrb[4].mxu1 %vm277_vm0, %v835_v50  ;;  %v837_v53 = vld [vmem:[#allocation2 + $0x84] sm:$0xff]  ;;  %v838_v54 = vld [vmem:[#allocation2 + $0x94] sm:$0xff] }
  0x44   : > { %397 = vst.msk [vmem:[#allocation2 + $0x10c] sm:$0xff] %vm277_vm0, %v13011_v39  ;;  %398 = vst.msk [vmem:[#allocation2 + $0x114] sm:$0xff] %vm277_vm0, %v13014_v40  ;;  %10377 = vmatprep.mubr.msk.f32.mxu1 %vm277_vm0, %v836_v52  ;;  %v13108_v59 = vld [vmem:[#allocation2 + $0x9c] sm:$0xff]  ;;  %v13110_v60 = vld [vmem:[#allocation2 + $0xac] sm:$0xff]  ;;  %10340 = vmatmul.mubr.msk.f32.gmra.mrb[18].mxu0 %vm277_vm0, %v13039_v44 }
  0x45   : > { %399 = vst.msk [vmem:[#allocation2 + $0x124] sm:$0xff] %vm277_vm0, %v13017_v41  ;;  %15649 = vst [vmem:[#allocation11_spill] sm:$0xff] %v13039_v44  ;;  %v13120_v61 = vld [vmem:[#allocation2 + $0xb4] sm:$0xff]  ;;  %v13122_v62 = vld [vmem:[#allocation2 + $0xc4] sm:$0xff]  ;;  %10342 = vmatprep.mubr.msk.f32.mxu0 %vm277_vm0, %v13055_v47  ;;  %11771 = vmatprep.subr.bf16.mxu0 %v13241_v45 }
  0x46   : > { %400 = vst.msk [vmem:[#allocation2 + $0x12c] sm:$0xff] %vm277_vm0, %v13027_v42  ;;  %401 = vst.msk [vmem:[#allocation2 + $0x13c] sm:$0xff] %vm277_vm0, %v13030_v43  ;;  %v13132_v63 = vld [vmem:[#allocation2 + $0xcc] sm:$0xff]  ;;  %v13134_v0 = vld [vmem:[#allocation2 + $0xdc] sm:$0xff]  ;;  %11773 = vmatpush3.bf16.msra.mxu0 %v13241_v45 }
  0x47   : > { %402 = vst.msk [vmem:[#allocation2 + $0x144] sm:$0xff] %vm277_vm0, %v13039_v44  ;;  %15650 = vst [vmem:[#allocation12_spill] sm:$0xff] %v13055_v47  ;;  %10378 = vmatmul.mubr.msk.f32.gmra.mrb[6].mxu1 %vm277_vm0, %v837_v53  ;;  %v8869_v50 = vld [vmem:[%s15525_s2 + $0x50] sm:$0xff]  ;;  %v8870_v52 = vld [vmem:[%s15525_s2 + $0x58] sm:$0xff] }
  0x48   : > { %15651 = vst [vmem:[#allocation13_spill] sm:$0xff] %v13058_v48  ;;  %15652 = vst [vmem:[#allocation14_spill] sm:$0xff] %v13061_v49  ;;  %10380 = vmatprep.mubr.msk.f32.mxu1 %vm277_vm0, %v838_v54  ;;  %v13144_v1 = vld [vmem:[#allocation2 + $0xe4] sm:$0xff]  ;;  %10343 = vmatmul.mubr.msk.f32.gmra.mrb[20].mxu0 %vm277_vm0, %v13058_v48  ;;  %v795_v53 = vld [vmem:[#allocation2 + $0x3a] sm:$0xff]  ;;  %v11682_v15 = vpack.c.bf16 %v8870_v52, %v8869_v50 }
  0x49   : > { %403 = vst.msk [vmem:[#allocation2 + $0x154] sm:$0xff] %vm277_vm0, %v13055_v47  ;;  %404 = vst.msk [vmem:[#allocation2 + $0x15c] sm:$0xff] %vm277_vm0, %v13058_v48  ;;  %v13146_v2 = vld [vmem:[#allocation2 + $0xf4] sm:$0xff]  ;;  %v13156_v3 = vld [vmem:[#allocation2 + $0xfc] sm:$0xff]  ;;  %10345 = vmatprep.mubr.msk.f32.mxu0 %vm277_vm0, %v13061_v49 }
  0x4a   : > { %405 = vst.msk [vmem:[#allocation2 + $0x16c] sm:$0xff] %vm277_vm0, %v13061_v49  ;;  %15653 = vst [vmem:[#allocation15_spill] sm:$0xff] %v13071_v51  ;;  %v796_v54 = vld [vmem:[#allocation2 + $0x4a] sm:$0xff]  ;;  %v797_v30 = vld [vmem:[#allocation2 + $0x52] sm:$0xff] }
  0x4b   : > { %406 = vst.msk [vmem:[#allocation2 + $0x174] sm:$0xff] %vm277_vm0, %v13071_v51  ;;  %15654 = vst [vmem:[#allocation16_spill] sm:$0xff] %v13083_v55  ;;  %10381 = vmatmul.mubr.msk.f32.gmra.mrb[8].mxu1 %vm277_vm0, %v13108_v59  ;;  %v13158_v4 = vld [vmem:[#allocation2 + $0x10c] sm:$0xff]  ;;  %v13168_v5 = vld [vmem:[#allocation2 + $0x114] sm:$0xff] }
  0x4c   : > { %15655 = vst [vmem:[#allocation17_spill] sm:$0xff] %v13086_v56  ;;  %15656 = vst [vmem:[#allocation18_spill] sm:$0xff] %v13089_v57  ;;  %10383 = vmatprep.mubr.msk.f32.mxu1 %vm277_vm0, %v13110_v60  ;;  %v13170_v6 = vld [vmem:[#allocation2 + $0x124] sm:$0xff]  ;;  %10346 = vmatmul.mubr.msk.f32.gmra.mrb[22].mxu0 %vm277_vm0, %v13071_v51  ;;  %v783_v50 = vld [vmem:[%s15527_s4 + $0x30] sm:$0xff] }
  0x4d   : > { %407 = vst.msk [vmem:[#allocation2 + $0x184] sm:$0xff] %vm277_vm0, %v13083_v55  ;;  %408 = vst.msk [vmem:[#allocation2 + $0x18c] sm:$0xff] %vm277_vm0, %v13086_v56  ;;  %v13180_v8 = vld [vmem:[#allocation2 + $0x12c] sm:$0xff]  ;;  %v13182_v9 = vld [vmem:[#allocation2 + $0x13c] sm:$0xff]  ;;  %10348 = vmatprep.mubr.msk.f32.mxu0 %vm277_vm0, %v13083_v55 }
  0x4e   : > { %409 = vst.msk [vmem:[#allocation2 + $0x19c] sm:$0xff] %vm277_vm0, %v13089_v57  ;;  %15657 = vst [vmem:[#allocation19_spill] sm:$0xff] %v13100_v58  ;;  %v13192_v10 = vld [vmem:[#allocation2 + $0x144] sm:$0xff]  ;;  %v13432_v49 = vld [vmem:[#allocation2 + $0x13a] sm:$0xff] }
  0x4f   : > { %410 = vst.msk [vmem:[#allocation2 + $0x1a4] sm:$0xff] %vm277_vm0, %v13100_v58  ;;  %10384 = vmatmul.mubr.msk.f32.gmra.mrb[10].mxu1 %vm277_vm0, %v13120_v61  ;;  %15658 = vst [vmem:[#allocation20_spill] sm:$0xff] %v13168_v5  ;;  %v13270_v34 = vld [vmem:[#allocation2 + $0x62] sm:$0xff]  ;;  %v13430_v51 = vld [vmem:[#allocation2 + $0x12a] sm:$0xff] }
  0x50   : > { %10386 = vmatprep.mubr.msk.f32.mxu1 %vm277_vm0, %v13122_v62  ;;  %15659 = vst [vmem:[#allocation21_spill] sm:$0xff] %v13170_v6  ;;  %15660 = vst [vmem:[#allocation22_spill] sm:$0xff] %v13180_v8  ;;  %v13194_v11 = vld [vmem:[#allocation2 + $0x154] sm:$0xff]  ;;  %v13204_v12 = vld [vmem:[#allocation2 + $0x15c] sm:$0xff]  ;;  %10349 = vmatmul.mubr.msk.f32.gmra.mrb[24].mxu0 %vm277_vm0, %v13086_v56 }
  0x51   : > { %15661 = vst [vmem:[#allocation23_spill] sm:$0xff] %v13182_v9  ;;  %15662 = vst [vmem:[#allocation24_spill] sm:$0xff] %v13192_v10  ;;  %v13206_v13 = vld [vmem:[#allocation2 + $0x16c] sm:$0xff]  ;;  %10351 = vmatprep.mubr.msk.f32.mxu0 %vm277_vm0, %v13089_v57  ;;  %v13416_v57 = vld [vmem:[#allocation2 + $0x122] sm:$0xff] }
  0x52   : > { %15663 = vst [vmem:[#allocation25_spill] sm:$0xff] %v13194_v11  ;;  %15664 = vst [vmem:[#allocation26_spill] sm:$0xff] %v13204_v12  ;;  %v13216_v14 = vld [vmem:[#allocation2 + $0x174] sm:$0xff]  ;;  %v9125_v56 = vld [vmem:[%s15525_s2 + $0x148] sm:$0xff] }
  0x53   : > { %10387 = vmatmul.mubr.msk.f32.gmra.mrb[12].mxu1 %vm277_vm0, %v13132_v63  ;;  %15665 = vst [vmem:[#allocation27_spill] sm:$0xff] %v13206_v13  ;;  %15666 = vst [vmem:[#allocation28_spill] sm:$0xff] %v13216_v14  ;;  %v13441_v48 = vld [vmem:[#allocation2 + $0x152] sm:$0xff]  ;;  %v8939_v40 = vld [vmem:[%s15525_s2 + $0x80] sm:$0xff] }
  0x54   : > { %10389 = vmatprep.mubr.msk.f32.mxu1 %vm277_vm0, %v13134_v0  ;;  %v858_v19 = vld [vmem:[#allocation2 + $0x184] sm:$0xff]  ;;  %15667 = vst [vmem:[#allocation29_spill] sm:$0xff] %v13224_v24  ;;  %10352 = vmatmul.mubr.msk.f32.gmra.mrb[26].mxu0 %vm277_vm0, %v13100_v58  ;;  %v859_v25 = vld [vmem:[#allocation2 + $0x18c] sm:$0xff]  ;;  %15668 = vst [vmem:[#allocation30_spill] sm:$0xff] %v13241_v45 }
  0x55   : > { %v860_v26 = vld [vmem:[#allocation2 + $0x19c] sm:$0xff]  ;;  %v791_v45 = vld [vmem:[%s15527_s4 + $0x70] sm:$0xff] }
  0x56   : > { %v861_v29 = vld [vmem:[#allocation2 + $0x1a4] sm:$0xff]  ;;  %v792_v24 = vld [vmem:[%s15527_s4 + $0x78] sm:$0xff]  ;;  %v1511_v41 = vld [vmem:[#allocation2 + $0x4e] sm:$0xff] }
  0x57   : > { %10390 = vmatmul.mubr.msk.f32.gmra.mrb[14].mxu1 %vm277_vm0, %v13144_v1  ;;  %v13371_v58 = vpack.c.bf16 %v792_v24, %v791_v45  ;;  %v13397_v24 = vld [vmem:[#allocation2 + $0xe2] sm:$0xff]  ;;  %v13399_v45 = vld [vmem:[#allocation2 + $0xf2] sm:$0xff]  ;;  %v13465_v44 = vld [vmem:[#allocation2 + $0x19a] sm:$0xff] }
  0x58   : > { %10392 = vmatprep.mubr.msk.f32.mxu1 %vm277_vm0, %v13146_v2  ;;  %v13457_v47 = vld [vmem:[#allocation2 + $0x182] sm:$0xff]  ;;  %v1509_v43 = vld [vmem:[#allocation2 + $0x36] sm:$0xff] }
  0x59   : > { %15677 = vst [vmem:[#allocation39_spill] sm:$0xff] %v13371_v58  ;;  %v8906_v42 = vld [vmem:[%s15525_s2 + $0x78] sm:$0xff] }
  0x5a   : > { %v1512_v39 = vld [vmem:[#allocation2 + $0x56] sm:$0xff] }
  0x5b   : > { %10393 = vmatmul.mubr.msk.f32.gmra.mrb[16].mxu1 %vm277_vm0, %v13156_v3 }
  0x5c   : > { %10395 = vmatprep.mubr.msk.f32.mxu1 %vm277_vm0, %v13158_v4 }
  0x5f   : > { %10396 = vmatmul.mubr.msk.f32.gmra.mrb[18].mxu1 %vm277_vm0, %v13168_v5  ;;  %v13491_v5 = vld [vmem:[#allocation2 + $0x66] sm:$0xff] }
  0x60   : > { %10398 = vmatprep.mubr.msk.f32.mxu1 %vm277_vm0, %v13170_v6  ;;  %v8940_v6 = vld [vmem:[%s15525_s2 + $0x88] sm:$0xff] }
  0x63   : > { %10399 = vmatmul.mubr.msk.f32.gmra.mrb[20].mxu1 %vm277_vm0, %v13180_v8 }
  0x64   : > { %10401 = vmatprep.mubr.msk.f32.mxu1 %vm277_vm0, %v13182_v9  ;;  %v1510_v9 = vld [vmem:[#allocation2 + $0x3e] sm:$0xff] }
  0x67   : > { %10402 = vmatmul.mubr.msk.f32.gmra.mrb[22].mxu1 %vm277_vm0, %v13192_v10  ;;  %v8905_v10 = vld [vmem:[%s15525_s2 + $0x70] sm:$0xff] }
  0x68   : > { %10404 = vmatprep.mubr.msk.f32.mxu1 %vm277_vm0, %v13194_v11  ;;  %v13471_v11 = vld [vmem:[#allocation2 + $0x1a2] sm:$0xff]  ;;  %v11690_v8 = vpack.c.bf16 %v8906_v42, %v8905_v10  ;;  %v13498_v42 = vld [vmem:[#allocation2 + $0x6e] sm:$0xff] }
  0x69   : > { %v13500_v10 = vld [vmem:[#allocation2 + $0x7e] sm:$0xff] }
  0x6b   : > { %10405 = vmatmul.mubr.msk.f32.gmra.mrb[24].mxu1 %vm277_vm0, %v13204_v12  ;;  %v13463_v12 = vld [vmem:[#allocation2 + $0x18a] sm:$0xff] }
  0x6c   : > { %10407 = vmatprep.mubr.msk.f32.mxu1 %vm277_vm0, %v13206_v13  ;;  %v13455_v13 = vld [vmem:[#allocation2 + $0x172] sm:$0xff] }
  0x6f   : > { %10408 = vmatmul.mubr.msk.f32.gmra.mrb[26].mxu1 %vm277_vm0, %v13216_v14  ;;  %v13439_v14 = vld [vmem:[#allocation2 + $0x142] sm:$0xff] }
  0x70   : > { %10410 = vmatprep.mubr.msk.f32.mxu1 %vm277_vm0, %v858_v19  ;;  %v8904_v19 = vld [vmem:[%s15525_s2 + $0x68] sm:$0xff] }
  0x73   : > { %10411 = vmatmul.mubr.msk.f32.gmra.mrb[28].mxu1 %vm277_vm0, %v859_v25  ;;  %v781_v25 = vld [vmem:[%s15527_s4 + $0x20] sm:$0xff] }
  0x74   : > { %10413 = vmatprep.mubr.msk.f32.mxu1 %vm277_vm0, %v860_v26  ;;  %v782_v26 = vld [vmem:[%s15527_s4 + $0x28] sm:$0xff] }
  0x77   : > { %10414 = vmatmul.mubr.msk.f32.gmra.mrb[30].mxu1 %vm277_vm0, %v861_v29  ;;  %v13266_v29 = vpack.c.bf16 %v782_v26, %v781_v25  ;;  %v13306_v25 = vld [vmem:[#allocation2 + $0x82] sm:$0xff]  ;;  %v13308_v26 = vld [vmem:[#allocation2 + $0x92] sm:$0xff] }
  0x78   : > { %10424 = vmatprep.mubr.msk.f32.mxu1 %vm277_vm0, %v794_v35  ;;  %v13272_v35 = vpack.c.bf16 %v8904_v19, %v8903_v16  ;;  %v785_v16 = vld [vmem:[%s15527_s4 + $0x40] sm:$0xff]  ;;  %v786_v19 = vld [vmem:[%s15527_s4 + $0x48] sm:$0xff] }
  0x79   : > { %15669 = vst [vmem:[#allocation31_spill] sm:$0xff] %v13266_v29  ;;  %11775 = vmatprep.subr.bf16.mxu0 %v13266_v29 }
  0x7a   : > { %11777 = vmatpush3.bf16.msra.mxu0 %v13266_v29 }
  0x7b   : > { %10425 = vmatmul.mubr.msk.f32.vlgmr.msra.gmra.mrb[0].mxu1 %vm277_vm0, %v795_v53  ;;  %v13287_v53 = vld [vmem:[#allocation2 + $0x6a] sm:$0xff] }
  0x7c   : > { %11681 = vmatpush3.bf16.msra.mxu1 %v13047_v46  ;;  %10427 = vmatprep.mubr.msk.f32.mxu1 %vm277_vm0, %v796_v54  ;;  %v784_v46 = vld [vmem:[%s15527_s4 + $0x38] sm:$0xff] }
  0x7d   : > { %11683 = vmatprep.subr.bf16.mxu1 %v11682_v15  ;;  %v13283_v52 = vpack.c.bf16 %v784_v46, %v783_v50  ;;  %v13289_v54 = vld [vmem:[#allocation2 + $0x7a] sm:$0xff] }
  0x7e   : > { %v788_v50 = vld [vmem:[%s15527_s4 + $0x58] sm:$0xff] }
  0x7f   : > { %10428 = vmatmul.mubr.msk.f32.gmra.mrb[2].mxu1 %vm277_vm0, %v797_v30  ;;  %15670 = vst [vmem:[#allocation32_spill] sm:$0xff] %v13283_v52  ;;  %11779 = vmatprep.subr.bf16.mxu0 %v13283_v52  ;;  %v787_v30 = vld [vmem:[%s15527_s4 + $0x50] sm:$0xff] }
  0x80   : > { %10430 = vmatprep.mubr.msk.f32.mxu1 %vm277_vm0, %v13270_v34  ;;  %11685 = vmatpush3.bf16.msra.mxu1 %v11682_v15  ;;  %v13302_v15 = vpack.c.bf16 %v786_v19, %v785_v16  ;;  %v13320_v46 = vpack.c.bf16 %v788_v50, %v787_v30  ;;  %v13324_v16 = vld [vmem:[#allocation2 + $0x9a] sm:$0xff]  ;;  %v13326_v19 = vld [vmem:[#allocation2 + $0xaa] sm:$0xff] }
  0x81   : > { %11687 = vmatprep.subr.bf16.mxu1 %v13272_v35  ;;  %11781 = vmatpush3.bf16.msra.mxu0 %v13283_v52  ;;  %v13336_v30 = vld [vmem:[%s12924_s23 + $0xe0] sm:$0xff]  ;;  %v13339_v50 = vld [vmem:[%s12924_s23 + $0xe8] sm:$0xff] }
  0x82   : > { %15671 = vst [vmem:[#allocation33_spill] sm:$0xff] %v13302_v15  ;;  %11783 = vmatprep.subr.bf16.mxu0 %v13302_v15  ;;  %15672 = vst [vmem:[#allocation34_spill] sm:$0xff] %v13320_v46  ;;  %10354 = vmatprep.mubr.msk.f32.mxu0 %vm277_vm0, %v13336_v30  ;;  %v13354_v52 = vld [vmem:[#allocation2 + $0xc2] sm:$0xff] }
  0x83   : > { %10431 = vmatmul.mubr.msk.f32.gmra.mrb[4].mxu1 %vm277_vm0, %v13287_v53  ;;  %15673 = vst [vmem:[#allocation35_spill] sm:$0xff] %v13336_v30  ;;  %15674 = vst [vmem:[#allocation36_spill] sm:$0xff] %v13339_v50  ;;  %10355 = vmatmul.mubr.msk.f32.gmra.mrb[28].mxu0 %vm277_vm0, %v13339_v50 }
  0x84   : > { %10433 = vmatprep.mubr.msk.f32.mxu1 %vm277_vm0, %v13289_v54  ;;  %411 = vst.msk [vmem:[#allocation2 + $0x1b4] sm:$0xff] %vm277_vm0, %v13336_v30  ;;  %412 = vst.msk [vmem:[#allocation2 + $0x1bc] sm:$0xff] %vm277_vm0, %v13339_v50  ;;  %v13369_v30 = vld [vmem:[%s12924_s23 + $0xf0] sm:$0xff]  ;;  %v13383_v50 = vld [vmem:[#allocation2 + $0xda] sm:$0xff] }
  0x85   : > { %11785 = vmatpush3.bf16.msra.mxu0 %v13302_v15  ;;  %v790_v15 = vld [vmem:[%s15527_s4 + $0x68] sm:$0xff]  ;;  %15676 = vst [vmem:[#allocation38_spill] sm:$0xff] %v13369_v30  ;;  %413 = vst.msk [vmem:[#allocation2 + $0x1cc] sm:$0xff] %vm277_vm0, %v13369_v30  ;;  %10357 = vmatprep.mubr.msk.f32.mxu0 %vm277_vm0, %v13369_v30  ;;  %v13414_v30 = vld [vmem:[#allocation2 + $0x112] sm:$0xff] }
  0x86   : > { %11787 = vmatprep.subr.bf16.mxu0 %v13320_v46  ;;  %v13358_v29 = vpack.c.bf16 %v790_v15, %v789_v7  ;;  %v13375_v7 = vld [vmem:[#allocation2 + $0xca] sm:$0xff]  ;;  %v13381_v15 = vld [vmem:[%s12924_s23 + $0xf8] sm:$0xff]  ;;  %s15460_s23 = scalar_lea.hbm %s15530_s7, %s9453_s16 }
  0x87   : > { %10434 = vmatmul.mubr.msk.f32.gmra.mrb[6].mxu1 %vm277_vm0, %v13306_v25  ;;  %15678 = vst [vmem:[#allocation40_spill] sm:$0xff] %v13381_v15  ;;  %414 = vst.msk [vmem:[#allocation2 + $0x1d4] sm:$0xff] %vm277_vm0, %v13381_v15  ;;  %10358 = vmatmul.mubr.msk.f32.gmra.mrb[30].mxu0 %vm277_vm0, %v13381_v15  ;;  %v13408_v15 = vld [vmem:[#allocation2 + $0x10a] sm:$0xff] }
  0x88   : > { %10436 = vmatprep.mubr.msk.f32.mxu1 %vm277_vm0, %v13308_v26  ;;  %15675 = vst [vmem:[#allocation37_spill] sm:$0xff] %v13358_v29 }
  0x89   : > { %11789 = vmatpush3.bf16.msra.mxu0 %v13320_v46  ;;  %v13346_v46 = vld [vmem:[#allocation2 + $0xb2] sm:$0xff] }
  0x8a   : > { %11791 = vmatprep.subr.bf16.mxu0 %v13358_v29 }
  0x8b   : > { %10437 = vmatmul.mubr.msk.f32.gmra.mrb[8].mxu1 %vm277_vm0, %v13324_v16 }
  0x8c   : > { %10439 = vmatprep.mubr.msk.f32.mxu1 %vm277_vm0, %v13326_v19 }
  0x8d   : > { %11793 = vmatpush3.bf16.msra.mxu0 %v13358_v29  ;;  %v13406_v29 = vld [vmem:[#allocation2 + $0xfa] sm:$0xff] }
  0x8e   : > { %11795 = vmatprep.subr.bf16.mxu0 %v13371_v58 }
  0x8f   : > { %10440 = vmatmul.mubr.msk.f32.gmra.mrb[10].mxu1 %vm277_vm0, %v13346_v46 }
  0x90   : > { %10442 = vmatprep.mubr.msk.f32.mxu1 %vm277_vm0, %v13354_v52 }
  0x91   : > { %11797 = vmatpush3.bf16.msra.mxu0 %v13371_v58  ;;  %v9124_v58 = vld [vmem:[%s15525_s2 + $0x140] sm:$0xff] }
  0x92   : > { %v13426_v55 = vpack.c.bf16 %v9125_v56, %v9124_v58  ;;  %v13447_v56 = vld [vmem:[#allocation2 + $0x15a] sm:$0xff]  ;;  %v13449_v58 = vld [vmem:[#allocation2 + $0x16a] sm:$0xff] }
  0x93   : > { %10443 = vmatmul.mubr.msk.f32.gmra.mrb[12].mxu1 %vm277_vm0, %v13375_v7 }
  0x94   : > { %10445 = vmatprep.mubr.msk.f32.mxu1 %vm277_vm0, %v13383_v50  ;;  %11799 = vmatprep.subr.bf16.mxu0 %v13426_v55 }
  0x97   : > { %10446 = vmatmul.mubr.msk.f32.gmra.mrb[14].mxu1 %vm277_vm0, %v13397_v24 }
  0x98   : > { %10448 = vmatprep.mubr.msk.f32.mxu1 %vm277_vm0, %v13399_v45 }
  0x9b   : > { %10449 = vmatmul.mubr.msk.f32.gmra.mrb[16].mxu1 %vm277_vm0, %v13406_v29 }
  0x9c   : > { %10451 = vmatprep.mubr.msk.f32.mxu1 %vm277_vm0, %v13408_v15 }
  0x9f   : > { %10452 = vmatmul.mubr.msk.f32.gmra.mrb[18].mxu1 %vm277_vm0, %v13414_v30 }
  0xa0   : > { %10454 = vmatprep.mubr.msk.f32.mxu1 %vm277_vm0, %v13416_v57 }
  0xa3   : > { %10455 = vmatmul.mubr.msk.f32.gmra.mrb[20].mxu1 %vm277_vm0, %v13430_v51 }
  0xa4   : > { %10457 = vmatprep.mubr.msk.f32.mxu1 %vm277_vm0, %v13432_v49 }
  0xa7   : > { %10458 = vmatmul.mubr.msk.f32.gmra.mrb[22].mxu1 %vm277_vm0, %v13439_v14 }
  0xa8   : > { %10460 = vmatprep.mubr.msk.f32.mxu1 %vm277_vm0, %v13441_v48 }
  0xab   : > { %10461 = vmatmul.mubr.msk.f32.gmra.mrb[24].mxu1 %vm277_vm0, %v13447_v56 }
  0xac   : > { %10463 = vmatprep.mubr.msk.f32.mxu1 %vm277_vm0, %v13449_v58 }
  0xaf   : > { %10464 = vmatmul.mubr.msk.f32.gmra.mrb[26].mxu1 %vm277_vm0, %v13455_v13 }
  0xb0   : > { %10466 = vmatprep.mubr.msk.f32.mxu1 %vm277_vm0, %v13457_v47 }
  0xb3   : > { %10467 = vmatmul.mubr.msk.f32.gmra.mrb[28].mxu1 %vm277_vm0, %v13463_v12 }
  0xb4   : > { %10469 = vmatprep.mubr.msk.f32.mxu1 %vm277_vm0, %v13465_v44 }
  0xb7   : > { %10470 = vmatmul.mubr.msk.f32.gmra.mrb[30].mxu1 %vm277_vm0, %v13471_v11 }
  0xb8   : > { %10480 = vmatprep.mubr.msk.f32.mxu1 %vm277_vm0, %v1509_v43  ;;  %v13493_v43 = vpack.c.bf16 %v8940_v6, %v8939_v40  ;;  %v13507_v40 = vld [vmem:[#allocation2 + $0x86] sm:$0xff]  ;;  %v13517_v6 = vld [vmem:[#allocation2 + $0xae] sm:$0xff] }
  0xb9   : > { %15681 = vst [vmem:[#allocation43_spill] sm:$0xff] %v13517_v6 }
  0xbb   : > { %10481 = vmatmul.mubr.msk.f32.vlgmr.msra.gmra.mrb[0].mxu1 %vm277_vm0, %v1510_v9  ;;  %v13525_v9 = vld [vmem:[#allocation2 + $0xc6] sm:$0xff] }
  0xbc   : > { %11689 = vmatpush3.bf16.msra.mxu1 %v13272_v35  ;;  %10483 = vmatprep.mubr.msk.f32.mxu1 %vm277_vm0, %v1511_v41  ;;  %v13509_v41 = vld [vmem:[#allocation2 + $0x96] sm:$0xff]  ;;  %15683 = vst [vmem:[#allocation45_spill] sm:$0xff] %v13525_v9  ;;  %v13531_v35 = vld [vmem:[#allocation2 + $0xce] sm:$0xff] }
  0xbd   : > { %11691 = vmatprep.subr.bf16.mxu1 %v11690_v8  ;;  %15679 = vst [vmem:[#allocation41_spill] sm:$0xff] %v13509_v41  ;;  %15684 = vst [vmem:[#allocation46_spill] sm:$0xff] %v13531_v35 }
  0xbf   : > { %10484 = vmatmul.mubr.msk.f32.gmra.mrb[2].mxu1 %vm277_vm0, %v1512_v39  ;;  %v13515_v39 = vld [vmem:[#allocation2 + $0x9e] sm:$0xff] }
  0xc0   : > { %10486 = vmatprep.mubr.msk.f32.mxu1 %vm277_vm0, %v13491_v5  ;;  %11693 = vmatpush3.bf16.msra.mxu1 %v11690_v8  ;;  %15680 = vst [vmem:[#allocation42_spill] sm:$0xff] %v13515_v39  ;;  %v13523_v8 = vld [vmem:[#allocation2 + $0xb6] sm:$0xff] }
  0xc1   : > { %11695 = vmatprep.subr.bf16.mxu1 %v13493_v43  ;;  %15682 = vst [vmem:[#allocation44_spill] sm:$0xff] %v13523_v8 }
  0xc3   : > { %10487 = vmatmul.mubr.msk.f32.gmra.mrb[4].mxu1 %vm277_vm0, %v13498_v42 }
  0xc4   : > { %10489 = vmatprep.mubr.msk.f32.mxu1 %vm277_vm0, %v13500_v10 }
  0xc7   : > { %10490 = vmatmul.mubr.msk.f32.gmra.mrb[6].mxu1 %vm277_vm0, %v13507_v40 }
  0xc8   : > { %10492 = vmatprep.mubr.msk.f32.mxu1 %vm277_vm0, %v13509_v41  ;;  %v13533_v41 = vld [vmem:[#allocation2 + $0xde] sm:$0xff] }
  0xc9   : > { %15685 = vst [vmem:[#allocation47_spill] sm:$0xff] %v13533_v41 }
  0xcb   : > { %10493 = vmatmul.mubr.msk.f32.gmra.mrb[8].mxu1 %vm277_vm0, %v13515_v39  ;;  %v13541_v39 = vld [vmem:[#allocation2 + $0xf6] sm:$0xff] }
  0xcc   : > { %10495 = vmatprep.mubr.msk.f32.mxu1 %vm277_vm0, %v13517_v6  ;;  %v13539_v6 = vld [vmem:[#allocation2 + $0xe6] sm:$0xff]  ;;  %15687 = vst [vmem:[#allocation49_spill] sm:$0xff] %v13541_v39 }
  0xcd   : > { %15686 = vst [vmem:[#allocation48_spill] sm:$0xff] %v13539_v6 }
  0xcf   : > { %10496 = vmatmul.mubr.msk.f32.gmra.mrb[10].mxu1 %vm277_vm0, %v13523_v8  ;;  %v13549_v8 = vld [vmem:[#allocation2 + $0x10e] sm:$0xff] }
  0xd0   : > { %10498 = vmatprep.mubr.msk.f32.mxu1 %vm277_vm0, %v13525_v9  ;;  %v13547_v9 = vld [vmem:[#allocation2 + $0xfe] sm:$0xff]  ;;  %15689 = vst [vmem:[#allocation51_spill] sm:$0xff] %v13549_v8 }
  0xd1   : > { %15688 = vst [vmem:[#allocation50_spill] sm:$0xff] %v13547_v9 }
  0xd3   : > { %10499 = vmatmul.mubr.msk.f32.gmra.mrb[12].mxu1 %vm277_vm0, %v13531_v35  ;;  %v13557_v35 = vld [vmem:[#allocation2 + $0x126] sm:$0xff] }
  0xd4   : > { %10501 = vmatprep.mubr.msk.f32.mxu1 %vm277_vm0, %v13533_v41  ;;  %v13555_v41 = vld [vmem:[#allocation2 + $0x116] sm:$0xff]  ;;  %15691 = vst [vmem:[#allocation53_spill] sm:$0xff] %v13557_v35 }
  0xd5   : > { %15690 = vst [vmem:[#allocation52_spill] sm:$0xff] %v13555_v41 }
  0xd7   : > { %10502 = vmatmul.mubr.msk.f32.gmra.mrb[14].mxu1 %vm277_vm0, %v13539_v6  ;;  %v13565_v6 = vld [vmem:[#allocation2 + $0x13e] sm:$0xff] }
  0xd8   : > { %10504 = vmatprep.mubr.msk.f32.mxu1 %vm277_vm0, %v13541_v39  ;;  %v13563_v39 = vld [vmem:[#allocation2 + $0x12e] sm:$0xff]  ;;  %15693 = vst [vmem:[#allocation55_spill] sm:$0xff] %v13565_v6 }
  0xd9   : > { %15692 = vst [vmem:[#allocation54_spill] sm:$0xff] %v13563_v39 }
  0xdb   : > { %10505 = vmatmul.mubr.msk.f32.gmra.mrb[16].mxu1 %vm277_vm0, %v13547_v9  ;;  %v13573_v9 = vld [vmem:[#allocation2 + $0x156] sm:$0xff] }
  0xdc   : > { %10507 = vmatprep.mubr.msk.f32.mxu1 %vm277_vm0, %v13549_v8  ;;  %v13571_v8 = vld [vmem:[#allocation2 + $0x146] sm:$0xff]  ;;  %15695 = vst [vmem:[#allocation57_spill] sm:$0xff] %v13573_v9 }
  0xdd   : > { %15694 = vst [vmem:[#allocation56_spill] sm:$0xff] %v13571_v8 }
  0xdf   : > { %10508 = vmatmul.mubr.msk.f32.gmra.mrb[18].mxu1 %vm277_vm0, %v13555_v41  ;;  %v13581_v41 = vld [vmem:[#allocation2 + $0x16e] sm:$0xff] }
  0xe0   : > { %10510 = vmatprep.mubr.msk.f32.mxu1 %vm277_vm0, %v13557_v35  ;;  %v13579_v35 = vld [vmem:[#allocation2 + $0x15e] sm:$0xff]  ;;  %15697 = vst [vmem:[#allocation59_spill] sm:$0xff] %v13581_v41 }
  0xe1   : > { %15696 = vst [vmem:[#allocation58_spill] sm:$0xff] %v13579_v35 }
  0xe3   : > { %10511 = vmatmul.mubr.msk.f32.gmra.mrb[20].mxu1 %vm277_vm0, %v13563_v39  ;;  %v13589_v39 = vld [vmem:[#allocation2 + $0x186] sm:$0xff] }
  0xe4   : > { %10513 = vmatprep.mubr.msk.f32.mxu1 %vm277_vm0, %v13565_v6  ;;  %v13587_v6 = vld [vmem:[#allocation2 + $0x176] sm:$0xff]  ;;  %15699 = vst [vmem:[#allocation61_spill] sm:$0xff] %v13589_v39 }
  0xe5   : > { %15698 = vst [vmem:[#allocation60_spill] sm:$0xff] %v13587_v6 }
  0xe7   : > { %10514 = vmatmul.mubr.msk.f32.gmra.mrb[22].mxu1 %vm277_vm0, %v13571_v8  ;;  %v13597_v8 = vld [vmem:[#allocation2 + $0x19e] sm:$0xff] }
  0xe8   : > { %10516 = vmatprep.mubr.msk.f32.mxu1 %vm277_vm0, %v13573_v9  ;;  %v13595_v9 = vld [vmem:[#allocation2 + $0x18e] sm:$0xff]  ;;  %15701 = vst [vmem:[#allocation63_spill] sm:$0xff] %v13597_v8 }
  0xe9   : > { %15700 = vst [vmem:[#allocation62_spill] sm:$0xff] %v13595_v9 }
  0xeb   : > { %10517 = vmatmul.mubr.msk.f32.gmra.mrb[24].mxu1 %vm277_vm0, %v13579_v35  ;;  %v8941_v35 = vld [vmem:[%s15525_s2 + $0x90] sm:$0xff] }
  0xec   : > { %10519 = vmatprep.mubr.msk.f32.mxu1 %vm277_vm0, %v13581_v41  ;;  %v13603_v41 = vld [vmem:[#allocation2 + $0x1a6] sm:$0xff] }
  0xed   : > { %15702 = vst [vmem:[#allocation64_spill] sm:$0xff] %v13603_v41 }
  0xef   : > { %10520 = vmatmul.mubr.msk.f32.gmra.mrb[26].mxu1 %vm277_vm0, %v13587_v6  ;;  %v8976_v6 = vld [vmem:[%s15525_s2 + $0xa8] sm:$0xff] }
  0xf0   : > { %10522 = vmatprep.mubr.msk.f32.mxu1 %vm277_vm0, %v13589_v39  ;;  %v8942_v39 = vld [vmem:[%s15525_s2 + $0x98] sm:$0xff] }
  0xf3   : > { %10523 = vmatmul.mubr.msk.f32.gmra.mrb[28].mxu1 %vm277_vm0, %v13595_v9  ;;  %v11698_v9 = vpack.c.bf16 %v8942_v39, %v8941_v35 }
  0xf4   : > { %10525 = vmatprep.mubr.msk.f32.mxu1 %vm277_vm0, %v13597_v8  ;;  %v8975_v8 = vld [vmem:[%s15525_s2 + $0xa0] sm:$0xff] }
  0xf7   : > { %10526 = vmatmul.mubr.msk.f32.gmra.mrb[30].mxu1 %vm277_vm0, %v13603_v41  ;;  %v13626_v41 = vpack.c.bf16 %v8976_v6, %v8975_v8  ;;  %v9121_v8 = vld [vmem:[%s15525_s2 + $0x128] sm:$0xff] }
  0xf8   : > { %10536 = vmatprep.mubr.msk.f32.mxu1 %vm277_vm0, %v13270_v34  ;;  %v8766_v34 = vld [vmem:[%s15528_s5] ss:$0 sm:$0xff] }
  0xfb   : > { %10537 = vmatmul.mubr.msk.f32.vlgmr.msra.gmra.mrb[0].mxu1 %vm277_vm0, %v13287_v53  ;;  %v10314_v53 = vpop.f32.mrb[0].mxu0 }
  0xfc   : > { %11697 = vmatpush3.bf16.msra.mxu1 %v13493_v43  ;;  %10539 = vmatprep.mubr.msk.f32.mxu1 %vm277_vm0, %v13289_v54  ;;  %v592_v54 = vadd.f32 %v10314_v53, %v8766_v34 }
  0xfd   : > { %11699 = vmatprep.subr.bf16.mxu1 %v11698_v9 }
  0xff   : > { %10540 = vmatmul.mubr.msk.f32.gmra.mrb[2].mxu1 %vm277_vm0, %v13306_v25  ;;  %v586_v25 = vpop.f32.mrb[1].mxu0 }
 0x100   : > { %10542 = vmatprep.mubr.msk.f32.mxu1 %vm277_vm0, %v13308_v26  ;;  %11701 = vmatpush3.bf16.msra.mxu1 %v11698_v9  ;;  %v587_v26 = vadd.f32 %v8766_v34, %v586_v25 }
 0x101   : > { %11703 = vmatprep.subr.bf16.mxu1 %v13626_v41 }
 0x103   : > { %10543 = vmatmul.mubr.msk.f32.gmra.mrb[4].mxu1 %vm277_vm0, %v13324_v16  ;;  %v746_v16 = vmax.f32 %v592_v54, 0.0 }
 0x104   : > { %10545 = vmatprep.mubr.msk.f32.mxu1 %vm277_vm0, %v13326_v19  ;;  %v745_v19 = vmax.f32 %v587_v26, 0.0 }
 0x106   : > { %10976 = vmatprep.mubr.f32.mxu0 %v745_v19 }
 0x107   : > { %10546 = vmatmul.mubr.msk.f32.gmra.mrb[6].mxu1 %vm277_vm0, %v13346_v46  ;;  %v9127_v46 = vld [vmem:[%s15525_s2 + $0x158] sm:$0xff]  ;;  %10977 = vmatmul.mubr.f32.vlgmr.msra.gmra.mrb[32].mxu0 %v746_v16 }
 0x108   : > { %10548 = vmatprep.mubr.msk.f32.mxu1 %vm277_vm0, %v13354_v52  ;;  %v9126_v52 = vld [vmem:[%s15525_s2 + $0x150] sm:$0xff]  ;;  %11801 = vmatpush3.bf16.msra.mxu0 %v13426_v55 }
 0x109   : > { %v11802_v39 = vpack.c.bf16 %v9127_v46, %v9126_v52 }
 0x10b   : > { %10549 = vmatmul.mubr.msk.f32.gmra.mrb[8].mxu1 %vm277_vm0, %v13375_v7  ;;  %11803 = vmatprep.subr.bf16.mxu0 %v11802_v39 }
 0x10c   : > { %10551 = vmatprep.mubr.msk.f32.mxu1 %vm277_vm0, %v13383_v50  ;;  %v10317_v50 = vpop.f32.mrb[2].mxu0  ;;  %11805 = vmatpush3.bf16.msra.mxu0 %v11802_v39 }
 0x10d   : > { %v602_v7 = vadd.f32 %v10317_v50, %v8766_v34  ;;  %v596_v43 = vpop.f32.mrb[3].mxu0 }
 0x10e   : > { %v597_v6 = vadd.f32 %v8766_v34, %v596_v43  ;;  %v10320_v35 = vpop.f32.mrb[4].mxu0 }
 0x10f   : > { %10552 = vmatmul.mubr.msk.f32.gmra.mrb[10].mxu1 %vm277_vm0, %v13397_v24  ;;  %v9120_v24 = vld [vmem:[%s15525_s2 + $0x120] sm:$0xff]  ;;  %v748_v9 = vmax.f32 %v602_v7, 0.0  ;;  %v612_v53 = vadd.f32 %v10320_v35, %v8766_v34  ;;  %v4690_v35 = vld [vmem:[#allocation2 + $0x4c] sm:$0xff] }
 0x110   : > { %10554 = vmatprep.mubr.msk.f32.mxu1 %vm277_vm0, %v13399_v45  ;;  %v747_v45 = vmax.f32 %v597_v6, 0.0  ;;  %v11806_v54 = vpack.c.bf16 %v9121_v8, %v9120_v24  ;;  %v4684_v6 = vld [vmem:[#allocation2 + $0x4] sm:$0xff] }
 0x111   : > { %v750_v26 = vmax.f32 %v612_v53, 0.0  ;;  %v9193_v8 = vld [vmem:[%s15525_s2 + $0x168] sm:$0xff] }
 0x112   : > { %10979 = vmatprep.mubr.f32.mxu0 %v747_v45  ;;  %11807 = vmatprep.subr.bf16.mxu0 %v11806_v54  ;;  %v4689_v45 = vld [vmem:[#allocation2 + $0x3c] sm:$0xff]  ;;  %v13723_v53 = vld [vmem:[#allocation2 + $0x1ca] sm:$0xff] }
 0x113   : > { %10555 = vmatmul.mubr.msk.f32.gmra.mrb[12].mxu1 %vm277_vm0, %v13406_v29  ;;  %v606_v29 = vpop.f32.mrb[5].mxu0  ;;  %10980 = vmatmul.mubr.f32.gmra.mrb[34].mxu0 %v748_v9  ;;  %v4688_v9 = vld [vmem:[#allocation2 + $0x34] sm:$0xff] }
 0x114   : > { %10557 = vmatprep.mubr.msk.f32.mxu1 %vm277_vm0, %v13408_v15  ;;  %v607_v25 = vadd.f32 %v8766_v34, %v606_v29  ;;  %v10323_v15 = vpop.f32.mrb[6].mxu0  ;;  %v4692_v29 = vld [vmem:[#allocation2 + $0x64] sm:$0xff] }
 0x115   : > { %v622_v46 = vadd.f32 %v10323_v15, %v8766_v34  ;;  %v616_v16 = vpop.f32.mrb[7].mxu0  ;;  %v4695_v15 = vld [vmem:[#allocation2 + $0x84] sm:$0xff] }
 0x116   : > { %v749_v52 = vmax.f32 %v607_v25, 0.0  ;;  %v617_v55 = vadd.f32 %v8766_v34, %v616_v16  ;;  %v10326_v50 = vpop.f32.mrb[8].mxu0  ;;  %v4694_v25 = vld [vmem:[#allocation2 + $0x7c] sm:$0xff] }
 0x117   : > { %10558 = vmatmul.mubr.msk.f32.gmra.mrb[14].mxu1 %vm277_vm0, %v13414_v30  ;;  %v752_v19 = vmax.f32 %v622_v46, 0.0  ;;  %v632_v7 = vadd.f32 %v10326_v50, %v8766_v34  ;;  %v13745_v46 = vld [vmem:[#allocation2 + $0x94] sm:$0xff] }
 0x118   : > { %10560 = vmatprep.mubr.msk.f32.mxu1 %vm277_vm0, %v13416_v57  ;;  %10982 = vmatprep.mubr.f32.mxu0 %v749_v52  ;;  %v751_v30 = vmax.f32 %v617_v55, 0.0  ;;  %v626_v57 = vpop.f32.mrb[9].mxu0  ;;  %v8978_v52 = vld [vmem:[%s15525_s2 + $0xb8] sm:$0xff]  ;;  %v9011_v55 = vld [vmem:[%s15525_s2 + $0xc0] sm:$0xff] }
 0x119   : > { %10983 = vmatmul.mubr.f32.gmra.mrb[36].mxu0 %v750_v26  ;;  %v627_v43 = vadd.f32 %v8766_v34, %v626_v57  ;;  %v754_v39 = vmax.f32 %v632_v7, 0.0  ;;  %v4686_v34 = vld [vmem:[#allocation2 + $0x1c] sm:$0xff]  ;;  %v8977_v26 = vld [vmem:[%s15525_s2 + $0xb0] sm:$0xff] }
 0x11a   : > { %10985 = vmatprep.mubr.f32.mxu0 %v751_v30  ;;  %v11706_v16 = vpack.c.bf16 %v8978_v52, %v8977_v26  ;;  %v15714_v50 = vld [vmem:[#allocation9_spill] sm:$0xff]  ;;  %v15716_v57 = vld [vmem:[#allocation24_spill] sm:$0xff]  ;;  %v15731_v52 = vld [vmem:[#allocation15_spill] sm:$0xff] }
 0x11b   : > { %10561 = vmatmul.mubr.msk.f32.gmra.mrb[16].mxu1 %vm277_vm0, %v13430_v51  ;;  %v753_v51 = vmax.f32 %v627_v43, 0.0  ;;  %v15717_v43 = vld [vmem:[#allocation10_spill] sm:$0xff] }
 0x11c   : > { %10563 = vmatprep.mubr.msk.f32.mxu1 %vm277_vm0, %v13432_v49  ;;  %v9122_v49 = vld [vmem:[%s15525_s2 + $0x130] sm:$0xff] }
 0x11d   : > { %10986 = vmatmul.mubr.f32.gmra.mrb[38].mxu0 %v752_v19  ;;  %v9012_v19 = vld [vmem:[%s15525_s2 + $0xc8] sm:$0xff] }
 0x11e   : > { %10988 = vmatprep.mubr.f32.mxu0 %v753_v51  ;;  %v13761_v30 = vpack.c.bf16 %v9012_v19, %v9011_v55  ;;  %v15719_v51 = vld [vmem:[#allocation25_spill] sm:$0xff]  ;;  %v15733_v19 = vld [vmem:[#allocation16_spill] sm:$0xff] }
 0x11f   : > { %10564 = vmatmul.mubr.msk.f32.gmra.mrb[18].mxu1 %vm277_vm0, %v13439_v14  ;;  %v9123_v14 = vld [vmem:[%s15525_s2 + $0x138] sm:$0xff] }
 0x120   : > { %10566 = vmatprep.mubr.msk.f32.mxu1 %vm277_vm0, %v13441_v48  ;;  %v4685_v48 = vld [vmem:[#allocation2 + $0xc] sm:$0xff]  ;;  %v11810_v24 = vpack.c.bf16 %v9123_v14, %v9122_v49  ;;  %v15722_v14 = vld [vmem:[#allocation26_spill] sm:$0xff] }
 0x121   : > { %10989 = vmatmul.mubr.f32.gmra.mrb[40].mxu0 %v754_v39 }
 0x122   : > { %11032 = vmatprep.mubr.msk.f32.mxu0 %vm277_vm0, %v4684_v6  ;;  %v15720_v6 = vld [vmem:[#allocation11_spill] sm:$0xff] }
 0x123   : > { %10567 = vmatmul.mubr.msk.f32.gmra.mrb[20].mxu1 %vm277_vm0, %v13447_v56  ;;  %v9192_v56 = vld [vmem:[%s15525_s2 + $0x160] sm:$0xff] }
 0x124   : > { %10569 = vmatprep.mubr.msk.f32.mxu1 %vm277_vm0, %v13449_v58  ;;  %v4687_v58 = vld [vmem:[#allocation2 + $0x24] sm:$0xff] }
 0x125   : > { %11033 = vmatmul.mubr.msk.f32.vlgmr.msra.gmra.mrb[42].mxu0 %vm277_vm0, %v4685_v48  ;;  %v15723_v48 = vld [vmem:[#allocation12_spill] sm:$0xff] }
 0x126   : > { %11035 = vmatprep.mubr.msk.f32.mxu0 %vm277_vm0, %v4686_v34  ;;  %11809 = vmatpush3.bf16.msra.mxu0 %v11806_v54  ;;  %v4693_v54 = vld [vmem:[#allocation2 + $0x6c] sm:$0xff] }
 0x127   : > { %10570 = vmatmul.mubr.msk.f32.gmra.mrb[22].mxu1 %vm277_vm0, %v13455_v13  ;;  %11811 = vmatprep.subr.bf16.mxu0 %v11810_v24  ;;  %v13704_v13 = vpack.c.bf16 %v9193_v8, %v9192_v56  ;;  %v4647_v56 = vld [vmem:[#allocation2] sm:$0xff]  ;;  %v15726_v8 = vld [vmem:[#allocation13_spill] sm:$0xff] }
 0x128   : > { %10572 = vmatprep.mubr.msk.f32.mxu1 %vm277_vm0, %v13457_v47  ;;  %v13712_v47 = vld [vmem:[#allocation2 + $0x1b2] sm:$0xff] }
 0x129   : > { %11036 = vmatmul.mubr.msk.f32.gmra.mrb[44].mxu0 %vm277_vm0, %v4687_v58  ;;  %v9194_v58 = vld [vmem:[%s15525_s2 + $0x170] sm:$0xff] }
 0x12a   : > { %11038 = vmatprep.mubr.msk.f32.mxu0 %vm277_vm0, %v4688_v9  ;;  %11813 = vmatpush3.bf16.msra.mxu0 %v11810_v24  ;;  %v15725_v24 = vld [vmem:[#allocation27_spill] sm:$0xff]  ;;  %v9195_v9 = vld [vmem:[%s15525_s2 + $0x178] sm:$0xff] }
 0x12b   : > { %10573 = vmatmul.mubr.msk.f32.gmra.mrb[24].mxu1 %vm277_vm0, %v13463_v12  ;;  %11815 = vmatprep.subr.bf16.mxu0 %v13704_v13  ;;  %v13720_v12 = vld [vmem:[#allocation2 + $0x1ba] sm:$0xff]  ;;  %v11818_v26 = vpack.c.bf16 %v9195_v9, %v9194_v58  ;;  %v15739_v58 = vld [vmem:[#allocation19_spill] sm:$0xff] }
 0x12c   : > { %10575 = vmatprep.mubr.msk.f32.mxu1 %vm277_vm0, %v13465_v44  ;;  %v4691_v44 = vld [vmem:[#allocation2 + $0x54] sm:$0xff] }
 0x12d   : > { %11039 = vmatmul.mubr.msk.f32.gmra.mrb[46].mxu0 %vm277_vm0, %v4689_v45 }
 0x12e   : > { %11041 = vmatprep.mubr.msk.f32.mxu0 %vm277_vm0, %v4690_v35  ;;  %v15728_v35 = vld [vmem:[#allocation28_spill] sm:$0xff] }
 0x12f   : > { %10576 = vmatmul.mubr.msk.f32.gmra.mrb[26].mxu1 %vm277_vm0, %v13471_v11  ;;  %v13730_v11 = vld [vmem:[#allocation2 + $0x1d2] sm:$0xff] }
 0x130   : > { %10578 = vmatprep.mubr.msk.f32.mxu1 %vm277_vm0, %v13712_v47 }
 0x131   : > { %11042 = vmatmul.mubr.msk.f32.gmra.mrb[48].mxu0 %vm277_vm0, %v4691_v44  ;;  %v15729_v44 = vld [vmem:[#allocation14_spill] sm:$0xff] }
 0x132   : > { %11044 = vmatprep.mubr.msk.f32.mxu0 %vm277_vm0, %v4692_v29 }
 0x133   : > { %10579 = vmatmul.mubr.msk.f32.gmra.mrb[28].mxu1 %vm277_vm0, %v13720_v12 }
 0x134   : > { %10581 = vmatprep.mubr.msk.f32.mxu1 %vm277_vm0, %v13723_v53 }
 0x135   : > { %11045 = vmatmul.mubr.msk.f32.gmra.mrb[50].mxu0 %vm277_vm0, %v4693_v54  ;;  %v13869_v54 = vld [vmem:[#allocation2 + $0x8] sm:$0xff] }
 0x136   : > { %11047 = vmatprep.mubr.msk.f32.mxu0 %vm277_vm0, %v4694_v25  ;;  %v4649_v25 = vld [vmem:[#allocation2 + $0x18] sm:$0xff] }
 0x137   : > { %10582 = vmatmul.mubr.msk.f32.gmra.mrb[30].mxu1 %vm277_vm0, %v13730_v11 }
 0x138   : > { %10592 = vmatprep.mubr.msk.f32.mxu1 %vm277_vm0, %v12933_v17 }
 0x139   : > { %11048 = vmatmul.mubr.msk.f32.gmra.mrb[52].mxu0 %vm277_vm0, %v4695_v15  ;;  %v9228_v15 = vld [vmem:[%s15525_s2 + $0x180] sm:$0xff] }
 0x13a   : > { %11050 = vmatprep.mubr.msk.f32.mxu0 %vm277_vm0, %v13745_v46 }
 0x13b   : > { %10593 = vmatmul.mubr.msk.f32.vlgmr.msra.gmra.mrb[0].mxu1 %vm277_vm0, %v12936_v18 }
 0x13c   : > { %11705 = vmatpush3.bf16.msra.mxu1 %v13626_v41  ;;  %10595 = vmatprep.mubr.msk.f32.mxu1 %vm277_vm0, %v12939_v20  ;;  %v15713_v41 = vld [vmem:[#allocation23_spill] sm:$0xff] }
 0x13d   : > { %11707 = vmatprep.subr.bf16.mxu1 %v11706_v16  ;;  %11051 = vmatmul.mubr.msk.f32.gmra.mrb[54].mxu0 %vm277_vm0, %v13108_v59  ;;  %v13806_v59 = vpop.f32.mrb[10].mxu0 }
 0x13e   : > { %11053 = vmatprep.mubr.msk.f32.mxu0 %vm277_vm0, %v13110_v60  ;;  %15703 = vst [vmem:[#allocation65_spill] sm:$0xff] %v13806_v59  ;;  %v15704_v60 = vld [vmem:[#allocation20_spill] sm:$0xff]  ;;  %v15761_v59 = vld [vmem:[#allocation50_spill] sm:$0xff] }
 0x13f   : > { %10596 = vmatmul.mubr.msk.f32.gmra.mrb[2].mxu1 %vm277_vm0, %v12950_v21 }
 0x140   : > { %10598 = vmatprep.mubr.msk.f32.mxu1 %vm277_vm0, %v12953_v22  ;;  %11709 = vmatpush3.bf16.msra.mxu1 %v11706_v16  ;;  %v9229_v16 = vld [vmem:[%s15525_s2 + $0x188] sm:$0xff] }
 0x141   : > { %11711 = vmatprep.subr.bf16.mxu1 %v13761_v30  ;;  %11054 = vmatmul.mubr.msk.f32.gmra.mrb[56].mxu0 %vm277_vm0, %v13120_v61  ;;  %v15705_v61 = vld [vmem:[#allocation6_spill] sm:$0xff] }
 0x142   : > { %11056 = vmatprep.mubr.msk.f32.mxu0 %vm277_vm0, %v13122_v62  ;;  %v13812_v62 = vpop.f32.mrb[11].mxu0 }
 0x143   : > { %10599 = vmatmul.mubr.msk.f32.gmra.mrb[4].mxu1 %vm277_vm0, %v12956_v23  ;;  %15706 = vst [vmem:[#allocation20_spill] sm:$0xff] %v13812_v62  ;;  %v14056_v62 = vld [vmem:[#allocation2 + $0x138] sm:$0xff] }
 0x144   : > { %10601 = vmatprep.mubr.msk.f32.mxu1 %vm277_vm0, %v12966_v27 }
 0x145   : > { %11057 = vmatmul.mubr.msk.f32.gmra.mrb[58].mxu0 %vm277_vm0, %v13132_v63  ;;  %v15707_v63 = vld [vmem:[#allocation21_spill] sm:$0xff] }
 0x146   : > { %11059 = vmatprep.mubr.msk.f32.mxu0 %vm277_vm0, %v13134_v0  ;;  %v15708_v0 = vld [vmem:[#allocation7_spill] sm:$0xff] }
 0x147   : > { %10602 = vmatmul.mubr.msk.f32.gmra.mrb[6].mxu1 %vm277_vm0, %v12969_v28 }
 0x148   : > { %10604 = vmatprep.mubr.msk.f32.mxu1 %vm277_vm0, %v12982_v31 }
 0x149   : > { %11060 = vmatmul.mubr.msk.f32.gmra.mrb[60].mxu0 %vm277_vm0, %v13144_v1  ;;  %v13818_v1 = vpop.f32.mrb[12].mxu0 }
 0x14a   : > { %11062 = vmatprep.mubr.msk.f32.mxu0 %vm277_vm0, %v13146_v2  ;;  %15709 = vst [vmem:[#allocation21_spill] sm:$0xff] %v13818_v1  ;;  %v15710_v2 = vld [vmem:[#allocation22_spill] sm:$0xff]  ;;  %v15759_v1 = vld [vmem:[#allocation48_spill] sm:$0xff] }
 0x14b   : > { %10605 = vmatmul.mubr.msk.f32.gmra.mrb[8].mxu1 %vm277_vm0, %v12985_v32 }
 0x14c   : > { %10607 = vmatprep.mubr.msk.f32.mxu1 %vm277_vm0, %v12988_v33 }
 0x14d   : > { %11063 = vmatmul.mubr.msk.f32.gmra.mrb[62].mxu0 %vm277_vm0, %v13156_v3  ;;  %v15711_v3 = vld [vmem:[#allocation8_spill] sm:$0xff] }
 0x14e   : > { %11065 = vmatprep.mubr.msk.f32.mxu0 %vm277_vm0, %v13158_v4  ;;  %v13824_v4 = vpop.f32.mrb[13].mxu0 }
 0x14f   : > { %10608 = vmatmul.mubr.msk.f32.gmra.mrb[10].mxu1 %vm277_vm0, %v12995_v36  ;;  %15712 = vst [vmem:[#allocation22_spill] sm:$0xff] %v13824_v4  ;;  %v13830_v7 = vpop.f32.mrb[14].mxu0  ;;  %v14044_v4 = vld [vmem:[#allocation2 + $0x120] sm:$0xff] }
 0x150   : > { %10610 = vmatprep.mubr.msk.f32.mxu1 %vm277_vm0, %v12998_v37  ;;  %15715 = vst [vmem:[#allocation23_spill] sm:$0xff] %v13830_v7  ;;  %v13836_v39 = vpop.f32.mrb[15].mxu0  ;;  %v15757_v7 = vld [vmem:[#allocation46_spill] sm:$0xff] }
 0x151   : > { %11066 = vmatmul.mubr.msk.f32.gmra.mrb[64].mxu0 %vm277_vm0, %v15704_v60  ;;  %15718 = vst [vmem:[#allocation24_spill] sm:$0xff] %v13836_v39  ;;  %v13842_v49 = vpop.f32.mrb[16].mxu0  ;;  %v14032_v39 = vld [vmem:[#allocation2 + $0x108] sm:$0xff] }
 0x152   : > { %11068 = vmatprep.mubr.msk.f32.mxu0 %vm277_vm0, %v15707_v63  ;;  %15721 = vst [vmem:[#allocation25_spill] sm:$0xff] %v13842_v49  ;;  %v13848_v34 = vpop.f32.mrb[17].mxu0  ;;  %v13888_v63 = vld [vmem:[#allocation2 + $0x20] sm:$0xff] }
 0x153   : > { %10611 = vmatmul.mubr.msk.f32.gmra.mrb[12].mxu1 %vm277_vm0, %v13001_v38  ;;  %15724 = vst [vmem:[#allocation26_spill] sm:$0xff] %v13848_v34  ;;  %v13860_v45 = vpop.f32.mrb[18].mxu0 }
 0x154   : > { %10613 = vmatprep.mubr.msk.f32.mxu1 %vm277_vm0, %v15705_v61  ;;  %15727 = vst [vmem:[#allocation27_spill] sm:$0xff] %v13860_v45  ;;  %v13866_v29 = vpop.f32.mrb[19].mxu0  ;;  %v13956_v45 = vld [vmem:[#allocation2 + $0x80] sm:$0xff] }
 0x155   : > { %11069 = vmatmul.mubr.msk.f32.gmra.mrb[66].mxu0 %vm277_vm0, %v15710_v2  ;;  %15730 = vst [vmem:[#allocation28_spill] sm:$0xff] %v13866_v29  ;;  %v13879_v55 = vpop.f32.mrb[20].mxu0  ;;  %v4651_v2 = vld [vmem:[#allocation2 + $0x30] sm:$0xff] }
 0x156   : > { %11071 = vmatprep.mubr.msk.f32.mxu0 %vm277_vm0, %v15713_v41  ;;  %15732 = vst [vmem:[#allocation66_spill] sm:$0xff] %v13879_v55  ;;  %v13885_v60 = vpop.f32.mrb[21].mxu0  ;;  %v13891_v41 = vpack.c.bf16 %v9229_v16, %v9228_v15  ;;  %v13918_v15 = vld [vmem:[#allocation2 + $0x50] sm:$0xff]  ;;  %v9014_v55 = vld [vmem:[%s15525_s2 + $0xd8] sm:$0xff] }
 0x157   : > { %10614 = vmatmul.mubr.msk.f32.gmra.mrb[14].mxu1 %vm277_vm0, %v15708_v0  ;;  %15734 = vst [vmem:[#allocation67_spill] sm:$0xff] %v13885_v60  ;;  %v15743_v16 = vld [vmem:[#allocation36_spill] sm:$0xff] }
 0x158   : > { %10616 = vmatprep.mubr.msk.f32.mxu1 %vm277_vm0, %v15711_v3  ;;  %v13958_v29 = vld [vmem:[#allocation2 + $0x90] sm:$0xff] }
 0x159   : > { %11072 = vmatmul.mubr.msk.f32.gmra.mrb[68].mxu0 %vm277_vm0, %v15716_v57  ;;  %v15735_v57 = vld [vmem:[#allocation17_spill] sm:$0xff] }
 0x15a   : > { %11074 = vmatprep.mubr.msk.f32.mxu0 %vm277_vm0, %v15719_v51  ;;  %v13895_v51 = vpop.f32.mrb[22].mxu0 }
 0x15b   : > { %10617 = vmatmul.mubr.msk.f32.gmra.mrb[16].mxu1 %vm277_vm0, %v15714_v50  ;;  %15736 = vst [vmem:[#allocation68_spill] sm:$0xff] %v13895_v51 }
 0x15c   : > { %10619 = vmatprep.mubr.msk.f32.mxu1 %vm277_vm0, %v15717_v43 }
 0x15d   : > { %11075 = vmatmul.mubr.msk.f32.gmra.mrb[70].mxu0 %vm277_vm0, %v15722_v14  ;;  %v15737_v14 = vld [vmem:[#allocation18_spill] sm:$0xff] }
 0x15e   : > { %11077 = vmatprep.mubr.msk.f32.mxu0 %vm277_vm0, %v15725_v24  ;;  %v13901_v24 = vpop.f32.mrb[23].mxu0 }
 0x15f   : > { %10620 = vmatmul.mubr.msk.f32.gmra.mrb[18].mxu1 %vm277_vm0, %v15720_v6  ;;  %15738 = vst [vmem:[#allocation69_spill] sm:$0xff] %v13901_v24  ;;  %v13909_v9 = vpop.f32.mrb[24].mxu0  ;;  %v15747_v24 = vld [vmem:[#allocation40_spill] sm:$0xff] }
 0x160   : > { %10622 = vmatprep.mubr.msk.f32.mxu1 %vm277_vm0, %v15723_v48  ;;  %15740 = vst [vmem:[#allocation70_spill] sm:$0xff] %v13909_v9  ;;  %v15745_v9 = vld [vmem:[#allocation38_spill] sm:$0xff]  ;;  %v15772_v48 = vld [vmem:[#allocation61_spill] sm:$0xff] }
 0x161   : > { %11078 = vmatmul.mubr.msk.f32.gmra.mrb[72].mxu0 %vm277_vm0, %v15728_v35  ;;  %v15741_v35 = vld [vmem:[#allocation35_spill] sm:$0xff] }
 0x162   : > { %11088 = vmatprep.mubr.msk.f32.mxu0 %vm277_vm0, %v4647_v56  ;;  %v4653_v56 = vld [vmem:[#allocation2 + $0x48] sm:$0xff] }
 0x163   : > { %10623 = vmatmul.mubr.msk.f32.gmra.mrb[20].mxu1 %vm277_vm0, %v15726_v8  ;;  %v9265_v8 = vld [vmem:[%s15525_s2 + $0x1a8] sm:$0xff] }
 0x164   : > { %10625 = vmatprep.mubr.msk.f32.mxu1 %vm277_vm0, %v15729_v44  ;;  %v9264_v44 = vld [vmem:[%s15525_s2 + $0x1a0] sm:$0xff] }
 0x165   : > { %11089 = vmatmul.mubr.msk.f32.vlgmr.msra.gmra.mrb[42].mxu0 %vm277_vm0, %v13869_v54 }
 0x166   : > { %11091 = vmatprep.mubr.msk.f32.mxu0 %vm277_vm0, %v4649_v25  ;;  %11817 = vmatpush3.bf16.msra.mxu0 %v13704_v13  ;;  %v13904_v13 = vld [vmem:[#allocation2 + $0x38] sm:$0xff]  ;;  %v13915_v25 = vpop.f32.mrb[25].mxu0 }
 0x167   : > { %10626 = vmatmul.mubr.msk.f32.gmra.mrb[22].mxu1 %vm277_vm0, %v15731_v52  ;;  %11819 = vmatprep.subr.bf16.mxu0 %v11818_v26  ;;  %15742 = vst [vmem:[#allocation71_spill] sm:$0xff] %v13915_v25  ;;  %v13936_v25 = vld [vmem:[#allocation2 + $0x78] sm:$0xff] }
 0x168   : > { %10628 = vmatprep.mubr.msk.f32.mxu1 %vm277_vm0, %v15733_v19  ;;  %v5364_v19 = vld [vmem:[#allocation2 + $0x10] sm:$0xff] }
 0x169   : > { %11092 = vmatmul.mubr.msk.f32.gmra.mrb[44].mxu0 %vm277_vm0, %v13888_v63 }
 0x16a   : > { %11094 = vmatprep.mubr.msk.f32.mxu0 %vm277_vm0, %v4651_v2  ;;  %11821 = vmatpush3.bf16.msra.mxu0 %v11818_v26  ;;  %v13920_v26 = vld [vmem:[#allocation2 + $0x60] sm:$0xff]  ;;  %v13924_v2 = vpop.f32.mrb[26].mxu0 }
 0x16b   : > { %10629 = vmatmul.mubr.msk.f32.gmra.mrb[24].mxu1 %vm277_vm0, %v15735_v57  ;;  %11823 = vmatprep.subr.bf16.mxu0 %v13891_v41  ;;  %15744 = vst [vmem:[#allocation72_spill] sm:$0xff] %v13924_v2  ;;  %v13930_v51 = vpop.f32.mrb[27].mxu0  ;;  %v9013_v2 = vld [vmem:[%s15525_s2 + $0xd0] sm:$0xff] }
 0x16c   : > { %10631 = vmatprep.mubr.msk.f32.mxu1 %vm277_vm0, %v15737_v14  ;;  %15746 = vst [vmem:[#allocation73_spill] sm:$0xff] %v13930_v51  ;;  %v13946_v60 = vpop.f32.mrb[28].mxu0  ;;  %v11714_v49 = vpack.c.bf16 %v9014_v55, %v9013_v2  ;;  %v13981_v2 = vld [vmem:[#allocation2 + $0xa8] sm:$0xff]  ;;  %v15769_v14 = vld [vmem:[#allocation58_spill] sm:$0xff]  ;;  %v9230_v57 = vld [vmem:[%s15525_s2 + $0x190] sm:$0xff] }
 0x16d   : > { %11095 = vmatmul.mubr.msk.f32.gmra.mrb[46].mxu0 %vm277_vm0, %v13904_v13  ;;  %15748 = vst [vmem:[#allocation74_spill] sm:$0xff] %v13946_v60  ;;  %v13952_v51 = vpop.f32.mrb[29].mxu0  ;;  %v9047_v60 = vld [vmem:[%s15525_s2 + $0xe0] sm:$0xff] }
 0x16e   : > { %11097 = vmatprep.mubr.msk.f32.mxu0 %vm277_vm0, %v4653_v56  ;;  %v13934_v56 = vld [vmem:[#allocation2 + $0x68] sm:$0xff]  ;;  %15749 = vst [vmem:[#allocation75_spill] sm:$0xff] %v13952_v51  ;;  %v13971_v51 = vpop.f32.mrb[30].mxu0 }
 0x16f   : > { %10632 = vmatmul.mubr.msk.f32.gmra.mrb[26].mxu1 %vm277_vm0, %v15739_v58  ;;  %15750 = vst [vmem:[#allocation76_spill] sm:$0xff] %v13971_v51  ;;  %v13979_v55 = vpop.f32.mrb[31].mxu0  ;;  %v13995_v51 = vld [vmem:[#allocation2 + $0xc0] sm:$0xff]  ;;  %v15767_v58 = vld [vmem:[#allocation56_spill] sm:$0xff] }
 0x170   : > { %10634 = vmatprep.mubr.msk.f32.mxu1 %vm277_vm0, %v15741_v35  ;;  %15751 = vst [vmem:[#allocation77_spill] sm:$0xff] %v13979_v55  ;;  %v14020_v55 = vld [vmem:[#allocation2 + $0xf0] sm:$0xff]  ;;  %v14080_v35 = vld [vmem:[#allocation2 + $0x168] sm:$0xff] }
 0x171   : > { %11098 = vmatmul.mubr.msk.f32.gmra.mrb[48].mxu0 %vm277_vm0, %v13918_v15 }
 0x172   : > { %11100 = vmatprep.mubr.msk.f32.mxu0 %vm277_vm0, %v13920_v26 }
 0x173   : > { %10635 = vmatmul.mubr.msk.f32.gmra.mrb[28].mxu1 %vm277_vm0, %v15743_v16  ;;  %v15765_v16 = vld [vmem:[#allocation54_spill] sm:$0xff] }
 0x174   : > { %10637 = vmatprep.mubr.msk.f32.mxu1 %vm277_vm0, %v15745_v9  ;;  %v14068_v9 = vld [vmem:[#allocation2 + $0x150] sm:$0xff] }
 0x175   : > { %11101 = vmatmul.mubr.msk.f32.gmra.mrb[50].mxu0 %vm277_vm0, %v13934_v56 }
 0x176   : > { %11103 = vmatprep.mubr.msk.f32.mxu0 %vm277_vm0, %v13936_v25 }
 0x177   : > { %10638 = vmatmul.mubr.msk.f32.gmra.mrb[30].mxu1 %vm277_vm0, %v15747_v24  ;;  %v15763_v24 = vld [vmem:[#allocation52_spill] sm:$0xff] }
 0x178   : > { %10648 = vmatprep.mubr.msk.f32.mxu1 %vm277_vm0, %v13491_v5  ;;  %v9048_v5 = vld [vmem:[%s15525_s2 + $0xe8] sm:$0xff] }
 0x179   : > { %11104 = vmatmul.mubr.msk.f32.gmra.mrb[52].mxu0 %vm277_vm0, %v13956_v45  ;;  %v13983_v34 = vpack.c.bf16 %v9048_v5, %v9047_v60  ;;  %v15753_v60 = vld [vmem:[#allocation42_spill] sm:$0xff]  ;;  %v14006_v5 = vld [vmem:[#allocation2 + $0xc8] sm:$0xff] }
 0x17a   : > { %11106 = vmatprep.mubr.msk.f32.mxu0 %vm277_vm0, %v13958_v29 }
 0x17b   : > { %10649 = vmatmul.mubr.msk.f32.vlgmr.msra.gmra.mrb[0].mxu1 %vm277_vm0, %v13498_v42  ;;  %v13977_v42 = vld [vmem:[#allocation2 + $0x98] sm:$0xff] }
 0x17c   : > { %11713 = vmatpush3.bf16.msra.mxu1 %v13761_v30  ;;  %10651 = vmatprep.mubr.msk.f32.mxu1 %vm277_vm0, %v13500_v10  ;;  %v15752_v30 = vld [vmem:[#allocation41_spill] sm:$0xff]  ;;  %v13993_v10 = vld [vmem:[#allocation2 + $0xb0] sm:$0xff] }
 0x17d   : > { %11715 = vmatprep.subr.bf16.mxu1 %v11714_v49  ;;  %11107 = vmatmul.mubr.msk.f32.gmra.mrb[54].mxu0 %vm277_vm0, %v13977_v42 }
 0x17e   : > { %11109 = vmatprep.mubr.msk.f32.mxu0 %vm277_vm0, %v13981_v2 }
 0x17f   : > { %10652 = vmatmul.mubr.msk.f32.gmra.mrb[2].mxu1 %vm277_vm0, %v13507_v40  ;;  %v15754_v40 = vld [vmem:[#allocation43_spill] sm:$0xff] }
 0x180   : > { %10654 = vmatprep.mubr.msk.f32.mxu1 %vm277_vm0, %v15752_v30  ;;  %11717 = vmatpush3.bf16.msra.mxu1 %v11714_v49  ;;  %v14008_v30 = vld [vmem:[#allocation2 + $0xd8] sm:$0xff]  ;;  %v15755_v49 = vld [vmem:[#allocation44_spill] sm:$0xff] }
 0x181   : > { %11719 = vmatprep.subr.bf16.mxu1 %v13983_v34  ;;  %11110 = vmatmul.mubr.msk.f32.gmra.mrb[56].mxu0 %vm277_vm0, %v13993_v10 }
 0x182   : > { %11112 = vmatprep.mubr.msk.f32.mxu0 %vm277_vm0, %v13995_v51 }
 0x183   : > { %10655 = vmatmul.mubr.msk.f32.gmra.mrb[4].mxu1 %vm277_vm0, %v15753_v60  ;;  %v15756_v60 = vld [vmem:[#allocation45_spill] sm:$0xff] }
 0x184   : > { %10657 = vmatprep.mubr.msk.f32.mxu1 %vm277_vm0, %v15754_v40  ;;  %v14018_v40 = vld [vmem:[#allocation2 + $0xe0] sm:$0xff] }
 0x185   : > { %11113 = vmatmul.mubr.msk.f32.gmra.mrb[58].mxu0 %vm277_vm0, %v14006_v5 }
 0x186   : > { %11115 = vmatprep.mubr.msk.f32.mxu0 %vm277_vm0, %v14008_v30 }
 0x187   : > { %10658 = vmatmul.mubr.msk.f32.gmra.mrb[6].mxu1 %vm277_vm0, %v15755_v49  ;;  %v15758_v49 = vld [vmem:[#allocation47_spill] sm:$0xff] }
 0x188   : > { %10660 = vmatprep.mubr.msk.f32.mxu1 %vm277_vm0, %v15756_v60  ;;  %v14030_v60 = vld [vmem:[#allocation2 + $0xf8] sm:$0xff] }
 0x189   : > { %11116 = vmatmul.mubr.msk.f32.gmra.mrb[60].mxu0 %vm277_vm0, %v14018_v40 }
 0x18a   : > { %11118 = vmatprep.mubr.msk.f32.mxu0 %vm277_vm0, %v14020_v55 }
 0x18b   : > { %10661 = vmatmul.mubr.msk.f32.gmra.mrb[8].mxu1 %vm277_vm0, %v15757_v7  ;;  %v15760_v7 = vld [vmem:[#allocation49_spill] sm:$0xff] }
 0x18c   : > { %10663 = vmatprep.mubr.msk.f32.mxu1 %vm277_vm0, %v15758_v49  ;;  %v14042_v49 = vld [vmem:[#allocation2 + $0x110] sm:$0xff] }
 0x18d   : > { %11119 = vmatmul.mubr.msk.f32.gmra.mrb[62].mxu0 %vm277_vm0, %v14030_v60 }
 0x18e   : > { %11121 = vmatprep.mubr.msk.f32.mxu0 %vm277_vm0, %v14032_v39 }
 0x18f   : > { %10664 = vmatmul.mubr.msk.f32.gmra.mrb[10].mxu1 %vm277_vm0, %v15759_v1  ;;  %v15762_v1 = vld [vmem:[#allocation51_spill] sm:$0xff] }
 0x190   : > { %10666 = vmatprep.mubr.msk.f32.mxu1 %vm277_vm0, %v15760_v7  ;;  %v14054_v7 = vld [vmem:[#allocation2 + $0x128] sm:$0xff] }
 0x191   : > { %11122 = vmatmul.mubr.msk.f32.gmra.mrb[64].mxu0 %vm277_vm0, %v14042_v49 }
 0x192   : > { %11124 = vmatprep.mubr.msk.f32.mxu0 %vm277_vm0, %v14044_v4 }
 0x193   : > { %10667 = vmatmul.mubr.msk.f32.gmra.mrb[12].mxu1 %vm277_vm0, %v15761_v59  ;;  %v15764_v59 = vld [vmem:[#allocation53_spill] sm:$0xff] }
 0x194   : > { %10669 = vmatprep.mubr.msk.f32.mxu1 %vm277_vm0, %v15762_v1  ;;  %v14066_v1 = vld [vmem:[#allocation2 + $0x140] sm:$0xff] }
 0x195   : > { %11125 = vmatmul.mubr.msk.f32.gmra.mrb[66].mxu0 %vm277_vm0, %v14054_v7 }
 0x196   : > { %11127 = vmatprep.mubr.msk.f32.mxu0 %vm277_vm0, %v14056_v62 }
 0x197   : > { %10670 = vmatmul.mubr.msk.f32.gmra.mrb[14].mxu1 %vm277_vm0, %v15763_v24  ;;  %v15766_v24 = vld [vmem:[#allocation55_spill] sm:$0xff] }
 0x198   : > { %10672 = vmatprep.mubr.msk.f32.mxu1 %vm277_vm0, %v15764_v59  ;;  %v14078_v59 = vld [vmem:[#allocation2 + $0x158] sm:$0xff] }
 0x199   : > { %11128 = vmatmul.mubr.msk.f32.gmra.mrb[68].mxu0 %vm277_vm0, %v14066_v1 }
 0x19a   : > { %11130 = vmatprep.mubr.msk.f32.mxu0 %vm277_vm0, %v14068_v9 }
 0x19b   : > { %10673 = vmatmul.mubr.msk.f32.gmra.mrb[16].mxu1 %vm277_vm0, %v15765_v16  ;;  %v15768_v16 = vld [vmem:[#allocation57_spill] sm:$0xff] }
 0x19c   : > { %10675 = vmatprep.mubr.msk.f32.mxu1 %vm277_vm0, %v15766_v24  ;;  %v14090_v24 = vld [vmem:[#allocation2 + $0x170] sm:$0xff] }
 0x19d   : > { %11131 = vmatmul.mubr.msk.f32.gmra.mrb[70].mxu0 %vm277_vm0, %v14078_v59 }
 0x19e   : > { %11133 = vmatprep.mubr.msk.f32.mxu0 %vm277_vm0, %v14080_v35 }
 0x19f   : > { %10676 = vmatmul.mubr.msk.f32.gmra.mrb[18].mxu1 %vm277_vm0, %v15767_v58  ;;  %v9231_v58 = vld [vmem:[%s15525_s2 + $0x198] sm:$0xff] }
 0x1a0   : > { %10678 = vmatprep.mubr.msk.f32.mxu1 %vm277_vm0, %v15768_v16  ;;  %v15770_v16 = vld [vmem:[#allocation59_spill] sm:$0xff]  ;;  %v11826_v52 = vpack.c.bf16 %v9231_v58, %v9230_v57  ;;  %v14120_v57 = vpack.c.bf16 %v9265_v8, %v9264_v44  ;;  %v15773_v58 = vld [vmem:[#allocation62_spill] sm:$0xff]  ;;  %v5370_v44 = vld [vmem:[#allocation2 + $0x58] sm:$0xff] }
 0x1a1   : > { %11134 = vmatmul.mubr.msk.f32.gmra.mrb[72].mxu0 %vm277_vm0, %v14090_v24  ;;  %v14137_v8 = vld [vmem:[#allocation2 + $0x1be] sm:$0xff] }
 0x1a2   : > { %11144 = vmatprep.mubr.msk.f32.mxu0 %vm277_vm0, %v13869_v54  ;;  %v5366_v54 = vld [vmem:[#allocation2 + $0x28] sm:$0xff] }
 0x1a3   : > { %10679 = vmatmul.mubr.msk.f32.gmra.mrb[20].mxu1 %vm277_vm0, %v15769_v14  ;;  %v15771_v14 = vld [vmem:[#allocation60_spill] sm:$0xff] }
 0x1a4   : > { %10681 = vmatprep.mubr.msk.f32.mxu1 %vm277_vm0, %v15770_v16  ;;  %v15774_v16 = vld [vmem:[#allocation63_spill] sm:$0xff] }
 0x1a5   : > { %11145 = vmatmul.mubr.msk.f32.vlgmr.msra.gmra.mrb[42].mxu0 %vm277_vm0, %v5364_v19  ;;  %v14129_v19 = vld [vmem:[#allocation2 + $0x1b6] sm:$0xff] }
 0x1a6   : > { %11147 = vmatprep.mubr.msk.f32.mxu0 %vm277_vm0, %v13888_v63  ;;  %11825 = vmatpush3.bf16.msra.mxu0 %v13891_v41  ;;  %v15775_v63 = vld [vmem:[#allocation64_spill] sm:$0xff] }
 0x1a7   : > { %10682 = vmatmul.mubr.msk.f32.gmra.mrb[22].mxu1 %vm277_vm0, %v15771_v14  ;;  %11827 = vmatprep.subr.bf16.mxu0 %v11826_v52  ;;  %v14141_v41 = vld [vmem:[#allocation2 + $0x1ce] sm:$0xff] }
 0x1a8   : > { %10684 = vmatprep.mubr.msk.f32.mxu1 %vm277_vm0, %v15772_v48  ;;  %v5368_v48 = vld [vmem:[#allocation2 + $0x40] sm:$0xff]  ;;  %15776 = vst [vmem:[#allocation41_spill] sm:$0xff] %v14141_v41  ;;  %v2942_v14 = vld [vmem:[#allocation2 + $0x92] sm:$0xff] }
 0x1a9   : > { %11148 = vmatmul.mubr.msk.f32.gmra.mrb[44].mxu0 %vm277_vm0, %v5366_v54  ;;  %v9050_v54 = vld [vmem:[%s15525_s2 + $0xf8] sm:$0xff] }
 0x1aa   : > { %11150 = vmatprep.mubr.msk.f32.mxu0 %vm277_vm0, %v13904_v13  ;;  %11829 = vmatpush3.bf16.msra.mxu0 %v11826_v52  ;;  %v14148_v52 = vld [vmem:[#allocation2 + $0x1d6] sm:$0xff] }
 0x1ab   : > { %10685 = vmatmul.mubr.msk.f32.gmra.mrb[24].mxu1 %vm277_vm0, %v15773_v58  ;;  %11831 = vmatprep.subr.bf16.mxu0 %v14120_v57  ;;  %15777 = vst [vmem:[#allocation42_spill] sm:$0xff] %v14148_v52  ;;  %v14152_v13 = vld [vmem:[#allocation2 + $0x70] sm:$0xff]  ;;  %v2943_v58 = vld [vmem:[#allocation2 + $0x9a] sm:$0xff] }
 0x1ac   : > { %10687 = vmatprep.mubr.msk.f32.mxu1 %vm277_vm0, %v15774_v16  ;;  %v14167_v16 = vld [vmem:[#allocation2 + $0x88] sm:$0xff] }
 0x1ad   : > { %11151 = vmatmul.mubr.msk.f32.gmra.mrb[46].mxu0 %vm277_vm0, %v5368_v48  ;;  %v2944_v48 = vld [vmem:[#allocation2 + $0xaa] sm:$0xff] }
 0x1ae   : > { %11153 = vmatprep.mubr.msk.f32.mxu0 %vm277_vm0, %v13918_v15  ;;  %v9049_v15 = vld [vmem:[%s15525_s2 + $0xf0] sm:$0xff] }
 0x1af   : > { %10688 = vmatmul.mubr.msk.f32.gmra.mrb[26].mxu1 %vm277_vm0, %v15775_v63  ;;  %v11722_v63 = vpack.c.bf16 %v9050_v54, %v9049_v15  ;;  %v14182_v15 = vld [vmem:[#allocation2 + $0xa0] sm:$0xff] }
 0x1b0   : > { %10690 = vmatprep.mubr.msk.f32.mxu1 %vm277_vm0, %v14129_v19  ;;  %v2946_v54 = vld [vmem:[#allocation2 + $0xc2] sm:$0xff] }
 0x1b1   : > { %11154 = vmatmul.mubr.msk.f32.gmra.mrb[48].mxu0 %vm277_vm0, %v5370_v44  ;;  %v9083_v44 = vld [vmem:[%s15525_s2 + $0x100] sm:$0xff] }
 0x1b2   : > { %11156 = vmatprep.mubr.msk.f32.mxu0 %vm277_vm0, %v13934_v56 }
 0x1b3   : > { %10691 = vmatmul.mubr.msk.f32.gmra.mrb[28].mxu1 %vm277_vm0, %v14137_v8 }
 0x1b4   : > { %10693 = vmatprep.mubr.msk.f32.mxu1 %vm277_vm0, %v14141_v41  ;;  %v2948_v41 = vld [vmem:[#allocation2 + $0xda] sm:$0xff] }
 0x1b5   : > { %11157 = vmatmul.mubr.msk.f32.gmra.mrb[50].mxu0 %vm277_vm0, %v14152_v13 }
 0x1b6   : > { %11159 = vmatprep.mubr.msk.f32.mxu0 %vm277_vm0, %v13956_v45 }
 0x1b7   : > { %10694 = vmatmul.mubr.msk.f32.gmra.mrb[30].mxu1 %vm277_vm0, %v14148_v52  ;;  %v9084_v52 = vld [vmem:[%s15525_s2 + $0x108] sm:$0xff] }
 0x1b8   : > { %10704 = vmatprep.mubr.msk.f32.mxu1 %vm277_vm0, %v2942_v14  ;;  %v2945_v14 = vld [vmem:[#allocation2 + $0xb2] sm:$0xff] }
 0x1b9   : > { %11160 = vmatmul.mubr.msk.f32.gmra.mrb[52].mxu0 %vm277_vm0, %v14167_v16 }
 0x1ba   : > { %11162 = vmatprep.mubr.msk.f32.mxu0 %vm277_vm0, %v13977_v42 }
 0x1bb   : > { %10705 = vmatmul.mubr.msk.f32.vlgmr.msra.gmra.mrb[0].mxu1 %vm277_vm0, %v2943_v58  ;;  %v14184_v58 = vpack.c.bf16 %v9084_v52, %v9083_v44  ;;  %v2949_v52 = vld [vmem:[#allocation2 + $0xe2] sm:$0xff]  ;;  %v14201_v44 = vld [vmem:[#allocation2 + $0xd0] sm:$0xff] }
 0x1bc   : > { %11721 = vmatpush3.bf16.msra.mxu1 %v13983_v34  ;;  %10707 = vmatprep.mubr.msk.f32.mxu1 %vm277_vm0, %v2944_v48  ;;  %v2947_v34 = vld [vmem:[#allocation2 + $0xca] sm:$0xff]  ;;  %v14192_v48 = vld [vmem:[#allocation2 + $0xb8] sm:$0xff]  ;;  %15779 = vst [vmem:[#allocation44_spill] sm:$0xff] %v14201_v44 }
 0x1bd   : > { %11723 = vmatprep.subr.bf16.mxu1 %v11722_v63  ;;  %11163 = vmatmul.mubr.msk.f32.gmra.mrb[54].mxu0 %vm277_vm0, %v14182_v15  ;;  %15778 = vst [vmem:[#allocation43_spill] sm:$0xff] %v14192_v48 }
 0x1be   : > { %11165 = vmatprep.mubr.msk.f32.mxu0 %vm277_vm0, %v13993_v10 }
 0x1bf   : > { %10708 = vmatmul.mubr.msk.f32.gmra.mrb[2].mxu1 %vm277_vm0, %v2945_v14  ;;  %v2950_v14 = vld [vmem:[#allocation2 + $0xf2] sm:$0xff] }
 0x1c0   : > { %10710 = vmatprep.mubr.msk.f32.mxu1 %vm277_vm0, %v2946_v54  ;;  %11725 = vmatpush3.bf16.msra.mxu1 %v11722_v63  ;;  %v2951_v63 = vld [vmem:[#allocation2 + $0xfa] sm:$0xff]  ;;  %v14209_v54 = vld [vmem:[#allocation2 + $0xe8] sm:$0xff] }
 0x1c1   : > { %11727 = vmatprep.subr.bf16.mxu1 %v14184_v58  ;;  %11166 = vmatmul.mubr.msk.f32.gmra.mrb[56].mxu0 %vm277_vm0, %v14192_v48  ;;  %15780 = vst [vmem:[#allocation45_spill] sm:$0xff] %v14209_v54  ;;  %v9301_v48 = vld [vmem:[%s15525_s2 + $0x1c8] sm:$0xff] }
 0x1c2   : > { %11168 = vmatprep.mubr.msk.f32.mxu0 %vm277_vm0, %v14006_v5 }
 0x1c3   : > { %10711 = vmatmul.mubr.msk.f32.gmra.mrb[4].mxu1 %vm277_vm0, %v2947_v34  ;;  %v2953_v34 = vld [vmem:[#allocation2 + $0x112] sm:$0xff] }
 0x1c4   : > { %10713 = vmatprep.mubr.msk.f32.mxu1 %vm277_vm0, %v2948_v41  ;;  %v2952_v41 = vld [vmem:[#allocation2 + $0x10a] sm:$0xff] }
 0x1c5   : > { %11169 = vmatmul.mubr.msk.f32.gmra.mrb[58].mxu0 %vm277_vm0, %v14201_v44  ;;  %v9266_v44 = vld [vmem:[%s15525_s2 + $0x1b0] sm:$0xff] }
 0x1c6   : > { %11171 = vmatprep.mubr.msk.f32.mxu0 %vm277_vm0, %v14018_v40 }
 0x1c7   : > { %10714 = vmatmul.mubr.msk.f32.gmra.mrb[6].mxu1 %vm277_vm0, %v2949_v52  ;;  %v14217_v52 = vld [vmem:[#allocation2 + $0x100] sm:$0xff] }
 0x1c8   : > { %10716 = vmatprep.mubr.msk.f32.mxu1 %vm277_vm0, %v2950_v14  ;;  %15781 = vst [vmem:[#allocation46_spill] sm:$0xff] %v14217_v52  ;;  %v2954_v14 = vld [vmem:[#allocation2 + $0x122] sm:$0xff] }
 0x1c9   : > { %11172 = vmatmul.mubr.msk.f32.gmra.mrb[60].mxu0 %vm277_vm0, %v14209_v54  ;;  %v14225_v54 = vld [vmem:[#allocation2 + $0x118] sm:$0xff] }
 0x1ca   : > { %11174 = vmatprep.mubr.msk.f32.mxu0 %vm277_vm0, %v14030_v60  ;;  %15782 = vst [vmem:[#allocation47_spill] sm:$0xff] %v14225_v54 }
 0x1cb   : > { %10717 = vmatmul.mubr.msk.f32.gmra.mrb[8].mxu1 %vm277_vm0, %v2951_v63  ;;  %v2955_v63 = vld [vmem:[#allocation2 + $0x12a] sm:$0xff] }
 0x1cc   : > { %10719 = vmatprep.mubr.msk.f32.mxu1 %vm277_vm0, %v2952_v41  ;;  %v2956_v41 = vld [vmem:[#allocation2 + $0x13a] sm:$0xff] }
 0x1cd   : > { %11175 = vmatmul.mubr.msk.f32.gmra.mrb[62].mxu0 %vm277_vm0, %v14217_v52  ;;  %v14233_v52 = vld [vmem:[#allocation2 + $0x130] sm:$0xff] }
 0x1ce   : > { %11177 = vmatprep.mubr.msk.f32.mxu0 %vm277_vm0, %v14042_v49  ;;  %15783 = vst [vmem:[#allocation48_spill] sm:$0xff] %v14233_v52 }
 0x1cf   : > { %10720 = vmatmul.mubr.msk.f32.gmra.mrb[10].mxu1 %vm277_vm0, %v2953_v34  ;;  %v2957_v34 = vld [vmem:[#allocation2 + $0x142] sm:$0xff] }
 0x1d0   : > { %10722 = vmatprep.mubr.msk.f32.mxu1 %vm277_vm0, %v2954_v14  ;;  %v2958_v14 = vld [vmem:[#allocation2 + $0x152] sm:$0xff] }
 0x1d1   : > { %11178 = vmatmul.mubr.msk.f32.gmra.mrb[64].mxu0 %vm277_vm0, %v14225_v54  ;;  %v14241_v54 = vld [vmem:[#allocation2 + $0x148] sm:$0xff] }
 0x1d2   : > { %11180 = vmatprep.mubr.msk.f32.mxu0 %vm277_vm0, %v14054_v7  ;;  %15784 = vst [vmem:[#allocation49_spill] sm:$0xff] %v14241_v54 }
 0x1d3   : > { %10723 = vmatmul.mubr.msk.f32.gmra.mrb[12].mxu1 %vm277_vm0, %v2955_v63  ;;  %v2959_v63 = vld [vmem:[#allocation2 + $0x15a] sm:$0xff] }
 0x1d4   : > { %10725 = vmatprep.mubr.msk.f32.mxu1 %vm277_vm0, %v2956_v41  ;;  %v2960_v41 = vld [vmem:[#allocation2 + $0x16a] sm:$0xff] }
 0x1d5   : > { %11181 = vmatmul.mubr.msk.f32.gmra.mrb[66].mxu0 %vm277_vm0, %v14233_v52  ;;  %v14249_v52 = vld [vmem:[#allocation2 + $0x160] sm:$0xff] }
 0x1d6   : > { %11183 = vmatprep.mubr.msk.f32.mxu0 %vm277_vm0, %v14066_v1  ;;  %15785 = vst [vmem:[#allocation50_spill] sm:$0xff] %v14249_v52 }
 0x1d7   : > { %10726 = vmatmul.mubr.msk.f32.gmra.mrb[14].mxu1 %vm277_vm0, %v2957_v34  ;;  %v2961_v34 = vld [vmem:[#allocation2 + $0x172] sm:$0xff] }
 0x1d8   : > { %10728 = vmatprep.mubr.msk.f32.mxu1 %vm277_vm0, %v2958_v14  ;;  %v2962_v14 = vld [vmem:[#allocation2 + $0x182] sm:$0xff] }
 0x1d9   : > { %11184 = vmatmul.mubr.msk.f32.gmra.mrb[68].mxu0 %vm277_vm0, %v14241_v54  ;;  %v14257_v54 = vld [vmem:[#allocation2 + $0x178] sm:$0xff] }
 0x1da   : > { %11186 = vmatprep.mubr.msk.f32.mxu0 %vm277_vm0, %v14078_v59 }
 0x1db   : > { %10729 = vmatmul.mubr.msk.f32.gmra.mrb[16].mxu1 %vm277_vm0, %v2959_v63  ;;  %v2963_v63 = vld [vmem:[#allocation2 + $0x18a] sm:$0xff] }
 0x1dc   : > { %10731 = vmatprep.mubr.msk.f32.mxu1 %vm277_vm0, %v2960_v41  ;;  %v2964_v41 = vld [vmem:[#allocation2 + $0x19a] sm:$0xff] }
 0x1dd   : > { %11187 = vmatmul.mubr.msk.f32.gmra.mrb[70].mxu0 %vm277_vm0, %v14249_v52 }
 0x1de   : > { %11189 = vmatprep.mubr.msk.f32.mxu0 %vm277_vm0, %v14090_v24 }
 0x1df   : > { %10732 = vmatmul.mubr.msk.f32.gmra.mrb[18].mxu1 %vm277_vm0, %v2961_v34  ;;  %v9267_v34 = vld [vmem:[%s15525_s2 + $0x1b8] sm:$0xff] }
 0x1e0   : > { %10734 = vmatprep.mubr.msk.f32.mxu1 %vm277_vm0, %v2962_v14  ;;  %v2965_v14 = vld [vmem:[#allocation2 + $0x1a2] sm:$0xff]  ;;  %v11834_v52 = vpack.c.bf16 %v9267_v34, %v9266_v44  ;;  %v14434_v44 = vld [vmem:[#allocation2 + $0x1b8] sm:$0xff]  ;;  %v14446_v34 = vld [vmem:[#allocation2 + $0x18c] sm:$0xff] }
 0x1e1   : > { %11190 = vmatmul.mubr.msk.f32.gmra.mrb[72].mxu0 %vm277_vm0, %v14257_v54 }
 0x1e2   : > { %11200 = vmatprep.mubr.msk.f32.mxu0 %vm277_vm0, %v13920_v26 }
 0x1e3   : > { %10735 = vmatmul.mubr.msk.f32.gmra.mrb[20].mxu1 %vm277_vm0, %v2963_v63  ;;  %v9300_v63 = vld [vmem:[%s15525_s2 + $0x1c0] sm:$0xff] }
 0x1e4   : > { %10737 = vmatprep.mubr.msk.f32.mxu1 %vm277_vm0, %v2964_v41  ;;  %v14285_v26 = vpack.c.bf16 %v9301_v48, %v9300_v63  ;;  %v14430_v48 = vld [vmem:[#allocation2 + $0x174] sm:$0xff]  ;;  %v14438_v41 = vld [vmem:[#allocation2 + $0x1c8] sm:$0xff]  ;;  %v14452_v63 = vld [vmem:[#allocation2 + $0x19c] sm:$0xff] }
 0x1e5   : > { %11201 = vmatmul.mubr.msk.f32.vlgmr.msra.gmra.mrb[42].mxu0 %vm277_vm0, %v13934_v56 }
 0x1e6   : > { %11203 = vmatprep.mubr.msk.f32.mxu0 %vm277_vm0, %v13936_v25  ;;  %11833 = vmatpush3.bf16.msra.mxu0 %v14120_v57  ;;  %v3333_v25 = vld [vmem:[#allocation2 + $0x9c] sm:$0xff]  ;;  %v14420_v57 = vld [vmem:[#allocation2 + $0x16c] sm:$0xff] }
 0x1e7   : > { %10738 = vmatmul.mubr.msk.f32.gmra.mrb[22].mxu1 %vm277_vm0, %v2965_v14  ;;  %11835 = vmatprep.subr.bf16.mxu0 %v11834_v52  ;;  %v14450_v14 = vld [vmem:[#allocation2 + $0x1d0] sm:$0xff] }
 0x1e8   : > { %10740 = vmatprep.mubr.msk.f32.mxu1 %vm277_vm0, %v13712_v47  ;;  %v2970_v47 = vld [vmem:[#allocation2 + $0x1e2] sm:$0xff] }
 0x1e9   : > { %11204 = vmatmul.mubr.msk.f32.gmra.mrb[44].mxu0 %vm277_vm0, %v13956_v45  ;;  %v2973_v45 = vld [vmem:[#allocation2 + $0x202] sm:$0xff] }
 0x1ea   : > { %11206 = vmatprep.mubr.msk.f32.mxu0 %vm277_vm0, %v13958_v29  ;;  %11837 = vmatpush3.bf16.msra.mxu0 %v11834_v52  ;;  %v9086_v29 = vld [vmem:[%s15525_s2 + $0x118] sm:$0xff]  ;;  %v14436_v52 = vld [vmem:[#allocation2 + $0x184] sm:$0xff] }
 0x1eb   : > { %10741 = vmatmul.mubr.msk.f32.gmra.mrb[24].mxu1 %vm277_vm0, %v13720_v12  ;;  %11839 = vmatprep.subr.bf16.mxu0 %v14285_v26  ;;  %v2971_v12 = vld [vmem:[#allocation2 + $0x1ea] sm:$0xff] }
 0x1ec   : > { %10743 = vmatprep.mubr.msk.f32.mxu1 %vm277_vm0, %v13723_v53  ;;  %v2972_v53 = vld [vmem:[#allocation2 + $0x1fa] sm:$0xff] }
 0x1ed   : > { %11207 = vmatmul.mubr.msk.f32.gmra.mrb[46].mxu0 %vm277_vm0, %v13977_v42  ;;  %v3335_v42 = vld [vmem:[#allocation2 + $0xb4] sm:$0xff] }
 0x1ee   : > { %11209 = vmatprep.mubr.msk.f32.mxu0 %vm277_vm0, %v13981_v2  ;;  %v14336_v2 = vld [vmem:[#allocation2 + $0xcc] sm:$0xff] }
 0x1ef   : > { %10744 = vmatmul.mubr.msk.f32.gmra.mrb[26].mxu1 %vm277_vm0, %v13730_v11  ;;  %v9085_v11 = vld [vmem:[%s15525_s2 + $0x110] sm:$0xff] }
 0x1f0   : > { %10746 = vmatprep.mubr.msk.f32.mxu1 %vm277_vm0, %v2970_v47  ;;  %v11730_v56 = vpack.c.bf16 %v9086_v29, %v9085_v11  ;;  %v9302_v47 = vld [vmem:[%s15525_s2 + $0x1d0] sm:$0xff]  ;;  %v9336_v29 = vld [vmem:[%s15525_s2 + $0x1e0] sm:$0xff] }
 0x1f1   : > { %11210 = vmatmul.mubr.msk.f32.gmra.mrb[48].mxu0 %vm277_vm0, %v13993_v10  ;;  %v14340_v10 = vld [vmem:[#allocation2 + $0xdc] sm:$0xff] }
 0x1f2   : > { %11212 = vmatprep.mubr.msk.f32.mxu0 %vm277_vm0, %v13995_v51  ;;  %v3334_v51 = vld [vmem:[#allocation2 + $0xac] sm:$0xff] }
 0x1f3   : > { %10747 = vmatmul.mubr.msk.f32.gmra.mrb[28].mxu1 %vm277_vm0, %v2971_v12  ;;  %v9303_v12 = vld [vmem:[%s15525_s2 + $0x1d8] sm:$0xff] }
 0x1f4   : > { %10749 = vmatprep.mubr.msk.f32.mxu1 %vm277_vm0, %v2972_v53  ;;  %v14466_v53 = vld [vmem:[#allocation2 + $0x1a4] sm:$0xff]  ;;  %v11842_v11 = vpack.c.bf16 %v9303_v12, %v9302_v47  ;;  %v14499_v47 = vld [vmem:[#allocation2 + $0x1d4] sm:$0xff] }
 0x1f5   : > { %11213 = vmatmul.mubr.msk.f32.gmra.mrb[50].mxu0 %vm277_vm0, %v14006_v5  ;;  %v14352_v5 = vld [vmem:[#allocation2 + $0xf4] sm:$0xff]  ;;  %v14503_v12 = vld [vmem:[#allocation2 + $0x1e4] sm:$0xff] }
 0x1f6   : > { %11215 = vmatprep.mubr.msk.f32.mxu0 %vm277_vm0, %v14008_v30  ;;  %v14364_v30 = vld [vmem:[#allocation2 + $0x10c] sm:$0xff]  ;;  %15786 = vst [vmem:[#allocation51_spill] sm:$0xff] %v14503_v12 }
 0x1f7   : > { %10750 = vmatmul.mubr.msk.f32.gmra.mrb[30].mxu1 %vm277_vm0, %v2973_v45  ;;  %v14470_v45 = vld [vmem:[#allocation2 + $0x1b4] sm:$0xff] }
 0x1f8   : > { %10760 = vmatprep.mubr.msk.f32.mxu1 %vm277_vm0, %v13745_v46  ;;  %v14329_v46 = vld [vmem:[#allocation2 + $0xc4] sm:$0xff] }
 0x1f9   : > { %11216 = vmatmul.mubr.msk.f32.gmra.mrb[52].mxu0 %vm277_vm0, %v14018_v40  ;;  %v14376_v40 = vld [vmem:[#allocation2 + $0x124] sm:$0xff] }
 0x1fa   : > { %11218 = vmatprep.mubr.msk.f32.mxu0 %vm277_vm0, %v14020_v55  ;;  %v14348_v55 = vld [vmem:[#allocation2 + $0xe4] sm:$0xff] }
 0x1fb   : > { %10761 = vmatmul.mubr.msk.f32.vlgmr.msra.gmra.mrb[0].mxu1 %vm277_vm0, %v3333_v25  ;;  %v9337_v25 = vld [vmem:[%s15525_s2 + $0x1e8] sm:$0xff] }
 0x1fc   : > { %11729 = vmatpush3.bf16.msra.mxu1 %v14184_v58  ;;  %10763 = vmatprep.mubr.msk.f32.mxu1 %vm277_vm0, %v3334_v51  ;;  %v14422_v58 = vld [vmem:[#allocation2 + $0x1b0] sm:$0xff]  ;;  %v14484_v51 = vld [vmem:[#allocation2 + $0x1bc] sm:$0xff] }
 0x1fd   : > { %11731 = vmatprep.subr.bf16.mxu1 %v11730_v56  ;;  %11219 = vmatmul.mubr.msk.f32.gmra.mrb[54].mxu0 %vm277_vm0, %v14030_v60  ;;  %v14388_v60 = vld [vmem:[#allocation2 + $0x13c] sm:$0xff] }
 0x1fe   : > { %11221 = vmatprep.mubr.msk.f32.mxu0 %vm277_vm0, %v14032_v39  ;;  %v14360_v39 = vld [vmem:[#allocation2 + $0xfc] sm:$0xff] }
 0x1ff   : > { %10764 = vmatmul.mubr.msk.f32.gmra.mrb[2].mxu1 %vm277_vm0, %v3335_v42  ;;  %v14491_v42 = vpack.c.bf16 %v9337_v25, %v9336_v29  ;;  %v14516_v29 = vld [vmem:[#allocation2 + $0x1fc] sm:$0xff] }
 0x200   : > { %10766 = vmatprep.mubr.msk.f32.mxu1 %vm277_vm0, %v14329_v46  ;;  %11733 = vmatpush3.bf16.msra.mxu1 %v11730_v56  ;;  %v14488_v56 = vld [vmem:[#allocation2 + $0x1cc] sm:$0xff]  ;;  %15788 = vst [vmem:[#allocation53_spill] sm:$0xff] %v14516_v29  ;;  %v3722_v25 = vld [vmem:[#allocation2 + $0x96] sm:$0xff] }
 0x201   : > { %11222 = vmatmul.mubr.msk.f32.gmra.mrb[56].mxu0 %vm277_vm0, %v14042_v49  ;;  %v14390_v49 = vld [vmem:[#allocation2 + $0x180] sm:$0xff] }
 0x202   : > { %11224 = vmatprep.mubr.msk.f32.mxu0 %vm277_vm0, %v14044_v4  ;;  %v14372_v4 = vld [vmem:[#allocation2 + $0x114] sm:$0xff] }
 0x203   : > { %10767 = vmatmul.mubr.msk.f32.gmra.mrb[4].mxu1 %vm277_vm0, %v14336_v2 }
 0x204   : > { %10769 = vmatprep.mubr.msk.f32.mxu1 %vm277_vm0, %v14340_v10 }
 0x205   : > { %11225 = vmatmul.mubr.msk.f32.gmra.mrb[58].mxu0 %vm277_vm0, %v14054_v7  ;;  %v14402_v7 = vld [vmem:[#allocation2 + $0x188] sm:$0xff] }
 0x206   : > { %11227 = vmatprep.mubr.msk.f32.mxu0 %vm277_vm0, %v14056_v62  ;;  %v14384_v62 = vld [vmem:[#allocation2 + $0x12c] sm:$0xff] }
 0x207   : > { %10770 = vmatmul.mubr.msk.f32.gmra.mrb[6].mxu1 %vm277_vm0, %v14348_v55 }
 0x208   : > { %10772 = vmatprep.mubr.msk.f32.mxu1 %vm277_vm0, %v14352_v5 }
 0x209   : > { %11228 = vmatmul.mubr.msk.f32.gmra.mrb[60].mxu0 %vm277_vm0, %v14066_v1  ;;  %v14406_v1 = vld [vmem:[#allocation2 + $0x198] sm:$0xff] }
 0x20a   : > { %11230 = vmatprep.mubr.msk.f32.mxu0 %vm277_vm0, %v14068_v9  ;;  %v14398_v9 = vld [vmem:[#allocation2 + $0x144] sm:$0xff] }
 0x20b   : > { %10773 = vmatmul.mubr.msk.f32.gmra.mrb[8].mxu1 %vm277_vm0, %v14360_v39 }
 0x20c   : > { %10775 = vmatprep.mubr.msk.f32.mxu1 %vm277_vm0, %v14364_v30 }
 0x20d   : > { %11231 = vmatmul.mubr.msk.f32.gmra.mrb[62].mxu0 %vm277_vm0, %v14078_v59  ;;  %v14414_v59 = vld [vmem:[#allocation2 + $0x15c] sm:$0xff] }
 0x20e   : > { %11233 = vmatprep.mubr.msk.f32.mxu0 %vm277_vm0, %v14080_v35  ;;  %v14404_v35 = vld [vmem:[#allocation2 + $0x154] sm:$0xff] }
 0x20f   : > { %10776 = vmatmul.mubr.msk.f32.gmra.mrb[10].mxu1 %vm277_vm0, %v14372_v4 }
 0x210   : > { %10778 = vmatprep.mubr.msk.f32.mxu1 %vm277_vm0, %v14376_v40 }
 0x211   : > { %11234 = vmatmul.mubr.msk.f32.gmra.mrb[64].mxu0 %vm277_vm0, %v14090_v24  ;;  %v14418_v24 = vld [vmem:[#allocation2 + $0x1a0] sm:$0xff] }
 0x212   : > { %11236 = vmatprep.mubr.msk.f32.mxu0 %vm277_vm0, %v14390_v49 }
 0x213   : > { %10779 = vmatmul.mubr.msk.f32.gmra.mrb[12].mxu1 %vm277_vm0, %v14384_v62 }
 0x214   : > { %10781 = vmatprep.mubr.msk.f32.mxu1 %vm277_vm0, %v14388_v60 }
 0x215   : > { %11237 = vmatmul.mubr.msk.f32.gmra.mrb[66].mxu0 %vm277_vm0, %v14402_v7 }
 0x216   : > { %11239 = vmatprep.mubr.msk.f32.mxu0 %vm277_vm0, %v14406_v1 }
 0x217   : > { %10782 = vmatmul.mubr.msk.f32.gmra.mrb[14].mxu1 %vm277_vm0, %v14398_v9 }
 0x218   : > { %10784 = vmatprep.mubr.msk.f32.mxu1 %vm277_vm0, %v14404_v35 }
 0x219   : > { %11240 = vmatmul.mubr.msk.f32.gmra.mrb[68].mxu0 %vm277_vm0, %v14418_v24 }
 0x21a   : > { %11242 = vmatprep.mubr.msk.f32.mxu0 %vm277_vm0, %v14422_v58 }
 0x21b   : > { %10785 = vmatmul.mubr.msk.f32.gmra.mrb[16].mxu1 %vm277_vm0, %v14414_v59 }
 0x21c   : > { %10787 = vmatprep.mubr.msk.f32.mxu1 %vm277_vm0, %v14420_v57 }
 0x21d   : > { %11243 = vmatmul.mubr.msk.f32.gmra.mrb[70].mxu0 %vm277_vm0, %v14434_v44 }
 0x21e   : > { %11245 = vmatprep.mubr.msk.f32.mxu0 %vm277_vm0, %v14438_v41 }
 0x21f   : > { %10788 = vmatmul.mubr.msk.f32.gmra.mrb[18].mxu1 %vm277_vm0, %v14430_v48 }
 0x220   : > { %10790 = vmatprep.mubr.msk.f32.mxu1 %vm277_vm0, %v14436_v52 }
 0x221   : > { %11246 = vmatmul.mubr.msk.f32.gmra.mrb[72].mxu0 %vm277_vm0, %v14450_v14 }
 0x222   : > { %11256 = vmatprep.mubr.msk.f32.mxu0 %vm277_vm0, %v12933_v17 }
 0x223   : > { %10791 = vmatmul.mubr.msk.f32.gmra.mrb[20].mxu1 %vm277_vm0, %v14446_v34 }
 0x224   : > { %10793 = vmatprep.mubr.msk.f32.mxu1 %vm277_vm0, %v14452_v63 }
 0x225   : > { %11257 = vmatmul.mubr.msk.f32.vlgmr.msra.gmra.mrb[42].mxu0 %vm277_vm0, %v12936_v18 }
 0x226   : > { %11259 = vmatprep.mubr.msk.f32.mxu0 %vm277_vm0, %v12939_v20  ;;  %11841 = vmatpush3.bf16.msra.mxu0 %v14285_v26  ;;  %v14512_v26 = vld [vmem:[#allocation2 + $0x1ec] sm:$0xff] }
 0x227   : > { %10794 = vmatmul.mubr.msk.f32.gmra.mrb[22].mxu1 %vm277_vm0, %v14466_v53  ;;  %11843 = vmatprep.subr.bf16.mxu0 %v11842_v11  ;;  %15787 = vst [vmem:[#allocation52_spill] sm:$0xff] %v14512_v26 }
 0x228   : > { %10796 = vmatprep.mubr.msk.f32.mxu1 %vm277_vm0, %v14470_v45 }
 0x229   : > { %11260 = vmatmul.mubr.msk.f32.gmra.mrb[44].mxu0 %vm277_vm0, %v12950_v21 }
 0x22a   : > { %11262 = vmatprep.mubr.msk.f32.mxu0 %vm277_vm0, %v12953_v22  ;;  %11845 = vmatpush3.bf16.msra.mxu0 %v11842_v11  ;;  %v14524_v11 = vld [vmem:[#allocation2 + $0x204] sm:$0xff] }
 0x22b   : > { %10797 = vmatmul.mubr.msk.f32.gmra.mrb[24].mxu1 %vm277_vm0, %v14484_v51  ;;  %11847 = vmatprep.subr.bf16.mxu0 %v14491_v42  ;;  %15789 = vst [vmem:[#allocation54_spill] sm:$0xff] %v14524_v11 }
 0x22c   : > { %10799 = vmatprep.mubr.msk.f32.mxu1 %vm277_vm0, %v14488_v56 }
 0x22d   : > { %11263 = vmatmul.mubr.msk.f32.gmra.mrb[46].mxu0 %vm277_vm0, %v12956_v23 }
 0x22e   : > { %11265 = vmatprep.mubr.msk.f32.mxu0 %vm277_vm0, %v12966_v27 }
 0x22f   : > { %10800 = vmatmul.mubr.msk.f32.gmra.mrb[26].mxu1 %vm277_vm0, %v14499_v47 }
 0x230   : > { %10802 = vmatprep.mubr.msk.f32.mxu1 %vm277_vm0, %v14503_v12  ;;  %v3724_v12 = vld [vmem:[#allocation2 + $0xae] sm:$0xff] }
 0x231   : > { %11266 = vmatmul.mubr.msk.f32.gmra.mrb[48].mxu0 %vm277_vm0, %v12969_v28 }
 0x232   : > { %11268 = vmatprep.mubr.msk.f32.mxu0 %vm277_vm0, %v12982_v31 }
 0x233   : > { %10803 = vmatmul.mubr.msk.f32.gmra.mrb[28].mxu1 %vm277_vm0, %v14512_v26  ;;  %v3723_v26 = vld [vmem:[#allocation2 + $0x9e] sm:$0xff] }
 0x234   : > { %10805 = vmatprep.mubr.msk.f32.mxu1 %vm277_vm0, %v14516_v29  ;;  %v3725_v29 = vld [vmem:[#allocation2 + $0xb6] sm:$0xff] }
 0x235   : > { %11269 = vmatmul.mubr.msk.f32.gmra.mrb[50].mxu0 %vm277_vm0, %v12985_v32 }
 0x236   : > { %11271 = vmatprep.mubr.msk.f32.mxu0 %vm277_vm0, %v12988_v33 }
 0x237   : > { %10806 = vmatmul.mubr.msk.f32.gmra.mrb[30].mxu1 %vm277_vm0, %v14524_v11  ;;  %v3726_v11 = vld [vmem:[#allocation2 + $0xc6] sm:$0xff] }
 0x238   : > { %10816 = vmatprep.mubr.msk.f32.mxu1 %vm277_vm0, %v3722_v25  ;;  %v3727_v25 = vld [vmem:[#allocation2 + $0xce] sm:$0xff] }
 0x239   : > { %11272 = vmatmul.mubr.msk.f32.gmra.mrb[52].mxu0 %vm277_vm0, %v12995_v36 }
 0x23a   : > { %11274 = vmatprep.mubr.msk.f32.mxu0 %vm277_vm0, %v12998_v37 }
 0x23b   : > { %10817 = vmatmul.mubr.msk.f32.vlgmr.msra.gmra.mrb[0].mxu1 %vm277_vm0, %v3723_v26  ;;  %v3728_v26 = vld [vmem:[#allocation2 + $0xde] sm:$0xff] }
 0x23c   : > { %10819 = vmatprep.mubr.msk.f32.mxu1 %vm277_vm0, %v3724_v12  ;;  %v3729_v12 = vld [vmem:[#allocation2 + $0xe6] sm:$0xff] }
 0x23d   : > { %11275 = vmatmul.mubr.msk.f32.gmra.mrb[54].mxu0 %vm277_vm0, %v13001_v38 }
 0x23e   : > { %11277 = vmatprep.mubr.msk.f32.mxu0 %vm277_vm0, %v15705_v61  ;;  %v9373_v61 = vld [vmem:[%s15525_s2 + $0x208] sm:$0xff] }
 0x23f   : > { %10820 = vmatmul.mubr.msk.f32.gmra.mrb[2].mxu1 %vm277_vm0, %v3725_v29  ;;  %v3730_v29 = vld [vmem:[#allocation2 + $0xf6] sm:$0xff] }
 0x240   : > { %10822 = vmatprep.mubr.msk.f32.mxu1 %vm277_vm0, %v3726_v11  ;;  %v3731_v11 = vld [vmem:[#allocation2 + $0xfe] sm:$0xff] }
 0x241   : > { %11278 = vmatmul.mubr.msk.f32.gmra.mrb[56].mxu0 %vm277_vm0, %v15708_v0  ;;  %v15795_v0 = vld [vmem:[#allocation17_spill] sm:$0xff] }
 0x242   : > { %11280 = vmatprep.mubr.msk.f32.mxu0 %vm277_vm0, %v15711_v3  ;;  %v15790_v3 = vld [vmem:[#allocation12_spill] sm:$0xff] }
 0x243   : > { %10823 = vmatmul.mubr.msk.f32.gmra.mrb[4].mxu1 %vm277_vm0, %v3727_v25  ;;  %v3732_v25 = vld [vmem:[#allocation2 + $0x10e] sm:$0xff] }
 0x244   : > { %10825 = vmatprep.mubr.msk.f32.mxu1 %vm277_vm0, %v3728_v26  ;;  %v3733_v26 = vld [vmem:[#allocation2 + $0x116] sm:$0xff] }
 0x245   : > { %11281 = vmatmul.mubr.msk.f32.gmra.mrb[58].mxu0 %vm277_vm0, %v15714_v50  ;;  %v15792_v50 = vld [vmem:[#allocation14_spill] sm:$0xff] }
 0x246   : > { %11283 = vmatprep.mubr.msk.f32.mxu0 %vm277_vm0, %v15717_v43  ;;  %v3735_v43 = vld [vmem:[#allocation2 + $0x12e] sm:$0xff] }
 0x247   : > { %10826 = vmatmul.mubr.msk.f32.gmra.mrb[6].mxu1 %vm277_vm0, %v3729_v12  ;;  %v3734_v12 = vld [vmem:[#allocation2 + $0x126] sm:$0xff] }
 0x248   : > { %10828 = vmatprep.mubr.msk.f32.mxu1 %vm277_vm0, %v3730_v29  ;;  %v15791_v29 = vld [vmem:[#allocation13_spill] sm:$0xff] }
 0x249   : > { %11284 = vmatmul.mubr.msk.f32.gmra.mrb[60].mxu0 %vm277_vm0, %v15720_v6 }
 0x24a   : > { %11286 = vmatprep.mubr.msk.f32.mxu0 %vm277_vm0, %v15790_v3  ;;  %v4182_v3 = vld [vmem:[%s15527_s4 + $0x88] sm:$0xff] }
 0x24b   : > { %10829 = vmatmul.mubr.msk.f32.gmra.mrb[8].mxu1 %vm277_vm0, %v3731_v11  ;;  %v3736_v11 = vld [vmem:[#allocation2 + $0x13e] sm:$0xff] }
 0x24c   : > { %10831 = vmatprep.mubr.msk.f32.mxu1 %vm277_vm0, %v3732_v25  ;;  %v4181_v25 = vld [vmem:[%s15527_s4 + $0x80] sm:$0xff] }
 0x24d   : > { %11287 = vmatmul.mubr.msk.f32.gmra.mrb[62].mxu0 %vm277_vm0, %v15791_v29  ;;  %v11734_v6 = vpack.c.bf16 %v4182_v3, %v4181_v25  ;;  %v15794_v29 = vld [vmem:[#allocation16_spill] sm:$0xff]  ;;  %v3739_v3 = vld [vmem:[#allocation2 + $0x15e] sm:$0xff] }
 0x24e   : > { %11289 = vmatprep.mubr.msk.f32.mxu0 %vm277_vm0, %v15792_v50  ;;  %v3738_v50 = vld [vmem:[#allocation2 + $0x156] sm:$0xff]  ;;  %v3740_v25 = vld [vmem:[#allocation2 + $0x16e] sm:$0xff] }
 0x24f   : > { %10832 = vmatmul.mubr.msk.f32.gmra.mrb[10].mxu1 %vm277_vm0, %v3733_v26  ;;  %v15793_v26 = vld [vmem:[#allocation15_spill] sm:$0xff]  ;;  %11735 = vmatprep.subr.bf16.mxu1 %v11734_v6 }
 0x250   : > { %10834 = vmatprep.mubr.msk.f32.mxu1 %vm277_vm0, %v3734_v12  ;;  %v3737_v12 = vld [vmem:[#allocation2 + $0x146] sm:$0xff]  ;;  %11737 = vmatpush3.bf16.msra.mxu1 %v11734_v6  ;;  %v4184_v6 = vld [vmem:[%s15527_s4 + $0x98] sm:$0xff] }
 0x251   : > { %11290 = vmatmul.mubr.msk.f32.gmra.mrb[64].mxu0 %vm277_vm0, %v15793_v26  ;;  %v15799_v26 = vld [vmem:[#allocation36_spill] sm:$0xff] }
 0x252   : > { %11292 = vmatprep.mubr.msk.f32.mxu0 %vm277_vm0, %v15794_v29 }
 0x253   : > { %10835 = vmatmul.mubr.msk.f32.gmra.mrb[12].mxu1 %vm277_vm0, %v3735_v43  ;;  %v15796_v43 = vld [vmem:[#allocation18_spill] sm:$0xff] }
 0x254   : > { %10837 = vmatprep.mubr.msk.f32.mxu1 %vm277_vm0, %v3736_v11  ;;  %v4183_v11 = vld [vmem:[%s15527_s4 + $0x90] sm:$0xff] }
 0x255   : > { %11293 = vmatmul.mubr.msk.f32.gmra.mrb[66].mxu0 %vm277_vm0, %v15795_v0  ;;  %v11738_v29 = vpack.c.bf16 %v4184_v6, %v4183_v11  ;;  %v15798_v0 = vld [vmem:[#allocation35_spill] sm:$0xff]  ;;  %v15800_v11 = vld [vmem:[#allocation38_spill] sm:$0xff] }
 0x256   : > { %11295 = vmatprep.mubr.msk.f32.mxu0 %vm277_vm0, %v15796_v43  ;;  %v3742_v43 = vld [vmem:[#allocation2 + $0x186] sm:$0xff]  ;;  %v3744_v6 = vld [vmem:[#allocation2 + $0x19e] sm:$0xff] }
 0x257   : > { %10838 = vmatmul.mubr.msk.f32.gmra.mrb[14].mxu1 %vm277_vm0, %v3737_v12  ;;  %v15797_v12 = vld [vmem:[#allocation19_spill] sm:$0xff]  ;;  %11739 = vmatprep.subr.bf16.mxu1 %v11738_v29 }
 0x258   : > { %10840 = vmatprep.mubr.msk.f32.mxu1 %vm277_vm0, %v3738_v50  ;;  %v3741_v50 = vld [vmem:[#allocation2 + $0x176] sm:$0xff]  ;;  %11741 = vmatpush3.bf16.msra.mxu1 %v11738_v29  ;;  %v4186_v29 = vld [vmem:[%s15527_s4 + $0xa8] sm:$0xff] }
 0x259   : > { %11296 = vmatmul.mubr.msk.f32.gmra.mrb[68].mxu0 %vm277_vm0, %v15797_v12  ;;  %v3745_v12 = vld [vmem:[#allocation2 + $0x1a6] sm:$0xff] }
 0x25a   : > { %11298 = vmatprep.mubr.msk.f32.mxu0 %vm277_vm0, %v15798_v0  ;;  %v6405_v0 = vld [vmem:[#allocation2 + $0x68] sm:$0xff] }
 0x25b   : > { %10841 = vmatmul.mubr.msk.f32.gmra.mrb[16].mxu1 %vm277_vm0, %v3739_v3  ;;  %v3743_v3 = vld [vmem:[#allocation2 + $0x18e] sm:$0xff] }
 0x25c   : > { %10843 = vmatprep.mubr.msk.f32.mxu1 %vm277_vm0, %v3740_v25  ;;  %v4185_v25 = vld [vmem:[%s15527_s4 + $0xa0] sm:$0xff] }
 0x25d   : > { %11299 = vmatmul.mubr.msk.f32.gmra.mrb[70].mxu0 %vm277_vm0, %v15799_v26  ;;  %v15801_v26 = vld [vmem:[#allocation40_spill] sm:$0xff] }
 0x25e   : > { %11301 = vmatprep.mubr.msk.f32.mxu0 %vm277_vm0, %v15800_v11  ;;  %v9339_v11 = vld [vmem:[%s15525_s2 + $0x1f8] sm:$0xff] }
 0x25f   : > { %10844 = vmatmul.mubr.msk.f32.gmra.mrb[18].mxu1 %vm277_vm0, %v3741_v50  ;;  %v11742_v50 = vpack.c.bf16 %v4186_v29, %v4185_v25  ;;  %v6407_v25 = vld [vmem:[#allocation2 + $0x80] sm:$0xff] }
 0x260   : > { %10846 = vmatprep.mubr.msk.f32.mxu1 %vm277_vm0, %v3742_v43  ;;  %v9338_v43 = vld [vmem:[%s15525_s2 + $0x1f0] sm:$0xff] }
 0x261   : > { %11302 = vmatmul.mubr.msk.f32.gmra.mrb[72].mxu0 %vm277_vm0, %v15801_v26  ;;  %11743 = vmatprep.subr.bf16.mxu1 %v11742_v50  ;;  %v11850_v29 = vpack.c.bf16 %v9339_v11, %v9338_v43  ;;  %v6409_v11 = vld [vmem:[#allocation2 + $0x98] sm:$0xff]  ;;  %v4189_v43 = vld [vmem:[%s15527_s4 + $0xc0] sm:$0xff] }
 0x262   : > { %11312 = vmatprep.mubr.msk.f32.mxu0 %vm277_vm0, %v6405_v0  ;;  %11745 = vmatpush3.bf16.msra.mxu1 %v11742_v50  ;;  %v4187_v0 = vld [vmem:[%s15527_s4 + $0xb0] sm:$0xff]  ;;  %v6798_v26 = vld [vmem:[#allocation2 + $0xd8] sm:$0xff] }
 0x263   : > { %10847 = vmatmul.mubr.msk.f32.gmra.mrb[20].mxu1 %vm277_vm0, %v3743_v3  ;;  %v9372_v3 = vld [vmem:[%s15525_s2 + $0x200] sm:$0xff]  ;;  %v6411_v50 = vld [vmem:[#allocation2 + $0xb0] sm:$0xff] }
 0x264   : > { %10849 = vmatprep.mubr.msk.f32.mxu1 %vm277_vm0, %v3744_v6  ;;  %v14643_v6 = vpack.c.bf16 %v9373_v61, %v9372_v3  ;;  %v15803_v61 = vld [vmem:[#allocation42_spill] sm:$0xff] }
 0x265   : > { %11313 = vmatmul.mubr.msk.f32.vlgmr.msra.gmra.mrb[42].mxu0 %vm277_vm0, %v14152_v13 }
 0x266   : > { %11315 = vmatprep.mubr.msk.f32.mxu0 %vm277_vm0, %v6407_v25  ;;  %11849 = vmatpush3.bf16.msra.mxu0 %v14491_v42  ;;  %v3750_v42 = vld [vmem:[#allocation2 + $0x1e6] sm:$0xff] }
 0x267   : > { %10850 = vmatmul.mubr.msk.f32.gmra.mrb[22].mxu1 %vm277_vm0, %v3745_v12  ;;  %v4188_v12 = vld [vmem:[%s15527_s4 + $0xb8] sm:$0xff]  ;;  %11851 = vmatprep.subr.bf16.mxu0 %v11850_v29  ;;  %v4190_v25 = vld [vmem:[%s15527_s4 + $0xc8] sm:$0xff] }
 0x268   : > { %10852 = vmatprep.mubr.msk.f32.mxu1 %vm277_vm0, %v14129_v19  ;;  %v11746_v13 = vpack.c.bf16 %v4188_v12, %v4187_v0  ;;  %v15802_v19 = vld [vmem:[#allocation41_spill] sm:$0xff]  ;;  %v11750_v3 = vpack.c.bf16 %v4190_v25, %v4189_v43  ;;  %v3753_v0 = vld [vmem:[#allocation2 + $0x206] sm:$0xff] }
 0x269   : > { %11316 = vmatmul.mubr.msk.f32.gmra.mrb[44].mxu0 %vm277_vm0, %v14167_v16  ;;  %v3752_v16 = vld [vmem:[#allocation2 + $0x1fe] sm:$0xff]  ;;  %v4194_v25 = vld [vmem:[%s15527_s4 + $0xe8] sm:$0xff] }
 0x26a   : > { %11318 = vmatprep.mubr.msk.f32.mxu0 %vm277_vm0, %v6409_v11  ;;  %11853 = vmatpush3.bf16.msra.mxu0 %v11850_v29  ;;  %v14665_v29 = vld [vmem:[#allocation2 + $0xc8] sm:$0xff]  ;;  %v14673_v12 = vld [vmem:[#allocation2 + $0xe0] sm:$0xff]  ;;  %v15805_v11 = vld [vmem:[#allocation44_spill] sm:$0xff] }
 0x26b   : > { %10853 = vmatmul.mubr.msk.f32.gmra.mrb[24].mxu1 %vm277_vm0, %v14137_v8  ;;  %11855 = vmatprep.subr.bf16.mxu0 %v14643_v6  ;;  %v3751_v8 = vld [vmem:[#allocation2 + $0x1ee] sm:$0xff]  ;;  %v4193_v43 = vld [vmem:[%s15527_s4 + $0xe0] sm:$0xff] }
 0x26c   : > { %10855 = vmatprep.mubr.msk.f32.mxu1 %vm277_vm0, %v15802_v19  ;;  %11747 = vmatprep.subr.bf16.mxu1 %v11746_v13  ;;  %v4192_v19 = vld [vmem:[%s15527_s4 + $0xd8] sm:$0xff] }
 0x26d   : > { %11319 = vmatmul.mubr.msk.f32.gmra.mrb[46].mxu0 %vm277_vm0, %v14182_v15  ;;  %11749 = vmatpush3.bf16.msra.mxu1 %v11746_v13  ;;  %v15804_v15 = vld [vmem:[#allocation43_spill] sm:$0xff]  ;;  %v4191_v13 = vld [vmem:[%s15527_s4 + $0xd0] sm:$0xff] }
 0x26e   : > { %11321 = vmatprep.mubr.msk.f32.mxu0 %vm277_vm0, %v6411_v50  ;;  %11751 = vmatprep.subr.bf16.mxu1 %v11750_v3  ;;  %v11754_v50 = vpack.c.bf16 %v4192_v19, %v4191_v13  ;;  %v15809_v13 = vld [vmem:[#allocation48_spill] sm:$0xff] }
 0x26f   : > { %10856 = vmatmul.mubr.msk.f32.gmra.mrb[26].mxu1 %vm277_vm0, %v15803_v61  ;;  %v15806_v61 = vld [vmem:[#allocation45_spill] sm:$0xff]  ;;  %v4195_v19 = vld [vmem:[%s15527_s4 + $0xf0] sm:$0xff] }
 0x270   : > { %10858 = vmatprep.mubr.msk.f32.mxu1 %vm277_vm0, %v3750_v42  ;;  %v14686_v42 = vld [vmem:[#allocation2 + $0xf8] sm:$0xff] }
 0x271   : > { %11322 = vmatmul.mubr.msk.f32.gmra.mrb[48].mxu0 %vm277_vm0, %v15804_v15  ;;  %11753 = vmatpush3.bf16.msra.mxu1 %v11750_v3  ;;  %v14704_v3 = vld [vmem:[#allocation2 + $0x128] sm:$0xff]  ;;  %v11758_v15 = vpack.c.bf16 %v4194_v25, %v4193_v43  ;;  %v15810_v43 = vld [vmem:[#allocation49_spill] sm:$0xff]  ;;  %v14728_v25 = vld [vmem:[#allocation2 + $0x170] sm:$0xff] }
 0x272   : > { %11324 = vmatprep.mubr.msk.f32.mxu0 %vm277_vm0, %v14665_v29  ;;  %11755 = vmatprep.subr.bf16.mxu1 %v11754_v50 }
 0x273   : > { %10859 = vmatmul.mubr.msk.f32.gmra.mrb[28].mxu1 %vm277_vm0, %v3751_v8  ;;  %v14692_v8 = vld [vmem:[#allocation2 + $0x110] sm:$0xff] }
 0x274   : > { %10861 = vmatprep.mubr.msk.f32.mxu1 %vm277_vm0, %v3752_v16  ;;  %v15807_v16 = vld [vmem:[#allocation46_spill] sm:$0xff] }
 0x275   : > { %11325 = vmatmul.mubr.msk.f32.gmra.mrb[50].mxu0 %vm277_vm0, %v15805_v11  ;;  %11757 = vmatpush3.bf16.msra.mxu1 %v11754_v50  ;;  %v14710_v11 = vld [vmem:[#allocation2 + $0x140] sm:$0xff]  ;;  %v4196_v50 = vld [vmem:[%s15527_s4 + $0xf8] sm:$0xff] }
 0x276   : > { %11327 = vmatprep.mubr.msk.f32.mxu0 %vm277_vm0, %v14673_v12  ;;  %11759 = vmatprep.subr.bf16.mxu1 %v11758_v15 }
 0x277   : > { %10862 = vmatmul.mubr.msk.f32.gmra.mrb[30].mxu1 %vm277_vm0, %v3753_v0  ;;  %v15808_v0 = vld [vmem:[#allocation47_spill] sm:$0xff] }
 0x279   : > { %11328 = vmatmul.mubr.msk.f32.gmra.mrb[52].mxu0 %vm277_vm0, %v15806_v61  ;;  %11761 = vmatpush3.bf16.msra.mxu1 %v11758_v15  ;;  %v14722_v61 = vld [vmem:[#allocation2 + $0x158] sm:$0xff] }
 0x27a   : > { %11330 = vmatprep.mubr.msk.f32.mxu0 %vm277_vm0, %v14686_v42  ;;  %v15811_v15 = vld [vmem:[#allocation29_spill] sm:$0xff] }
 0x27d   : > { %11331 = vmatmul.mubr.msk.f32.gmra.mrb[54].mxu0 %vm277_vm0, %v15807_v16  ;;  %v11762_v16 = vpack.c.bf16 %v4196_v50, %v4195_v19  ;;  %v14745_v19 = vld [vmem:[#allocation2 + $0x1a8] sm:$0xff]  ;;  %v14757_v50 = vld [vmem:[#allocation2 + $0x1d8] sm:$0xff] }
 0x27e   : > { %11333 = vmatprep.mubr.msk.f32.mxu0 %vm277_vm0, %v14692_v8  ;;  %15814 = vst [vmem:[#allocation56_spill] sm:$0xff] %v14745_v19  ;;  %15816 = vst [vmem:[#allocation58_spill] sm:$0xff] %v14757_v50 }
 0x27f   : > { %11763 = vmatprep.subr.bf16.mxu1 %v11762_v16 }
 0x280   : > { %11765 = vmatpush3.bf16.msra.mxu1 %v11762_v16  ;;  %v6796_v16 = vld [vmem:[#allocation2 + $0xc0] sm:$0xff] }
 0x281   : > { %11334 = vmatmul.mubr.msk.f32.gmra.mrb[56].mxu0 %vm277_vm0, %v15808_v0  ;;  %11932 = vmatprep.subr.bf16.mxu1 %v15811_v15  ;;  %v15812_v0 = vld [vmem:[#allocation50_spill] sm:$0xff] }
 0x282   : > { %11336 = vmatprep.mubr.msk.f32.mxu0 %vm277_vm0, %v14704_v3 }
 0x285   : > { %11337 = vmatmul.mubr.msk.f32.gmra.mrb[58].mxu0 %vm277_vm0, %v15809_v13  ;;  %v14739_v13 = vld [vmem:[#allocation2 + $0x190] sm:$0xff] }
 0x286   : > { %11339 = vmatprep.mubr.msk.f32.mxu0 %vm277_vm0, %v14710_v11  ;;  %15813 = vst [vmem:[#allocation55_spill] sm:$0xff] %v14739_v13 }
 0x289   : > { %11340 = vmatmul.mubr.msk.f32.gmra.mrb[60].mxu0 %vm277_vm0, %v15810_v43  ;;  %v9374_v43 = vld [vmem:[%s15525_s2 + $0x210] sm:$0xff] }
 0x28a   : > { %11342 = vmatprep.mubr.msk.f32.mxu0 %vm277_vm0, %v14722_v61 }
 0x28d   : > { %11343 = vmatmul.mubr.msk.f32.gmra.mrb[62].mxu0 %vm277_vm0, %v15812_v0  ;;  %v9375_v0 = vld [vmem:[%s15525_s2 + $0x218] sm:$0xff] }
 0x28e   : > { %11345 = vmatprep.mubr.msk.f32.mxu0 %vm277_vm0, %v14728_v25 }
 0x291   : > { %11346 = vmatmul.mubr.msk.f32.gmra.mrb[64].mxu0 %vm277_vm0, %v14257_v54  ;;  %v14751_v54 = vld [vmem:[#allocation2 + $0x1c0] sm:$0xff] }
 0x292   : > { %11348 = vmatprep.mubr.msk.f32.mxu0 %vm277_vm0, %v14402_v7  ;;  %15815 = vst [vmem:[#allocation57_spill] sm:$0xff] %v14751_v54 }
 0x295   : > { %11349 = vmatmul.mubr.msk.f32.gmra.mrb[66].mxu0 %vm277_vm0, %v14739_v13  ;;  %v9409_v13 = vld [vmem:[%s15525_s2 + $0x228] sm:$0xff] }
 0x296   : > { %11351 = vmatprep.mubr.msk.f32.mxu0 %vm277_vm0, %v14418_v24 }
 0x299   : > { %11352 = vmatmul.mubr.msk.f32.gmra.mrb[68].mxu0 %vm277_vm0, %v14745_v19  ;;  %v9408_v19 = vld [vmem:[%s15525_s2 + $0x220] sm:$0xff] }
 0x29a   : > { %11354 = vmatprep.mubr.msk.f32.mxu0 %vm277_vm0, %v14434_v44 }
 0x29d   : > { %11355 = vmatmul.mubr.msk.f32.gmra.mrb[70].mxu0 %vm277_vm0, %v14751_v54  ;;  %v11858_v54 = vpack.c.bf16 %v9375_v0, %v9374_v43  ;;  %v6802_v43 = vld [vmem:[#allocation2 + $0x108] sm:$0xff]  ;;  %v6804_v0 = vld [vmem:[#allocation2 + $0x120] sm:$0xff] }
 0x29e   : > { %11357 = vmatprep.mubr.msk.f32.mxu0 %vm277_vm0, %v14450_v14 }
 0x2a1   : > { %11358 = vmatmul.mubr.msk.f32.gmra.mrb[72].mxu0 %vm277_vm0, %v14757_v50  ;;  %v6800_v50 = vld [vmem:[#allocation2 + $0xf0] sm:$0xff] }
 0x2a2   : > { %11368 = vmatprep.mubr.msk.f32.mxu0 %vm277_vm0, %v6796_v16  ;;  %v11862_v16 = vpack.c.bf16 %v9409_v13, %v9408_v19  ;;  %v6810_v13 = vld [vmem:[#allocation2 + $0x168] sm:$0xff]  ;;  %v6820_v19 = vld [vmem:[#allocation2 + $0x1e0] sm:$0xff] }
 0x2a5   : > { %11369 = vmatmul.mubr.msk.f32.vlgmr.msra.gmra.mrb[42].mxu0 %vm277_vm0, %v14665_v29 }
 0x2a6   : > { %11371 = vmatprep.mubr.msk.f32.mxu0 %vm277_vm0, %v6798_v26  ;;  %11857 = vmatpush3.bf16.msra.mxu0 %v14643_v6  ;;  %v6806_v26 = vld [vmem:[#allocation2 + $0x138] sm:$0xff]  ;;  %v6808_v6 = vld [vmem:[#allocation2 + $0x150] sm:$0xff] }
 0x2a7   : > { %11859 = vmatprep.subr.bf16.mxu0 %v11858_v54 }
 0x2a9   : > { %11372 = vmatmul.mubr.msk.f32.gmra.mrb[44].mxu0 %vm277_vm0, %v14673_v12 }
 0x2aa   : > { %11374 = vmatprep.mubr.msk.f32.mxu0 %vm277_vm0, %v6800_v50  ;;  %11861 = vmatpush3.bf16.msra.mxu0 %v11858_v54  ;;  %v9411_v54 = vld [vmem:[%s15525_s2 + $0x238] sm:$0xff]  ;;  %v8308_v50 = vsel %vm277_vm0, %v12933_v17, 0.0 }
 0x2ab   : > { %11863 = vmatprep.subr.bf16.mxu0 %v11862_v16 }
 0x2ad   : > { %11375 = vmatmul.mubr.msk.f32.gmra.mrb[46].mxu0 %vm277_vm0, %v14686_v42 }
 0x2ae   : > { %11377 = vmatprep.mubr.msk.f32.mxu0 %vm277_vm0, %v6802_v43  ;;  %v8309_v43 = vsel %vm277_vm0, %v12936_v18, 0.0  ;;  %v8313_v18 = vsel %vm277_vm0, %v12950_v21, 0.0  ;;  %v8317_v21 = vsel %vm277_vm0, %v12956_v23, 0.0  ;;  %v8321_v23 = vsel %vm277_vm0, %v12969_v28, 0.0 }
 0x2b1   : > { %11378 = vmatmul.mubr.msk.f32.gmra.mrb[48].mxu0 %vm277_vm0, %v14692_v8 }
 0x2b2   : > { %11380 = vmatprep.mubr.msk.f32.mxu0 %vm277_vm0, %v6804_v0 }
 0x2b5   : > { %11381 = vmatmul.mubr.msk.f32.gmra.mrb[50].mxu0 %vm277_vm0, %v14704_v3 }
 0x2b6   : > { %11383 = vmatprep.mubr.msk.f32.mxu0 %vm277_vm0, %v6806_v26  ;;  %v8310_v26 = vadd.f32 %v8309_v43, %v8308_v50  ;;  %v15820_v43 = vld [vmem:[#allocation53_spill] sm:$0xff] }
 0x2b9   : > { %11384 = vmatmul.mubr.msk.f32.gmra.mrb[52].mxu0 %vm277_vm0, %v14710_v11 }
 0x2ba   : > { %11386 = vmatprep.mubr.msk.f32.mxu0 %vm277_vm0, %v6808_v6  ;;  %v8311_v6 = vsel %vm277_vm0, %v12939_v20, 0.0  ;;  %v8315_v20 = vsel %vm277_vm0, %v12953_v22, 0.0  ;;  %v8319_v22 = vsel %vm277_vm0, %v12966_v27, 0.0  ;;  %v8035_v27 = vld [vmem:[%s15527_s4 + $0x100] sm:$0xff] }
 0x2bb   : > { %v8312_v17 = vadd.f32 %v8311_v6, %v8310_v26  ;;  %v7214_v6 = vld [vmem:[#allocation2 + $0x214] sm:$0xff] }
 0x2bd   : > { %11387 = vmatmul.mubr.msk.f32.gmra.mrb[54].mxu0 %vm277_vm0, %v14722_v61 }
 0x2be   : > { %11389 = vmatprep.mubr.msk.f32.mxu0 %vm277_vm0, %v6810_v13  ;;  %v15817_v13 = vld [vmem:[#allocation51_spill] sm:$0xff] }
 0x2c1   : > { %11390 = vmatmul.mubr.msk.f32.gmra.mrb[56].mxu0 %vm277_vm0, %v14728_v25 }
 0x2c2   : > { %11392 = vmatprep.mubr.msk.f32.mxu0 %vm277_vm0, %v14390_v49  ;;  %v14815_v49 = vld [vmem:[#allocation2 + $0x1e8] sm:$0xff] }
 0x2c5   : > { %11393 = vmatmul.mubr.msk.f32.gmra.mrb[58].mxu0 %vm277_vm0, %v14402_v7  ;;  %v6822_v7 = vld [vmem:[#allocation2 + $0x1f8] sm:$0xff] }
 0x2c6   : > { %11395 = vmatprep.mubr.msk.f32.mxu0 %vm277_vm0, %v14406_v1  ;;  %v14820_v1 = vld [vmem:[#allocation2 + $0x200] sm:$0xff] }
 0x2c9   : > { %11396 = vmatmul.mubr.msk.f32.gmra.mrb[60].mxu0 %vm277_vm0, %v14418_v24  ;;  %v6824_v24 = vld [vmem:[#allocation2 + $0x210] sm:$0xff] }
 0x2ca   : > { %11398 = vmatprep.mubr.msk.f32.mxu0 %vm277_vm0, %v14422_v58  ;;  %v14825_v58 = vld [vmem:[#allocation2 + $0x218] sm:$0xff] }
 0x2cd   : > { %11399 = vmatmul.mubr.msk.f32.gmra.mrb[62].mxu0 %vm277_vm0, %v14434_v44  ;;  %v6826_v44 = vld [vmem:[#allocation2 + $0x228] sm:$0xff] }
 0x2ce   : > { %11401 = vmatprep.mubr.msk.f32.mxu0 %vm277_vm0, %v14438_v41  ;;  %v14830_v41 = vld [vmem:[#allocation2 + $0x230] sm:$0xff] }
 0x2d1   : > { %11402 = vmatmul.mubr.msk.f32.gmra.mrb[64].mxu0 %vm277_vm0, %v14450_v14  ;;  %v9410_v14 = vld [vmem:[%s15525_s2 + $0x230] sm:$0xff] }
 0x2d2   : > { %11404 = vmatprep.mubr.msk.f32.mxu0 %vm277_vm0, %v6820_v19  ;;  %v11866_v0 = vpack.c.bf16 %v9411_v54, %v9410_v14  ;;  %v15818_v14 = vld [vmem:[#allocation30_spill] sm:$0xff]  ;;  %v15819_v54 = vld [vmem:[#allocation52_spill] sm:$0xff] }
 0x2d5   : > { %11405 = vmatmul.mubr.msk.f32.gmra.mrb[66].mxu0 %vm277_vm0, %v14815_v49 }
 0x2d6   : > { %11407 = vmatprep.mubr.msk.f32.mxu0 %vm277_vm0, %v6822_v7 }
 0x2d9   : > { %11408 = vmatmul.mubr.msk.f32.gmra.mrb[68].mxu0 %vm277_vm0, %v14820_v1 }
 0x2da   : > { %11410 = vmatprep.mubr.msk.f32.mxu0 %vm277_vm0, %v6824_v24 }
 0x2dd   : > { %11411 = vmatmul.mubr.msk.f32.gmra.mrb[70].mxu0 %vm277_vm0, %v14825_v58 }
 0x2de   : > { %11413 = vmatprep.mubr.msk.f32.mxu0 %vm277_vm0, %v6826_v44 }
 0x2e1   : > { %11414 = vmatmul.mubr.msk.f32.gmra.mrb[72].mxu0 %vm277_vm0, %v14830_v41 }
 0x2e2   : > { %11424 = vmatprep.mubr.msk.f32.mxu0 %vm277_vm0, %v14329_v46  ;;  %v8314_v46 = vadd.f32 %v8313_v18, %v8312_v17 }
 0x2e5   : > { %11425 = vmatmul.mubr.msk.f32.vlgmr.msra.gmra.mrb[42].mxu0 %vm277_vm0, %v14336_v2  ;;  %v8316_v2 = vadd.f32 %v8315_v20, %v8314_v46  ;;  %v15822_v20 = vld [vmem:[#allocation31_spill] sm:$0xff] }
 0x2e6   : > { %11427 = vmatprep.mubr.msk.f32.mxu0 %vm277_vm0, %v14340_v10  ;;  %11865 = vmatpush3.bf16.msra.mxu0 %v11862_v16 }
 0x2e7   : > { %11867 = vmatprep.subr.bf16.mxu0 %v11866_v0  ;;  %v8318_v10 = vadd.f32 %v8317_v21, %v8316_v2  ;;  %v15823_v21 = vld [vmem:[#allocation54_spill] sm:$0xff] }
 0x2e9   : > { %11428 = vmatmul.mubr.msk.f32.gmra.mrb[44].mxu0 %vm277_vm0, %v14348_v55  ;;  %v8320_v55 = vadd.f32 %v8319_v22, %v8318_v10  ;;  %v7215_v22 = vld [vmem:[#allocation2 + $0x21c] sm:$0xff] }
 0x2ea   : > { %11430 = vmatprep.mubr.msk.f32.mxu0 %vm277_vm0, %v14352_v5  ;;  %11869 = vmatpush3.bf16.msra.mxu0 %v11866_v0 }
 0x2eb   : > { %v8322_v5 = vadd.f32 %v8321_v23, %v8320_v55  ;;  %v15824_v55 = vld [vmem:[#allocation7_spill] sm:$0xff] }
 0x2ec   : > { %v8337_v23 = vsel %vm277_vm0, %v15824_v55, 0.0 }
 0x2ed   : > { %11431 = vmatmul.mubr.msk.f32.gmra.mrb[46].mxu0 %vm277_vm0, %v14360_v39  ;;  %v8036_v39 = vld [vmem:[%s15527_s4 + $0x108] sm:$0xff] }
 0x2ee   : > { %11433 = vmatprep.mubr.msk.f32.mxu0 %vm277_vm0, %v14364_v30  ;;  %v8323_v30 = vsel %vm277_vm0, %v12982_v31, 0.0  ;;  %v8327_v31 = vsel %vm277_vm0, %v12988_v33, 0.0 }
 0x2ef   : > { %v8324_v28 = vadd.f32 %v8323_v30, %v8322_v5 }
 0x2f1   : > { %11434 = vmatmul.mubr.msk.f32.gmra.mrb[48].mxu0 %vm277_vm0, %v14372_v4  ;;  %v14894_v4 = vpack.c.bf16 %v8036_v39, %v8035_v27  ;;  %v7216_v39 = vld [vmem:[#allocation2 + $0x22c] sm:$0xff] }
 0x2f2   : > { %11436 = vmatprep.mubr.msk.f32.mxu0 %vm277_vm0, %v14376_v40  ;;  %v8325_v40 = vsel %vm277_vm0, %v12985_v32, 0.0  ;;  %v8329_v32 = vsel %vm277_vm0, %v12995_v36, 0.0 }
 0x2f3   : > { %11871 = vmatprep.subr.bf16.mxu0 %v14894_v4 }
 0x2f5   : > { %11437 = vmatmul.mubr.msk.f32.gmra.mrb[50].mxu0 %vm277_vm0, %v14384_v62  ;;  %v8326_v62 = vadd.f32 %v8325_v40, %v8324_v28 }
 0x2f6   : > { %11439 = vmatprep.mubr.msk.f32.mxu0 %vm277_vm0, %v14388_v60  ;;  %v14914_v60 = vld [vmem:[%s15528_s5 + $0x1] ss:$0 sm:$0xff] }
 0x2f9   : > { %11440 = vmatmul.mubr.msk.f32.gmra.mrb[52].mxu0 %vm277_vm0, %v14398_v9  ;;  %v8328_v9 = vadd.f32 %v8327_v31, %v8326_v62  ;;  %v15825_v62 = vld [vmem:[#allocation32_spill] sm:$0xff] }
 0x2fa   : > { %11442 = vmatprep.mubr.msk.f32.mxu0 %vm277_vm0, %v14404_v35 }
 0x2fd   : > { %11443 = vmatmul.mubr.msk.f32.gmra.mrb[54].mxu0 %vm277_vm0, %v14414_v59 }
 0x2fe   : > { %11445 = vmatprep.mubr.msk.f32.mxu0 %vm277_vm0, %v14420_v57 }
 0x301   : > { %11446 = vmatmul.mubr.msk.f32.gmra.mrb[56].mxu0 %vm277_vm0, %v14430_v48  ;;  %v8330_v48 = vadd.f32 %v8329_v32, %v8328_v9  ;;  %v7217_v32 = vld [vmem:[#allocation2 + $0x234] sm:$0xff] }
 0x302   : > { %11448 = vmatprep.mubr.msk.f32.mxu0 %vm277_vm0, %v14436_v52  ;;  %v8331_v52 = vsel %vm277_vm0, %v12998_v37, 0.0  ;;  %v8333_v37 = vsel %vm277_vm0, %v13001_v38, 0.0  ;;  %v15821_v38 = vld [vmem:[#allocation6_spill] sm:$0xff] }
 0x305   : > { %11449 = vmatmul.mubr.msk.f32.gmra.mrb[58].mxu0 %vm277_vm0, %v14446_v34 }
 0x306   : > { %11451 = vmatprep.mubr.msk.f32.mxu0 %vm277_vm0, %v14452_v63 }
 0x309   : > { %11452 = vmatmul.mubr.msk.f32.gmra.mrb[60].mxu0 %vm277_vm0, %v14466_v53 }
 0x30a   : > { %11454 = vmatprep.mubr.msk.f32.mxu0 %vm277_vm0, %v14470_v45 }
 0x30d   : > { %11455 = vmatmul.mubr.msk.f32.gmra.mrb[62].mxu0 %vm277_vm0, %v14484_v51  ;;  %v8332_v51 = vadd.f32 %v8331_v52, %v8330_v48 }
 0x30e   : > { %v10818_v35 = vpop.f32.mrb[0].mxu1  ;;  %11457 = vmatprep.mubr.msk.f32.mxu0 %vm277_vm0, %v14488_v56 }
 0x30f   : > { %v4118_v59 = vadd.f32 %v10818_v35, %v14914_v60  ;;  %v3921_v57 = vpop.f32.mrb[1].mxu1  ;;  %v8334_v50 = vadd.f32 %v8333_v37, %v8332_v51  ;;  %v15826_v35 = vld [vmem:[#allocation8_spill] sm:$0xff] }
 0x310   : > { %v4117_v33 = vadd.f32 %v14914_v60, %v3921_v57  ;;  %v7577_v51 = vld [vmem:[#allocation2 + $0xd0] sm:$0xff] }
 0x311   : > { %v4150_v53 = vmax.f32 %v4118_v59, 0.0  ;;  %11458 = vmatmul.mubr.msk.f32.gmra.mrb[64].mxu0 %vm277_vm0, %v14499_v47  ;;  %v8339_v59 = vsel %vm277_vm0, %v15826_v35, 0.0  ;;  %v12634_v35 = vmov 0.0|0.0  }
 0x312   : > { %v4149_v34 = vmax.f32 %v4117_v33, 0.0  ;;  %v10821_v63 = vpop.f32.mrb[2].mxu1  ;;  %11460 = vmatprep.mubr.msk.f32.mxu0 %vm277_vm0, %v15817_v13  ;;  %v15828_v13 = vld [vmem:[#allocation9_spill] sm:$0xff] }
 0x313   : > { %v4120_v36 = vadd.f32 %v10821_v63, %v14914_v60  ;;  %v3931_v45 = vpop.f32.mrb[3].mxu1  ;;  %v15827_v63 = vld [vmem:[#allocation33_spill] sm:$0xff]  ;;  %v8341_v37 = vsel %vm277_vm0, %v15828_v13, 0.0 }
 0x314   : > { %v4119_v16 = vadd.f32 %v14914_v60, %v3931_v45  ;;  %10896 = vmatprep.mubr.f32.mxu1 %v4149_v34  ;;  %v8038_v45 = vld [vmem:[%s15527_s4 + $0x118] sm:$0xff] }
 0x315   : > { %10897 = vmatmul.mubr.f32.vlgmr.msra.gmra.mrb[32].mxu1 %v4150_v53  ;;  %v4152_v7 = vmax.f32 %v4120_v36, 0.0  ;;  %11461 = vmatmul.mubr.msk.f32.gmra.mrb[66].mxu0 %vm277_vm0, %v15819_v54  ;;  %v8037_v36 = vld [vmem:[%s15527_s4 + $0x110] sm:$0xff] }
 0x316   : > { %v4151_v56 = vmax.f32 %v4119_v16, 0.0  ;;  %v10824_v19 = vpop.f32.mrb[4].mxu1  ;;  %11940 = vmatpush3.bf16.msra.mxu1 %v15811_v15  ;;  %11463 = vmatprep.mubr.msk.f32.mxu0 %vm277_vm0, %v15820_v43  ;;  %v8335_v15 = vsel %vm277_vm0, %v15821_v38, 0.0  ;;  %v15830_v43 = vld [vmem:[#allocation10_spill] sm:$0xff] }
 0x317   : > { %v4122_v24 = vadd.f32 %v10824_v19, %v14914_v60  ;;  %v3941_v44 = vpop.f32.mrb[5].mxu1  ;;  %11933 = vmatprep.subr.bf16.mxu1 %v15818_v14  ;;  %v8336_v10 = vadd.f32 %v8335_v15, %v8334_v50  ;;  %v7579_v50 = vld [vmem:[#allocation2 + $0xe8] sm:$0xff]  ;;  %v8343_v38 = vsel %vm277_vm0, %v15830_v43, 0.0 }
 0x318   : > { %v4121_v47 = vadd.f32 %v14914_v60, %v3941_v44  ;;  %10899 = vmatprep.mubr.f32.mxu1 %v4151_v56 }
 0x319   : > { %10900 = vmatmul.mubr.f32.gmra.mrb[34].mxu1 %v4152_v7  ;;  %v4154_v17 = vmax.f32 %v4122_v24, 0.0  ;;  %11464 = vmatmul.mubr.msk.f32.gmra.mrb[68].mxu0 %vm277_vm0, %v15823_v21  ;;  %v8338_v9 = vadd.f32 %v8337_v23, %v8336_v10 }
 0x31a   : > { %v4153_v0 = vmax.f32 %v4121_v47, 0.0  ;;  %v10827_v26 = vpop.f32.mrb[6].mxu1  ;;  %11941 = vmatpush3.bf16.msra.mxu1 %v15818_v14  ;;  %11466 = vmatprep.mubr.msk.f32.mxu0 %vm277_vm0, %v7214_v6  ;;  %v15829_v14 = vld [vmem:[#allocation34_spill] sm:$0xff]  ;;  %v11874_v47 = vpack.c.bf16 %v8038_v45, %v8037_v36 }
 0x31b   : > { %v4124_v18 = vadd.f32 %v10827_v26, %v14914_v60  ;;  %v3951_v46 = vpop.f32.mrb[7].mxu1  ;;  %11934 = vmatprep.subr.bf16.mxu1 %v15822_v20  ;;  %v8340_v16 = vadd.f32 %v8339_v59, %v8338_v9 }
 0x31c   : > { %v4123_v2 = vadd.f32 %v14914_v60, %v3951_v46  ;;  %10902 = vmatprep.mubr.f32.mxu1 %v4153_v0 }
 0x31d   : > { %10903 = vmatmul.mubr.f32.gmra.mrb[36].mxu1 %v4154_v17  ;;  %v4156_v30 = vmax.f32 %v4124_v18, 0.0  ;;  %11467 = vmatmul.mubr.msk.f32.gmra.mrb[70].mxu0 %vm277_vm0, %v7215_v22  ;;  %v15831_v18 = vld [vmem:[#allocation37_spill] sm:$0xff] }
 0x31e   : > { %v4155_v5 = vmax.f32 %v4123_v2, 0.0  ;;  %v10830_v27 = vpop.f32.mrb[8].mxu1  ;;  %11942 = vmatpush3.bf16.msra.mxu1 %v15822_v20  ;;  %11469 = vmatprep.mubr.msk.f32.mxu0 %vm277_vm0, %v7216_v39  ;;  %v7581_v20 = vld [vmem:[#allocation2 + $0x100] sm:$0xff]  ;;  %v15832_v2 = vld [vmem:[#allocation11_spill] sm:$0xff]  ;;  %v7583_v39 = vld [vmem:[#allocation2 + $0x118] sm:$0xff] }
 0x31f   : > { %v4126_v28 = vadd.f32 %v10830_v27, %v14914_v60  ;;  %v3961_v40 = vpop.f32.mrb[9].mxu1  ;;  %11935 = vmatprep.subr.bf16.mxu1 %v15825_v62 }
 0x320   : > { %v4125_v31 = vadd.f32 %v14914_v60, %v3961_v40  ;;  %10905 = vmatprep.mubr.f32.mxu1 %v4155_v5  ;;  %v15833_v5 = vld [vmem:[#allocation39_spill] sm:$0xff] }
 0x321   : > { %10906 = vmatmul.mubr.f32.gmra.mrb[38].mxu1 %v4156_v30  ;;  %v4158_v48 = vmax.f32 %v4126_v28, 0.0  ;;  %11470 = vmatmul.mubr.msk.f32.gmra.mrb[72].mxu0 %vm277_vm0, %v7217_v32  ;;  %v15834_v30 = vld [vmem:[#allocation12_spill] sm:$0xff] }
 0x322   : > { %v4157_v57 = vmax.f32 %v4125_v31, 0.0  ;;  %v10833_v33 = vpop.f32.mrb[10].mxu1  ;;  %11943 = vmatpush3.bf16.msra.mxu1 %v15825_v62  ;;  %11480 = vmatprep.mubr.msk.f32.mxu0 %vm277_vm0, %v14665_v29  ;;  %v8342_v29 = vadd.f32 %v8341_v37, %v8340_v16  ;;  %v8347_v28 = vsel %vm277_vm0, %v15834_v30, 0.0 }
 0x323   : > { %v4128_v52 = vadd.f32 %v10833_v33, %v14914_v60  ;;  %v3971_v34 = vpop.f32.mrb[11].mxu1  ;;  %11936 = vmatprep.subr.bf16.mxu1 %v15827_v63  ;;  %v15835_v33 = vld [vmem:[#allocation13_spill] sm:$0xff] }
 0x324   : > { %v4127_v53 = vadd.f32 %v14914_v60, %v3971_v34  ;;  %10908 = vmatprep.mubr.f32.mxu1 %v4157_v57  ;;  %v7585_v57 = vld [vmem:[#allocation2 + $0x130] sm:$0xff] }
 0x325   : > { %10909 = vmatmul.mubr.f32.gmra.mrb[40].mxu1 %v4158_v48  ;;  %v4160_v7 = vmax.f32 %v4128_v52, 0.0  ;;  %11481 = vmatmul.mubr.msk.f32.vlgmr.msra.gmra.mrb[42].mxu0 %vm277_vm0, %v7577_v51  ;;  %v8349_v48 = vsel %vm277_vm0, %v15835_v33, 0.0  ;;  %v15836_v51 = vld [vmem:[#allocation14_spill] sm:$0xff] }
 0x326   : > { %v4159_v56 = vmax.f32 %v4127_v53, 0.0  ;;  %v10836_v19 = vpop.f32.mrb[12].mxu1  ;;  %11944 = vmatpush3.bf16.msra.mxu1 %v15827_v63  ;;  %11483 = vmatprep.mubr.msk.f32.mxu0 %vm277_vm0, %v14673_v12  ;;  %v8344_v12 = vadd.f32 %v8343_v38, %v8342_v29  ;;  %v8351_v13 = vsel %vm277_vm0, %v15836_v51, 0.0  ;;  %v7598_v51 = vld [vmem:[#allocation2 + $0x1d0] sm:$0xff] }
 0x327   : > { %v4130_v24 = vadd.f32 %v10836_v19, %v14914_v60  ;;  %v3981_v44 = vpop.f32.mrb[13].mxu1  ;;  %11937 = vmatprep.subr.bf16.mxu1 %v15829_v14  ;;  %11873 = vmatpush3.bf16.msra.mxu0 %v14894_v4  ;;  %v8345_v4 = vsel %vm277_vm0, %v15832_v2, 0.0 }
 0x328   : > { %v4129_v54 = vadd.f32 %v14914_v60, %v3981_v44  ;;  %10911 = vmatprep.mubr.f32.mxu1 %v4159_v56  ;;  %11875 = vmatprep.subr.bf16.mxu0 %v11874_v47 }
 0x329   : > { %10912 = vmatmul.mubr.f32.gmra.mrb[42].mxu1 %v4160_v7  ;;  %v4162_v26 = vmax.f32 %v4130_v24, 0.0  ;;  %11484 = vmatmul.mubr.msk.f32.gmra.mrb[44].mxu0 %vm277_vm0, %v7579_v50 }
 0x32a   : > { %v4161_v15 = vmax.f32 %v4129_v54, 0.0  ;;  %v10839_v0 = vpop.f32.mrb[14].mxu1  ;;  %11945 = vmatpush3.bf16.msra.mxu1 %v15829_v14  ;;  %11486 = vmatprep.mubr.msk.f32.mxu0 %vm277_vm0, %v14686_v42  ;;  %v8346_v42 = vadd.f32 %v8345_v4, %v8344_v12  ;;  %v7592_v12 = vld [vmem:[#allocation2 + $0x188] sm:$0xff] }
 0x32b   : > { %v4132_v6 = vadd.f32 %v10839_v0, %v14914_v60  ;;  %v3991_v17 = vpop.f32.mrb[15].mxu1  ;;  %11938 = vmatprep.subr.bf16.mxu1 %v15831_v18  ;;  %11877 = vmatpush3.bf16.msra.mxu0 %v11874_v47  ;;  %v15837_v47 = vld [vmem:[#allocation15_spill] sm:$0xff] }
 0x32c   : > { %v4131_v46 = vadd.f32 %v14914_v60, %v3991_v17  ;;  %10914 = vmatprep.mubr.f32.mxu1 %v4161_v15  ;;  %v8353_v54 = vsel %vm277_vm0, %v15837_v47, 0.0  ;;  %v15848_v47 = vld [vmem:[#allocation35_spill] sm:$0xff] }
 0x32d   : > { %10915 = vmatmul.mubr.f32.gmra.mrb[44].mxu1 %v4162_v26  ;;  %v4164_v22 = vmax.f32 %v4132_v6, 0.0  ;;  %11487 = vmatmul.mubr.msk.f32.gmra.mrb[46].mxu0 %vm277_vm0, %v7581_v20  ;;  %v15838_v6 = vld [vmem:[#allocation16_spill] sm:$0xff] }
 0x32e   : > { %v4163_v21 = vmax.f32 %v4131_v46, 0.0  ;;  %v10842_v10 = vpop.f32.mrb[16].mxu1  ;;  %11946 = vmatpush3.bf16.msra.mxu1 %v15831_v18  ;;  %11489 = vmatprep.mubr.msk.f32.mxu0 %vm277_vm0, %v14692_v8  ;;  %v8348_v8 = vadd.f32 %v8347_v28, %v8346_v42  ;;  %v8355_v17 = vsel %vm277_vm0, %v15838_v6, 0.0  ;;  %v15840_v28 = vld [vmem:[#allocation55_spill] sm:$0xff] }
 0x32f   : > { %v4134_v55 = vadd.f32 %v10842_v10, %v14914_v60  ;;  %v4001_v23 = vpop.f32.mrb[17].mxu1  ;;  %11939 = vmatprep.subr.bf16.mxu1 %v15833_v5 }
 0x330   : > { %v4133_v27 = vadd.f32 %v14914_v60, %v4001_v23  ;;  %10917 = vmatprep.mubr.f32.mxu1 %v4163_v21  ;;  %v8350_v16 = vadd.f32 %v8349_v48, %v8348_v8  ;;  %v15053_v48 = vld [vmem:[%s15528_s5] ss:$0 sm:$0xff] }
 0x331   : > { %10918 = vmatmul.mubr.f32.gmra.mrb[46].mxu1 %v4164_v22  ;;  %v4166_v31 = vmax.f32 %v4134_v55, 0.0  ;;  %11490 = vmatmul.mubr.msk.f32.gmra.mrb[48].mxu0 %vm277_vm0, %v7583_v39 }
 0x332   : > { %v4165_v40 = vmax.f32 %v4133_v27, 0.0  ;;  %v10845_v62 = vpop.f32.mrb[18].mxu1  ;;  %11947 = vmatpush3.bf16.msra.mxu1 %v15833_v5  ;;  %11492 = vmatprep.mubr.msk.f32.mxu0 %vm277_vm0, %v14704_v3  ;;  %v7587_v3 = vld [vmem:[#allocation2 + $0x148] sm:$0xff]  ;;  %v8352_v14 = vadd.f32 %v8351_v13, %v8350_v16  ;;  %v7594_v5 = vld [vmem:[#allocation2 + $0x1a0] sm:$0xff]  ;;  %v15845_v13 = vld [vmem:[#allocation65_spill] sm:$0xff] }
 0x333   : > { %v4136_v9 = vadd.f32 %v10845_v62, %v14914_v60  ;;  %v4011_v32 = vpop.f32.mrb[19].mxu1  ;;  %11902 = vmatprep.subr.bf16.mxu1 %v12634_v35  ;;  %v15841_v62 = vld [vmem:[#allocation18_spill] sm:$0xff] }
 0x334   : > { %v4135_v59 = vadd.f32 %v14914_v60, %v4011_v32  ;;  %10920 = vmatprep.mubr.f32.mxu1 %v4165_v40  ;;  %v8354_v26 = vadd.f32 %v8353_v54, %v8352_v14  ;;  %v15847_v14 = vld [vmem:[#allocation57_spill] sm:$0xff]  ;;  %v8363_v54 = vsel %vm277_vm0, %v15848_v47, 0.0 }
 0x335   : > { %10921 = vmatmul.mubr.f32.gmra.mrb[48].mxu1 %v4166_v31  ;;  %v4168_v63 = vmax.f32 %v4136_v9, 0.0  ;;  %11493 = vmatmul.mubr.msk.f32.gmra.mrb[50].mxu0 %vm277_vm0, %v7585_v57  ;;  %v8359_v31 = vsel %vm277_vm0, %v15841_v62, 0.0 }
 0x336   : > { %v4167_v52 = vmax.f32 %v4135_v59, 0.0  ;;  %v10848_v34 = vpop.f32.mrb[20].mxu1  ;;  %11495 = vmatprep.mubr.msk.f32.mxu0 %vm277_vm0, %v14710_v11  ;;  %v7589_v11 = vld [vmem:[#allocation2 + $0x160] sm:$0xff]  ;;  %v8356_v10 = vadd.f32 %v8355_v17, %v8354_v26  ;;  %v7596_v59 = vld [vmem:[#allocation2 + $0x1b8] sm:$0xff] }
 0x337   : > { %v4138_v53 = vadd.f32 %v10848_v34, %v14914_v60  ;;  %v4021_v36 = vpop.f32.mrb[21].mxu1  ;;  %v15851_v17 = vld [vmem:[#allocation58_spill] sm:$0xff] }
 0x338   : > { %v4137_v45 = vadd.f32 %v14914_v60, %v4021_v36  ;;  %10923 = vmatprep.mubr.f32.mxu1 %v4167_v52  ;;  %v15842_v52 = vld [vmem:[#allocation20_spill] sm:$0xff] }
 0x339   : > { %10924 = vmatmul.mubr.f32.gmra.mrb[50].mxu1 %v4168_v63  ;;  %v4170_v19 = vmax.f32 %v4138_v53, 0.0  ;;  %11496 = vmatmul.mubr.msk.f32.gmra.mrb[52].mxu0 %vm277_vm0, %v7587_v3  ;;  %v637_v34 = vadd.f32 %v15053_v48, %v15842_v52  ;;  %v15843_v53 = vld [vmem:[#allocation56_spill] sm:$0xff]  ;;  %v15860_v52 = vld [vmem:[#allocation67_spill] sm:$0xff] }
 0x33a   : > { %v4169_v37 = vmax.f32 %v4137_v45, 0.0  ;;  %v10851_v56 = vpop.f32.mrb[22].mxu1  ;;  %11498 = vmatprep.mubr.msk.f32.mxu0 %vm277_vm0, %v14722_v61  ;;  %v7591_v61 = vld [vmem:[#allocation2 + $0x178] sm:$0xff]  ;;  %v15844_v45 = vld [vmem:[#allocation19_spill] sm:$0xff] }
 0x33b   : > { %v4140_v7 = vadd.f32 %v10851_v56, %v14914_v60  ;;  %v4031_v24 = vpop.f32.mrb[23].mxu1  ;;  %v8361_v16 = vsel %vm277_vm0, %v15844_v45, 0.0 }
 0x33c   : > { %v4139_v44 = vadd.f32 %v14914_v60, %v4031_v24  ;;  %10926 = vmatprep.mubr.f32.mxu1 %v4169_v37  ;;  %v642_v37 = vadd.f32 %v15053_v48, %v15845_v13  ;;  %v15846_v24 = vld [vmem:[#allocation22_spill] sm:$0xff] }
 0x33d   : > { %10927 = vmatmul.mubr.f32.gmra.mrb[52].mxu1 %v4170_v19  ;;  %v4172_v43 = vmax.f32 %v4140_v7, 0.0  ;;  %11499 = vmatmul.mubr.msk.f32.gmra.mrb[54].mxu0 %vm277_vm0, %v7589_v11  ;;  %v8380_v19 = vld [vmem:[%s15526_s3 + $0x8] sm:$0xff]  ;;  %v755_v7 = vmax.f32 %v637_v34, 0.0  ;;  %v687_v34 = vadd.f32 %v15053_v48, %v15860_v52 }
 0x33e   : > { %v4171_v29 = vmax.f32 %v4139_v44, 0.0  ;;  %v10854_v50 = vpop.f32.mrb[24].mxu1  ;;  %11501 = vmatprep.mubr.msk.f32.mxu0 %vm277_vm0, %v14728_v25  ;;  %v15839_v25 = vld [vmem:[#allocation17_spill] sm:$0xff]  ;;  %v647_v44 = vadd.f32 %v15053_v48, %v15846_v24  ;;  %v8039_v24 = vld [vmem:[%s15527_s4 + $0x120] sm:$0xff] }
 0x33f   : > { %v4142_v38 = vadd.f32 %v10854_v50, %v14914_v60  ;;  %v4041_v15 = vpop.f32.mrb[25].mxu1  ;;  %v8357_v22 = vsel %vm277_vm0, %v15839_v25, 0.0  ;;  %v756_v50 = vmax.f32 %v642_v37, 0.0 }
 0x340   : > { %v4141_v0 = vadd.f32 %v14914_v60, %v4041_v15  ;;  %10929 = vmatprep.mubr.f32.mxu1 %v4171_v29  ;;  %v8358_v40 = vadd.f32 %v8357_v22, %v8356_v10  ;;  %v8381_v15 = vld [vmem:[%s15526_s3 + $0x10] sm:$0xff]  ;;  %v757_v26 = vmax.f32 %v647_v44, 0.0  ;;  %v15854_v22 = vld [vmem:[#allocation26_spill] sm:$0xff]  ;;  %v8040_v44 = vld [vmem:[%s15527_s4 + $0x128] sm:$0xff] }
 0x341   : > { %10930 = vmatmul.mubr.f32.gmra.mrb[54].mxu1 %v4172_v43  ;;  %v4174_v20 = vmax.f32 %v4142_v38, 0.0  ;;  %11502 = vmatmul.mubr.msk.f32.gmra.mrb[56].mxu0 %vm277_vm0, %v7591_v61  ;;  %v15849_v43 = vld [vmem:[#allocation21_spill] sm:$0xff]  ;;  %v15850_v61 = vld [vmem:[#allocation24_spill] sm:$0xff] }
 0x342   : > { %v4173_v18 = vmax.f32 %v4141_v0, 0.0  ;;  %v10857_v46 = vpop.f32.mrb[26].mxu1  ;;  %11504 = vmatprep.mubr.msk.f32.mxu0 %vm277_vm0, %v7592_v12  ;;  %v8360_v36 = vadd.f32 %v8359_v31, %v8358_v40  ;;  %v652_v38 = vadd.f32 %v15053_v48, %v15849_v43  ;;  %v8382_v0 = vld [vmem:[%s15526_s3 + $0x18] sm:$0xff]  ;;  %v657_v6 = vadd.f32 %v15053_v48, %v15850_v61  ;;  %v15852_v12 = vld [vmem:[#allocation36_spill] sm:$0xff] }
 0x343   : > { %v4144_v2 = vadd.f32 %v10857_v46, %v14914_v60  ;;  %v4051_v4 = vpop.f32.mrb[27].mxu1  ;;  %v7601_v46 = vld [vmem:[#allocation2 + $0x1f0] sm:$0xff]  ;;  %v15866_v43 = vld [vmem:[#allocation73_spill] sm:$0xff] }
 0x344   : > { %v4143_v21 = vadd.f32 %v14914_v60, %v4051_v4  ;;  %10932 = vmatprep.mubr.f32.mxu1 %v4173_v18  ;;  %v8362_v11 = vadd.f32 %v8361_v16, %v8360_v36  ;;  %v758_v4 = vmax.f32 %v652_v38, 0.0  ;;  %v759_v25 = vmax.f32 %v657_v6, 0.0  ;;  %v15857_v40 = vld [vmem:[#allocation28_spill] sm:$0xff]  ;;  %v15861_v36 = vld [vmem:[#allocation66_spill] sm:$0xff] }
 0x345   : > { %10933 = vmatmul.mubr.f32.gmra.mrb[56].mxu1 %v4174_v20  ;;  %v4176_v27 = vmax.f32 %v4144_v2, 0.0  ;;  %11505 = vmatmul.mubr.msk.f32.gmra.mrb[58].mxu0 %vm277_vm0, %v15840_v28  ;;  %v8365_v20 = vsel %vm277_vm0, %v15852_v12, 0.0  ;;  %v11906_v2 = vpack.c.bf16 %v8382_v0, %v8381_v15  ;;  %v677_v62 = vadd.f32 %v15053_v48, %v15857_v40  ;;  %v8041_v15 = vld [vmem:[%s15527_s4 + $0x130] sm:$0xff]  ;;  %v8042_v0 = vld [vmem:[%s15527_s4 + $0x138] sm:$0xff]  ;;  %v15868_v12 = vld [vmem:[#allocation75_spill] sm:$0xff] }
 0x346   : > { %v4175_v55 = vmax.f32 %v4143_v21, 0.0  ;;  %v10860_v23 = vpop.f32.mrb[28].mxu1  ;;  %11507 = vmatprep.mubr.msk.f32.mxu0 %vm277_vm0, %v7594_v5  ;;  %v8364_v18 = vadd.f32 %v8363_v54, %v8362_v11  ;;  %v15853_v21 = vld [vmem:[#allocation23_spill] sm:$0xff]  ;;  %v15855_v5 = vld [vmem:[#allocation38_spill] sm:$0xff]  ;;  %v692_v45 = vadd.f32 %v15053_v48, %v15861_v36  ;;  %v765_v16 = vmax.f32 %v687_v34, 0.0  ;;  %v15871_v40 = vld [vmem:[#allocation76_spill] sm:$0xff] }
 0x347   : > { %v4146_v42 = vadd.f32 %v10860_v23, %v14914_v60  ;;  %v4061_v39 = vpop.f32.mrb[29].mxu1  ;;  %v662_v10 = vadd.f32 %v15053_v48, %v15853_v21  ;;  %v7603_v23 = vld [vmem:[#allocation2 + $0x208] sm:$0xff]  ;;  %v11878_v11 = vpack.c.bf16 %v8040_v44, %v8039_v24  ;;  %v15865_v54 = vld [vmem:[#allocation70_spill] sm:$0xff]  ;;  %v717_v38 = vadd.f32 %v15053_v48, %v15866_v43  ;;  %v8460_v36 = vld [vmem:[%s15527_s4 + $0x190] sm:$0xff] }
 0x348   : > { %v4145_v30 = vadd.f32 %v14914_v60, %v4061_v39  ;;  %10935 = vmatprep.mubr.f32.mxu1 %v4175_v55  ;;  %v667_v55 = vadd.f32 %v15053_v48, %v15854_v22  ;;  %v15856_v39 = vld [vmem:[#allocation25_spill] sm:$0xff]  ;;  %v766_v37 = vmax.f32 %v692_v45, 0.0  ;;  %v11882_v61 = vpack.c.bf16 %v8042_v0, %v8041_v15  ;;  %v15869_v22 = vld [vmem:[#allocation74_spill] sm:$0xff]  ;;  %v8468_v24 = vld [vmem:[%s15527_s4 + $0x1d0] sm:$0xff] }
 0x349   : > { %10936 = vmatmul.mubr.f32.gmra.mrb[58].mxu1 %v4176_v27  ;;  %v4178_v8 = vmax.f32 %v4146_v42, 0.0  ;;  %11508 = vmatmul.mubr.msk.f32.gmra.mrb[60].mxu0 %vm277_vm0, %v15843_v53  ;;  %v8367_v27 = vsel %vm277_vm0, %v15855_v5, 0.0  ;;  %v760_v42 = vmax.f32 %v662_v10, 0.0  ;;  %v15872_v34 = vmov 0.0   ;;  %v8461_v45 = vld [vmem:[%s15527_s4 + $0x198] sm:$0xff] }
 0x34a   : > { %v4177_v9 = vmax.f32 %v4145_v30, 0.0  ;;  %v10863_v32 = vpop.f32.mrb[30].mxu1  ;;  %11510 = vmatprep.mubr.msk.f32.mxu0 %vm277_vm0, %v7596_v59  ;;  %v672_v30 = vadd.f32 %v15053_v48, %v15856_v39  ;;  %v761_v28 = vmax.f32 %v667_v55, 0.0  ;;  %11879 = vmatprep.subr.bf16.mxu0 %v11878_v11  ;;  %v732_v55 = vadd.f32 %v15053_v48, %v15869_v22  ;;  %v8469_v44 = vld [vmem:[%s15527_s4 + $0x1d8] sm:$0xff] }
 0x34b   : > { %v4148_v57 = vadd.f32 %v10863_v32, %v14914_v60  ;;  %v4071_v33 = vpop.f32.mrb[31].mxu1  ;;  %11881 = vmatpush3.bf16.msra.mxu0 %v11878_v11  ;;  %v8470_v11 = vld [vmem:[%s15527_s4 + $0x1e0] sm:$0xff] }
 0x34c   : > { %v4147_v63 = vadd.f32 %v14914_v60, %v4071_v33  ;;  %10938 = vmatprep.mubr.f32.mxu1 %v4177_v9  ;;  %v8379_v60 = vld [vmem:[%s15526_s3] sm:$0xff]  ;;  %v15858_v9 = vld [vmem:[#allocation40_spill] sm:$0xff]  ;;  %v762_v59 = vmax.f32 %v672_v30, 0.0  ;;  %v763_v33 = vmax.f32 %v677_v62, 0.0  ;;  %11883 = vmatprep.subr.bf16.mxu0 %v11882_v61  ;;  %v742_v62 = vadd.f32 %v15053_v48, %v15871_v40 }
 0x34d   : > { %10939 = vmatmul.mubr.f32.gmra.mrb[60].mxu1 %v4178_v8  ;;  %v4180_v56 = vmax.f32 %v4148_v57, 0.0  ;;  %11511 = vmatmul.mubr.msk.f32.gmra.mrb[62].mxu0 %vm277_vm0, %v15847_v14  ;;  %v11903_v29 = vpack.c.bf16 %v8380_v19, %v8379_v60  ;;  %v8369_v32 = vsel %vm277_vm0, %v15858_v9, 0.0  ;;  %v15859_v8 = vld [vmem:[#allocation27_spill] sm:$0xff] }
 0x34e   : > { %v4179_v3 = vmax.f32 %v4147_v63, 0.0  ;;  %11513 = vmatprep.mubr.msk.f32.mxu0 %vm277_vm0, %v7598_v51  ;;  %v682_v57 = vadd.f32 %v15053_v48, %v15859_v8  ;;  %v15864_v19 = vld [vmem:[#allocation71_spill] sm:$0xff]  ;;  %v776_v8 = vmax.f32 %v742_v62, 0.0 }
 0x34f   : > { %11885 = vmatpush3.bf16.msra.mxu0 %v11882_v61  ;;  %v8048_v9 = vld [vmem:[%s15527_s4 + $0x168] sm:$0xff] }
 0x350   : > { %10941 = vmatprep.mubr.f32.mxu1 %v4179_v3  ;;  %v764_v53 = vmax.f32 %v682_v57, 0.0  ;;  %v15862_v3 = vld [vmem:[#allocation69_spill] sm:$0xff] }
 0x351   : > { %10942 = vmatmul.mubr.f32.gmra.mrb[62].mxu1 %v4180_v56  ;;  %11514 = vmatmul.mubr.msk.f32.gmra.mrb[64].mxu0 %vm277_vm0, %v15851_v17  ;;  %v697_v51 = vadd.f32 %v15053_v48, %v15862_v3  ;;  %v15863_v56 = vld [vmem:[#allocation68_spill] sm:$0xff]  ;;  %v8050_v57 = vld [vmem:[%s15527_s4 + $0x178] sm:$0xff]  ;;  %v8462_v3 = vld [vmem:[%s15527_s4 + $0x1a0] sm:$0xff] }
 0x352   : > { %10991 = vmatprep.mubr.f32.mxu1 %v755_v7  ;;  %11516 = vmatprep.mubr.msk.f32.mxu0 %vm277_vm0, %v14815_v49  ;;  %v8366_v49 = vadd.f32 %v8365_v20, %v8364_v18  ;;  %v702_v60 = vadd.f32 %v15053_v48, %v15863_v56  ;;  %v707_v7 = vadd.f32 %v15053_v48, %v15864_v19  ;;  %v15867_v17 = vld [vmem:[#allocation72_spill] sm:$0xff]  ;;  %v8465_v56 = vld [vmem:[%s15527_s4 + $0x1b8] sm:$0xff]  ;;  %v8467_v19 = vld [vmem:[%s15527_s4 + $0x1c8] sm:$0xff] }
 0x353   : > { %v722_v18 = vadd.f32 %v15053_v48, %v15867_v17  ;;  %v727_v20 = vadd.f32 %v15053_v48, %v15868_v12  ;;  %v15261_v12 = vld [vmem:[%s15528_s5 + $0x2] ss:$0 sm:$0xff] }
 0x354   : > { %v8368_v31 = vadd.f32 %v8367_v27, %v8366_v49  ;;  %v768_v47 = vmax.f32 %v702_v60, 0.0  ;;  %v8045_v27 = vld [vmem:[%s15527_s4 + $0x150] sm:$0xff] }
 0x355   : > { %10992 = vmatmul.mubr.f32.vlgmr.msra.gmra.mrb[42].mxu1 %v756_v50  ;;  %11517 = vmatmul.mubr.msk.f32.gmra.mrb[66].mxu0 %vm277_vm0, %v7601_v46  ;;  %v769_v50 = vmax.f32 %v707_v7, 0.0  ;;  %v771_v46 = vmax.f32 %v717_v38, 0.0  ;;  %v773_v49 = vmax.f32 %v727_v20, 0.0 }
 0x356   : > { %10994 = vmatprep.mubr.f32.mxu1 %v757_v26  ;;  %11904 = vmatpush3.bf16.msra.mxu1 %v11903_v29  ;;  %v8370_v63 = vadd.f32 %v8369_v32, %v8368_v31  ;;  %v712_v29 = vadd.f32 %v15053_v48, %v15865_v54 }
 0x357   : > { %11905 = vmatprep.subr.bf16.mxu1 %v12634_v35  ;;  %11519 = vmatprep.mubr.msk.f32.mxu0 %vm277_vm0, %v14820_v1  ;;  %v7605_v1 = vld [vmem:[#allocation2 + $0x220] sm:$0xff] }
 0x358   : > { %v8371_v13 = vrot.slane %v8370_v63, 4  ;;  %v770_v6 = vmax.f32 %v712_v29, 0.0  ;;  %v8472_v29 = vld [vmem:[%s15527_s4 + $0x1f0] sm:$0xff] }
 0x359   : > { %10995 = vmatmul.mubr.f32.gmra.mrb[44].mxu1 %v758_v4  ;;  %11520 = vmatmul.mubr.msk.f32.gmra.mrb[68].mxu0 %vm277_vm0, %v7603_v23  ;;  %v8044_v4 = vld [vmem:[%s15527_s4 + $0x148] sm:$0xff]  ;;  %v15870_v23 = vld [vmem:[#allocation77_spill] sm:$0xff] }
 0x35a   : > { %10997 = vmatprep.mubr.f32.mxu1 %v759_v25  ;;  %11907 = vmatpush3.bf16.msra.mxu1 %v11906_v2  ;;  %v8372_v14 = vadd.f32 %v8371_v13, %v8370_v63  ;;  %v8043_v2 = vld [vmem:[%s15527_s4 + $0x140] sm:$0xff]  ;;  %v772_v25 = vmax.f32 %v722_v18, 0.0  ;;  %v737_v5 = vadd.f32 %v15053_v48, %v15870_v23  ;;  %v8049_v48 = vld [vmem:[%s15527_s4 + $0x170] sm:$0xff] }
 0x35b   : > { %11908 = vmatprep.subr.bf16.mxu1 %v12634_v35  ;;  %11522 = vmatprep.mubr.msk.f32.mxu0 %vm277_vm0, %v14825_v58  ;;  %v7607_v58 = vld [vmem:[#allocation2 + $0x238] sm:$0xff]  ;;  %v11886_v10 = vpack.c.bf16 %v8044_v4, %v8043_v2  ;;  %v11898_v52 = vpack.c.bf16 %v8050_v57, %v8049_v48  ;;  %v8458_v63 = vld [vmem:[%s15527_s4 + $0x180] sm:$0xff] }
 0x35c   : > { %v8373_v26 = vrot.slane %v8372_v14, 2  ;;  %v775_v31 = vmax.f32 %v737_v5, 0.0 }
 0x35d   : > { %10998 = vmatmul.mubr.f32.gmra.mrb[46].mxu1 %v760_v42  ;;  %11523 = vmatmul.mubr.msk.f32.gmra.mrb[70].mxu0 %vm277_vm0, %v7605_v1  ;;  %v8046_v42 = vld [vmem:[%s15527_s4 + $0x158] sm:$0xff]  ;;  %v8047_v1 = vld [vmem:[%s15527_s4 + $0x160] sm:$0xff] }
 0x35e   : > { %11000 = vmatprep.mubr.f32.mxu1 %v761_v28  ;;  %11525 = vmatprep.mubr.msk.f32.mxu0 %vm277_vm0, %v14830_v41  ;;  %v767_v41 = vmax.f32 %v697_v51, 0.0  ;;  %v8374_v21 = vadd.f32 %v8373_v26, %v8372_v14  ;;  %v11890_v30 = vpack.c.bf16 %v8046_v42, %v8045_v27  ;;  %v774_v28 = vmax.f32 %v732_v55, 0.0  ;;  %v8463_v51 = vld [vmem:[%s15527_s4 + $0x1a8] sm:$0xff] }
 0x35f   : > { %11887 = vmatprep.subr.bf16.mxu0 %v11886_v10  ;;  %v11915_v13 = vpack.c.bf16 %v8463_v51, %v8462_v3  ;;  %v11924_v14 = vpack.c.bf16 %v8469_v44, %v8468_v24 }
 0x360   : > { %11889 = vmatpush3.bf16.msra.mxu0 %v11886_v10  ;;  %v8375_v39 = vrot.slane %v8374_v21, 1 }
 0x361   : > { %11001 = vmatmul.mubr.f32.gmra.mrb[48].mxu1 %v762_v59  ;;  %11526 = vmatmul.mubr.msk.f32.gmra.mrb[72].mxu0 %vm277_vm0, %v7607_v58  ;;  %v11894_v59 = vpack.c.bf16 %v8048_v9, %v8047_v1  ;;  %v8459_v58 = vld [vmem:[%s15527_s4 + $0x188] sm:$0xff] }
 0x362   : > { %11003 = vmatprep.mubr.f32.mxu1 %v763_v33  ;;  %11891 = vmatprep.subr.bf16.mxu0 %v11890_v30  ;;  %v8376_v32 = vadd.f32 %v8375_v39, %v8374_v21 }
 0x364   : > { %11893 = vmatpush3.bf16.msra.mxu0 %v11890_v30  ;;  %v8378_v33 = vmul.f32 0.00390625, %v8376_v32 }
 0x365   : > { %11004 = vmatmul.mubr.f32.gmra.mrb[50].mxu1 %v764_v53  ;;  %11895 = vmatprep.subr.bf16.mxu0 %v11894_v59  ;;  %v11909_v53 = vpack.c.bf16 %v8459_v58, %v8458_v63 }
 0x366   : > { %11006 = vmatprep.mubr.f32.mxu1 %v765_v16  ;;  %v11912_v16 = vpack.c.bf16 %v8461_v45, %v8460_v36 }
 0x368   : > { %11897 = vmatpush3.bf16.msra.mxu0 %v11894_v59 }
 0x369   : > { %11007 = vmatmul.mubr.f32.gmra.mrb[52].mxu1 %v766_v37  ;;  %11899 = vmatprep.subr.bf16.mxu0 %v11898_v52  ;;  %v8464_v37 = vld [vmem:[%s15527_s4 + $0x1b0] sm:$0xff] }
 0x36a   : > { %11009 = vmatprep.mubr.f32.mxu1 %v767_v41  ;;  %v11918_v60 = vpack.c.bf16 %v8465_v56, %v8464_v37  ;;  %v8466_v41 = vld [vmem:[%s15527_s4 + $0x1c0] sm:$0xff] }
 0x36b   : > { %v11921_v7 = vpack.c.bf16 %v8467_v19, %v8466_v41 }
 0x36c   : > { %11901 = vmatpush3.bf16.msra.mxu0 %v11898_v52 }
 0x36d   : > { %11010 = vmatmul.mubr.f32.gmra.mrb[54].mxu1 %v768_v47  ;;  %v8471_v47 = vld [vmem:[%s15527_s4 + $0x1e8] sm:$0xff] }
 0x36e   : > { %11012 = vmatprep.mubr.f32.mxu1 %v769_v50  ;;  %v11927_v54 = vpack.c.bf16 %v8471_v47, %v8470_v11  ;;  %v8473_v50 = vld [vmem:[%s15527_s4 + $0x1f8] sm:$0xff] }
 0x36f   : > { %v11930_v43 = vpack.c.bf16 %v8473_v50, %v8472_v29 }
 0x371   : > { %11013 = vmatmul.mubr.f32.gmra.mrb[56].mxu1 %v770_v6 }
 0x372   : > { %11015 = vmatprep.mubr.f32.mxu1 %v771_v46 }
 0x375   : > { %11016 = vmatmul.mubr.f32.gmra.mrb[58].mxu1 %v772_v25 }
 0x376   : > { %11018 = vmatprep.mubr.f32.mxu1 %v773_v49 }
 0x379   : > { %11019 = vmatmul.mubr.f32.gmra.mrb[60].mxu1 %v774_v28 }
 0x37a   : > { %11021 = vmatprep.mubr.f32.mxu1 %v775_v31 }
 0x37d   : > { %11022 = vmatmul.mubr.f32.gmra.mrb[62].mxu1 %v776_v8 }
 0x37e   : > { %11616 = vmatprep.mubr.msk.f32.mxu1 %vm12635_vm1, %v15872_v34 }
 0x381   : > { %11617 = vmatmul.mubr.msk.f32.vlgmr.msra.gmra.mrb[64].mxu1 %vm277_vm0, %v8378_v33 }
 0x382   : > { %11651 = vmatprep.mubr.msk.f32.mxu1 %vm12635_vm1, %v15872_v34  ;;  %11910 = vmatpush3.bf16.msra.mxu1 %v11909_v53 }
 0x383   : > { %11911 = vmatprep.subr.bf16.mxu1 %v12634_v35 }
 0x386   : > { %11913 = vmatpush3.bf16.msra.mxu1 %v11912_v16 }
 0x387   : > { %11914 = vmatprep.subr.bf16.mxu1 %v12634_v35 }
 0x38a   : > { %11916 = vmatpush3.bf16.msra.mxu1 %v11915_v13 }
 0x38b   : > { %11917 = vmatprep.subr.bf16.mxu1 %v12634_v35 }
 0x38e   : > { %11919 = vmatpush3.bf16.msra.mxu1 %v11918_v60 }
 0x38f   : > { %11920 = vmatprep.subr.bf16.mxu1 %v12634_v35 }
 0x392   : > { %11922 = vmatpush3.bf16.msra.mxu1 %v11921_v7 }
 0x393   : > { %11923 = vmatprep.subr.bf16.mxu1 %v12634_v35 }
 0x396   : > { %11925 = vmatpush3.bf16.msra.mxu1 %v11924_v14 }
 0x397   : > { %11926 = vmatprep.subr.bf16.mxu1 %v12634_v35 }
 0x39a   : > { %11928 = vmatpush3.bf16.msra.mxu1 %v11927_v54 }
 0x39b   : > { %11929 = vmatprep.subr.bf16.mxu1 %v12634_v35 }
 0x39e   : > { %11931 = vmatpush3.bf16.msra.mxu1 %v11930_v43 }
 0x3e8   : > { %v15238_v38 = vpop.f32.mrb[32].mxu1 }
 0x3e9   : > { %v15240_v15 = vpop.f32.mrb[33].mxu1 }
 0x3ec   : > { %v15242_v0 = vpop.f32.mrb[34].mxu1 }
 0x3ed   : > { %v15244_v26 = vpop.f32.mrb[35].mxu1 }
 0x3f0   : > { %v15246_v61 = vpop.f32.mrb[36].mxu1 }
 0x3f1   : > { %v15248_v35 = vpop.f32.mrb[37].mxu1 }
 0x3f4   : > { %v15250_v6 = vpop.f32.mrb[38].mxu1 }
 0x3f5   : > { %v15252_v17 = vpop.f32.mrb[39].mxu1 }
 0x3f8   : > { %v15254_v18 = vpop.f32.mrb[40].mxu1  ;;  %v11482_v20 = vpop.f32.mrb[42].mxu0 }
 0x3f9   : > { %v15256_v46 = vpop.f32.mrb[41].mxu1  ;;  %v7972_v2 = vadd.f32 %v11482_v20, %v15261_v12  ;;  %v7775_v4 = vpop.f32.mrb[43].mxu0 }
 0x3fa   : > { %v7971_v21 = vadd.f32 %v15261_v12, %v7775_v4 }
 0x3fb   : > { %v8004_v22 = vmax.f32 %v7972_v2, 0.0 }
 0x3fc   : > { %v8003_v10 = vmax.f32 %v7971_v21, 0.0  ;;  %v11485_v25 = vpop.f32.mrb[44].mxu0 }
 0x3fd   : > { %v7974_v55 = vadd.f32 %v11485_v25, %v15261_v12  ;;  %v7785_v49 = vpop.f32.mrb[45].mxu0 }
 0x3fe   : > { %v7973_v23 = vadd.f32 %v15261_v12, %v7785_v49  ;;  %11560 = vmatprep.mubr.f32.mxu0 %v8003_v10 }
 0x3ff   : > { %11561 = vmatmul.mubr.f32.vlgmr.msra.gmra.mrb[32].mxu0 %v8004_v22  ;;  %v8006_v42 = vmax.f32 %v7974_v55, 0.0 }
 0x400   : > { %v8005_v5 = vmax.f32 %v7973_v23, 0.0  ;;  %v11488_v27 = vpop.f32.mrb[46].mxu0 }
 0x401   : > { %v7976_v39 = vadd.f32 %v11488_v27, %v15261_v12  ;;  %v7795_v30 = vpop.f32.mrb[47].mxu0 }
 0x402   : > { %v7975_v28 = vadd.f32 %v15261_v12, %v7795_v30  ;;  %11563 = vmatprep.mubr.f32.mxu0 %v8005_v5 }
 0x403   : > { %11564 = vmatmul.mubr.f32.gmra.mrb[34].mxu0 %v8006_v42  ;;  %v8008_v31 = vmax.f32 %v7976_v39, 0.0 }
 0x404   : > { %v8007_v40 = vmax.f32 %v7975_v28, 0.0  ;;  %v11491_v62 = vpop.f32.mrb[48].mxu0 }
 0x405   : > { %v7978_v1 = vadd.f32 %v11491_v62, %v15261_v12  ;;  %v7805_v9 = vpop.f32.mrb[49].mxu0 }
 0x406   : > { %v7977_v32 = vadd.f32 %v15261_v12, %v7805_v9  ;;  %11566 = vmatprep.mubr.f32.mxu0 %v8007_v40 }
 0x407   : > { %11567 = vmatmul.mubr.f32.gmra.mrb[36].mxu0 %v8008_v31  ;;  %v8010_v48 = vmax.f32 %v7978_v1, 0.0 }
 0x408   : > { %v8009_v59 = vmax.f32 %v7977_v32, 0.0  ;;  %v11494_v8 = vpop.f32.mrb[50].mxu0 }
 0x409   : > { %v7980_v57 = vadd.f32 %v11494_v8, %v15261_v12  ;;  %v7815_v33 = vpop.f32.mrb[51].mxu0 }
 0x40a   : > { %v7979_v52 = vadd.f32 %v15261_v12, %v7815_v33  ;;  %11569 = vmatprep.mubr.f32.mxu0 %v8009_v59 }
 0x40b   : > { %11570 = vmatmul.mubr.f32.gmra.mrb[38].mxu0 %v8010_v48  ;;  %v8012_v58 = vmax.f32 %v7980_v57, 0.0 }
 0x40c   : > { %v8011_v34 = vmax.f32 %v7979_v52, 0.0  ;;  %v11497_v63 = vpop.f32.mrb[52].mxu0 }
 0x40d   : > { %v7982_v53 = vadd.f32 %v11497_v63, %v15261_v12  ;;  %v7825_v36 = vpop.f32.mrb[53].mxu0 }
 0x40e   : > { %v7981_v45 = vadd.f32 %v15261_v12, %v7825_v36  ;;  %11572 = vmatprep.mubr.f32.mxu0 %v8011_v34 }
 0x40f   : > { %11573 = vmatmul.mubr.f32.gmra.mrb[40].mxu0 %v8012_v58  ;;  %v8014_v51 = vmax.f32 %v7982_v53, 0.0 }
 0x410   : > { %v8013_v16 = vmax.f32 %v7981_v45, 0.0  ;;  %v11500_v3 = vpop.f32.mrb[54].mxu0 }
 0x411   : > { %v7984_v13 = vadd.f32 %v11500_v3, %v15261_v12  ;;  %v7835_v37 = vpop.f32.mrb[55].mxu0 }
 0x412   : > { %v7983_v56 = vadd.f32 %v15261_v12, %v7835_v37  ;;  %11575 = vmatprep.mubr.f32.mxu0 %v8013_v16 }
 0x413   : > { %11576 = vmatmul.mubr.f32.gmra.mrb[74].mxu0 %v8014_v51  ;;  %v8016_v19 = vmax.f32 %v7984_v13, 0.0 }
 0x414   : > { %v8015_v60 = vmax.f32 %v7983_v56, 0.0  ;;  %v11503_v41 = vpop.f32.mrb[56].mxu0 }
 0x415   : > { %v7986_v7 = vadd.f32 %v11503_v41, %v15261_v12  ;;  %v7845_v24 = vpop.f32.mrb[57].mxu0 }
 0x416   : > { %v7985_v44 = vadd.f32 %v15261_v12, %v7845_v24  ;;  %11578 = vmatprep.mubr.f32.mxu0 %v8015_v60 }
 0x417   : > { %11579 = vmatmul.mubr.f32.gmra.mrb[76].mxu0 %v8016_v19  ;;  %v8018_v47 = vmax.f32 %v7986_v7, 0.0 }
 0x418   : > { %v8017_v14 = vmax.f32 %v7985_v44, 0.0  ;;  %v11506_v11 = vpop.f32.mrb[58].mxu0 }
 0x419   : > { %v7988_v54 = vadd.f32 %v11506_v11, %v15261_v12  ;;  %v7855_v29 = vpop.f32.mrb[59].mxu0 }
 0x41a   : > { %v7987_v50 = vadd.f32 %v15261_v12, %v7855_v29  ;;  %11581 = vmatprep.mubr.f32.mxu0 %v8017_v14 }
 0x41b   : > { %11582 = vmatmul.mubr.f32.gmra.mrb[78].mxu0 %v8018_v47  ;;  %v8020_v2 = vmax.f32 %v7988_v54, 0.0 }
 0x41c   : > { %v8019_v43 = vmax.f32 %v7987_v50, 0.0  ;;  %v11509_v20 = vpop.f32.mrb[60].mxu0 }
 0x41d   : > { %v7990_v4 = vadd.f32 %v11509_v20, %v15261_v12  ;;  %v7865_v21 = vpop.f32.mrb[61].mxu0 }
 0x41e   : > { %v7989_v10 = vadd.f32 %v15261_v12, %v7865_v21  ;;  %11584 = vmatprep.mubr.f32.mxu0 %v8019_v43 }
 0x41f   : > { %11585 = vmatmul.mubr.f32.gmra.mrb[80].mxu0 %v8020_v2  ;;  %v8022_v55 = vmax.f32 %v7990_v4, 0.0 }
 0x420   : > { %v8021_v25 = vmax.f32 %v7989_v10, 0.0  ;;  %v11512_v22 = vpop.f32.mrb[62].mxu0 }
 0x421   : > { %v7992_v49 = vadd.f32 %v11512_v22, %v15261_v12  ;;  %v7875_v23 = vpop.f32.mrb[63].mxu0 }
 0x422   : > { %v7991_v5 = vadd.f32 %v15261_v12, %v7875_v23  ;;  %11587 = vmatprep.mubr.f32.mxu0 %v8021_v25 }
 0x423   : > { %11588 = vmatmul.mubr.f32.gmra.mrb[82].mxu0 %v8022_v55  ;;  %v8024_v39 = vmax.f32 %v7992_v49, 0.0 }
 0x424   : > { %v8023_v27 = vmax.f32 %v7991_v5, 0.0  ;;  %v11515_v42 = vpop.f32.mrb[64].mxu0 }
 0x425   : > { %v7994_v28 = vadd.f32 %v11515_v42, %v15261_v12  ;;  %v7885_v40 = vpop.f32.mrb[65].mxu0 }
 0x426   : > { %v7993_v31 = vadd.f32 %v15261_v12, %v7885_v40  ;;  %11590 = vmatprep.mubr.f32.mxu0 %v8023_v27  ;;  %v8383_v27 = vld [vmem:[%s15528_s5 + $0x3] sm:$0x1] }
 0x427   : > { %11591 = vmatmul.mubr.f32.gmra.mrb[84].mxu0 %v8024_v39  ;;  %v8026_v32 = vmax.f32 %v7994_v28, 0.0 }
 0x428   : > { %v15285_v30 = vpop.f32.mrb[42].mxu1  ;;  %v8025_v1 = vmax.f32 %v7993_v31, 0.0  ;;  %v11518_v9 = vpop.f32.mrb[66].mxu0 }
 0x429   : > { %v15288_v62 = vpop.f32.mrb[43].mxu1  ;;  %v7996_v8 = vadd.f32 %v11518_v9, %v15261_v12  ;;  %v7895_v48 = vpop.f32.mrb[67].mxu0 }
 0x42a   : > { %v7995_v33 = vadd.f32 %v15261_v12, %v7895_v48  ;;  %11593 = vmatprep.mubr.f32.mxu0 %v8025_v1 }
 0x42b   : > { %11594 = vmatmul.mubr.f32.gmra.mrb[86].mxu0 %v8026_v32  ;;  %v8028_v63 = vmax.f32 %v7996_v8, 0.0 }
 0x42c   : > { %v15291_v59 = vpop.f32.mrb[44].mxu1  ;;  %v8027_v52 = vmax.f32 %v7995_v33, 0.0  ;;  %v11521_v34 = vpop.f32.mrb[68].mxu0 }
 0x42d   : > { %v15294_v57 = vpop.f32.mrb[45].mxu1  ;;  %v7998_v53 = vadd.f32 %v11521_v34, %v15261_v12  ;;  %v7905_v36 = vpop.f32.mrb[69].mxu0 }
 0x42e   : > { %v7997_v16 = vadd.f32 %v15261_v12, %v7905_v36  ;;  %11596 = vmatprep.mubr.f32.mxu0 %v8027_v52 }
 0x42f   : > { %11597 = vmatmul.mubr.f32.gmra.mrb[88].mxu0 %v8028_v63  ;;  %v8030_v13 = vmax.f32 %v7998_v53, 0.0 }
 0x430   : > { %v15297_v58 = vpop.f32.mrb[46].mxu1  ;;  %v8029_v3 = vmax.f32 %v7997_v16, 0.0  ;;  %v11524_v51 = vpop.f32.mrb[70].mxu0 }
 0x431   : > { %v15300_v45 = vpop.f32.mrb[47].mxu1  ;;  %v8000_v56 = vadd.f32 %v11524_v51, %v15261_v12  ;;  %v7915_v60 = vpop.f32.mrb[71].mxu0 }
 0x432   : > { %v7999_v19 = vadd.f32 %v15261_v12, %v7915_v60  ;;  %11599 = vmatprep.mubr.f32.mxu0 %v8029_v3 }
 0x433   : > { %11600 = vmatmul.mubr.f32.gmra.mrb[90].mxu0 %v8030_v13  ;;  %v8032_v44 = vmax.f32 %v8000_v56, 0.0 }
 0x434   : > { %v15303_v37 = vpop.f32.mrb[48].mxu1  ;;  %v8031_v7 = vmax.f32 %v7999_v19, 0.0  ;;  %v11527_v24 = vpop.f32.mrb[72].mxu0 }
 0x435   : > { %v15306_v41 = vpop.f32.mrb[49].mxu1  ;;  %v8002_v11 = vadd.f32 %v11527_v24, %v15261_v12  ;;  %v7925_v47 = vpop.f32.mrb[73].mxu0 }
 0x436   : > { %v8001_v29 = vadd.f32 %v15261_v12, %v7925_v47  ;;  %11602 = vmatprep.mubr.f32.mxu0 %v8031_v7 }
 0x437   : > { %11603 = vmatmul.mubr.f32.gmra.mrb[92].mxu0 %v8032_v44  ;;  %v8034_v43 = vmax.f32 %v8002_v11, 0.0 }
 0x438   : > { %v15309_v14 = vpop.f32.mrb[50].mxu1  ;;  %v8033_v50 = vmax.f32 %v8001_v29, 0.0 }
 0x439   : > { %v15312_v54 = vpop.f32.mrb[51].mxu1 }
 0x43a   : > { %11605 = vmatprep.mubr.f32.mxu0 %v8033_v50 }
 0x43b   : > { %11606 = vmatmul.mubr.f32.gmra.mrb[94].mxu0 %v8034_v43 }
 0x43c   : > { %v11008_v20 = vpop.f32.mrb[52].mxu1 }
 0x43d   : > { %v4588_v2 = vpop.f32.mrb[53].mxu1 }
 0x440   : > { %v11011_v4 = vpop.f32.mrb[54].mxu1 }
 0x441   : > { %v4598_v21 = vpop.f32.mrb[55].mxu1 }
 0x444   : > { %v15315_v10 = vpop.f32.mrb[56].mxu1 }
 0x445   : > { %v15317_v25 = vpop.f32.mrb[57].mxu1 }
 0x448   : > { %v15319_v22 = vpop.f32.mrb[58].mxu1 }
 0x449   : > { %v15321_v55 = vpop.f32.mrb[59].mxu1 }
 0x44c   : > { %v15323_v49 = vpop.f32.mrb[60].mxu1 }
 0x44d   : > { %v15325_v12 = vpop.f32.mrb[61].mxu1 }
 0x450   : > { %v15327_v23 = vpop.f32.mrb[62].mxu1 }
 0x451   : > { %v15329_v5 = vpop.f32.mrb[63].mxu1 }
 0x454   : > { %v8453_v42 = vpop.f32.mrb[64].mxu1 }
 0x455   : > { %v8454_v39 = vadd.f32 %v8453_v42, %v8383_v27  ;;  %v11618_v28 = vpop.f32.mrb[65].mxu1 }
 0x457   : > { %v8457_v40 = vmax.f32 %v8454_v39, 0.0 }
 0x459   : > { %11652 = vmatmul.mubr.f32.vlgmr.msra.gmra.mrb[66].mxu1 %v8457_v40 }
 0x4d2   : > { %v11562_v31 = vpop.f32.mrb[32].mxu0 }
 0x4d3   : > { %v15335_v1 = vadd.f32 %v11562_v31, %v15238_v38  ;;  %v8117_v9 = vpop.f32.mrb[33].mxu0 }
 0x4d4   : > { %v15338_v32 = vadd.f32 %v8117_v9, %v15240_v15 }
 0x4d6   : > { %v11565_v8 = vpop.f32.mrb[34].mxu0 }
 0x4d7   : > { %v15341_v48 = vadd.f32 %v11565_v8, %v15242_v0  ;;  %v8127_v33 = vpop.f32.mrb[35].mxu0 }
 0x4d8   : > { %v15344_v52 = vadd.f32 %v8127_v33, %v15244_v26 }
 0x4da   : > { %v11568_v34 = vpop.f32.mrb[36].mxu0 }
 0x4db   : > { %v15347_v63 = vadd.f32 %v11568_v34, %v15246_v61  ;;  %v8137_v53 = vpop.f32.mrb[37].mxu0 }
 0x4dc   : > { %v15350_v38 = vadd.f32 %v8137_v53, %v15248_v35 }
 0x4de   : > { %v11571_v36 = vpop.f32.mrb[38].mxu0 }
 0x4df   : > { %v15353_v15 = vadd.f32 %v11571_v36, %v15250_v6  ;;  %v8147_v16 = vpop.f32.mrb[39].mxu0 }
 0x4e0   : > { %v11955_v0 = vadd.f32 %v8147_v16, %v15252_v17  ;;  %v8544_v16 = vlaneseq }
 0x4e2   : > { %v11574_v3 = vpop.f32.mrb[40].mxu0 }
 0x4e3   : > { %v11956_v51 = vadd.f32 %v11574_v3, %v15254_v18  ;;  %v8157_v26 = vpop.f32.mrb[41].mxu0 }
 0x4e4   : > { %v11957_v13 = vadd.f32 %v8157_v26, %v15256_v46 }
 0x4e6   : > { %v11577_v56 = vpop.f32.mrb[74].mxu0 }
 0x4e7   : > { %v11958_v61 = vadd.f32 %v11577_v56, %v15285_v30  ;;  %v8167_v60 = vpop.f32.mrb[75].mxu0 }
 0x4e8   : > { %v11959_v35 = vadd.f32 %v8167_v60, %v15288_v62 }
 0x4ea   : > { %v11580_v19 = vpop.f32.mrb[76].mxu0 }
 0x4eb   : > { %v11960_v7 = vadd.f32 %v11580_v19, %v15291_v59  ;;  %v8177_v6 = vpop.f32.mrb[77].mxu0 }
 0x4ec   : > { %v11961_v24 = vadd.f32 %v8177_v6, %v15294_v57 }
 0x4ee   : > { %v11583_v44 = vpop.f32.mrb[78].mxu0 }
 0x4ef   : > { %v11962_v17 = vadd.f32 %v11583_v44, %v15297_v58  ;;  %v8187_v11 = vpop.f32.mrb[79].mxu0 }
 0x4f0   : > { %v11963_v18 = vadd.f32 %v8187_v11, %v15300_v45 }
 0x4f2   : > { %v11586_v47 = vpop.f32.mrb[80].mxu0 }
 0x4f3   : > { %v11964_v46 = vadd.f32 %v11586_v47, %v15303_v37  ;;  %v8197_v29 = vpop.f32.mrb[81].mxu0 }
 0x4f4   : > { %v11965_v30 = vadd.f32 %v8197_v29, %v15306_v41 }
 0x4f6   : > { %v11589_v50 = vpop.f32.mrb[82].mxu0 }
 0x4f7   : > { %v11966_v62 = vadd.f32 %v11589_v50, %v15309_v14  ;;  %v8207_v43 = vpop.f32.mrb[83].mxu0 }
 0x4f8   : > { %v11967_v59 = vadd.f32 %v8207_v43, %v15312_v54 }
 0x4fa   : > { %v11592_v27 = vpop.f32.mrb[84].mxu0 }
 0x4fb   : > { %v11968_v57 = vadd.f32 %v11592_v27, %v11008_v20  ;;  %v8217_v42 = vpop.f32.mrb[85].mxu0 }
 0x4fc   : > { %v11969_v39 = vadd.f32 %v8217_v42, %v4588_v2 }
 0x4fe   : > { %v11595_v58 = vpop.f32.mrb[86].mxu0 }
 0x4ff   : > { %v11970_v28 = vadd.f32 %v11595_v58, %v11011_v4  ;;  %v8227_v40 = vpop.f32.mrb[87].mxu0 }
 0x500   : > { %v11971_v45 = vadd.f32 %v8227_v40, %v4598_v21 }
 0x502   : > { %v11598_v31 = vpop.f32.mrb[88].mxu0 }
 0x503   : > { %v11972_v37 = vadd.f32 %v11598_v31, %v15315_v10  ;;  %v8237_v9 = vpop.f32.mrb[89].mxu0 }
 0x504   : > { %v11973_v41 = vadd.f32 %v8237_v9, %v15317_v25  ;;  %v8545_v25 = vshrl.u32 %v8544_v16, 7 }
 0x506   : > { %v11601_v8 = vpop.f32.mrb[90].mxu0  ;;  %v8546_v3 = vsub.s32 0, %v8545_v25 }
 0x507   : > { %v11974_v14 = vadd.f32 %v11601_v8, %v15319_v22  ;;  %v8247_v33 = vpop.f32.mrb[91].mxu0 }
 0x508   : > { %v11975_v54 = vadd.f32 %v8247_v33, %v15321_v55 }
 0x50a   : > { %v11604_v34 = vpop.f32.mrb[92].mxu0 }
 0x50b   : > { %v11976_v20 = vadd.f32 %v11604_v34, %v15323_v49  ;;  %v8257_v2 = vpop.f32.mrb[93].mxu0 }
 0x50c   : > { %v11977_v4 = vadd.f32 %v8257_v2, %v15325_v12 }
 0x50e   : > { %v11607_v53 = vpop.f32.mrb[94].mxu0 }
 0x50f   : > { %v11978_v21 = vadd.f32 %v11607_v53, %v15327_v23  ;;  %v8267_v36 = vpop.f32.mrb[95].mxu0 }
 0x510   : > { %v11979_v10 = vadd.f32 %v8267_v36, %v15329_v5 }
 0x52c   : > { %v8540_v26 = vpop.f32.mrb[66].mxu1 }
 0x52d   : > { %v8547_v22 = vrot.slane %v8540_v26, %v8546_v3  ;;  %v11653_v56 = vpop.f32.mrb[67].mxu1 }
 0x52f   : > { %v8548_v55 = vadd.f32 %v15338_v32, %v8547_v22  ;;  %v8549_v60 = vadd.f32 %v15335_v1, %v8547_v22  ;;  %v8550_v49 = vadd.f32 %v15344_v52, %v8547_v22  ;;  %v8551_v12 = vadd.f32 %v15341_v48, %v8547_v22  ;;  %v9446_v48 = vld [vmem:[%s15529_s6] ss:$0 sm:$0xff] }
 0x530   : > { %v8552_v19 = vadd.f32 %v15350_v38, %v8547_v22  ;;  %v8553_v23 = vadd.f32 %v15347_v63, %v8547_v22  ;;  %v8554_v6 = vadd.f32 %v11955_v0, %v8547_v22  ;;  %v8555_v5 = vadd.f32 %v15353_v15, %v8547_v22 }
 0x531   : > { %v8556_v44 = vadd.f32 %v11957_v13, %v8547_v22  ;;  %v8557_v11 = vadd.f32 %v11956_v51, %v8547_v22  ;;  %v8558_v47 = vadd.f32 %v11959_v35, %v8547_v22  ;;  %v8559_v29 = vadd.f32 %v11958_v61, %v8547_v22 }
 0x532   : > { %v8560_v50 = vadd.f32 %v11961_v24, %v8547_v22  ;;  %v8561_v43 = vadd.f32 %v11960_v7, %v8547_v22  ;;  %v8562_v32 = vadd.f32 %v11963_v18, %v8547_v22  ;;  %v8563_v27 = vadd.f32 %v11962_v17, %v8547_v22 }
 0x533   : > { %v8564_v1 = vadd.f32 %v11965_v30, %v8547_v22  ;;  %v8565_v42 = vadd.f32 %v11964_v46, %v8547_v22  ;;  %v8566_v52 = vadd.f32 %v11967_v59, %v8547_v22  ;;  %v8567_v58 = vadd.f32 %v11966_v62, %v8547_v22 }
 0x534   : > { %v8568_v63 = vadd.f32 %v11969_v39, %v8547_v22  ;;  %v8569_v38 = vadd.f32 %v11968_v57, %v8547_v22  ;;  %v8570_v15 = vadd.f32 %v11971_v45, %v8547_v22  ;;  %v8571_v0 = vadd.f32 %v11970_v28, %v8547_v22 }
 0x535   : > { %v8572_v51 = vadd.f32 %v11973_v41, %v8547_v22  ;;  %v8573_v13 = vadd.f32 %v11972_v37, %v8547_v22  ;;  %v8574_v61 = vadd.f32 %v11975_v54, %v8547_v22  ;;  %v8575_v35 = vadd.f32 %v11974_v14, %v8547_v22 }
 0x536   : > { %v8576_v7 = vadd.f32 %v11977_v4, %v8547_v22  ;;  %v8577_v24 = vadd.f32 %v11976_v20, %v8547_v22  ;;  %v8578_v17 = vadd.f32 %v11979_v10, %v8547_v22  ;;  %v8579_v18 = vadd.f32 %v11978_v21, %v8547_v22 }
 0x537   : > { %v8587_v46 = vadd.f32 %v9446_v48, %v8548_v55  ;;  %v8588_v30 = vadd.f32 %v9446_v48, %v8549_v60  ;;  %v8589_v62 = vadd.f32 %v9446_v48, %v8550_v49  ;;  %v8590_v59 = vadd.f32 %v9446_v48, %v8551_v12 }
 0x538   : > { %v8591_v40 = vadd.f32 %v9446_v48, %v8552_v19  ;;  %v8592_v39 = vadd.f32 %v9446_v48, %v8553_v23  ;;  %v8593_v31 = vadd.f32 %v9446_v48, %v8554_v6  ;;  %v8594_v57 = vadd.f32 %v9446_v48, %v8555_v5 }
 0x539   : > { %v8595_v45 = vadd.f32 %v9446_v48, %v8556_v44  ;;  %v8596_v28 = vadd.f32 %v9446_v48, %v8557_v11  ;;  %v8597_v9 = vadd.f32 %v9446_v48, %v8558_v47  ;;  %v8598_v37 = vadd.f32 %v9446_v48, %v8559_v29 }
 0x53a   : > { %v8599_v41 = vadd.f32 %v9446_v48, %v8560_v50  ;;  %v8600_v8 = vadd.f32 %v9446_v48, %v8561_v43  ;;  %v8601_v14 = vadd.f32 %v9446_v48, %v8562_v32  ;;  %v8602_v33 = vadd.f32 %v9446_v48, %v8563_v27 }
 0x53b   : > { %v15389_v54 = vadd.f32 %v9446_v48, %v8564_v1  ;;  %v15391_v34 = vadd.f32 %v9446_v48, %v8565_v42  ;;  %v15393_v20 = vadd.f32 %v9446_v48, %v8566_v52  ;;  %v15395_v2 = vadd.f32 %v9446_v48, %v8567_v58 }
 0x53c   : > { %v15397_v4 = vadd.f32 %v9446_v48, %v8568_v63  ;;  %v15399_v53 = vadd.f32 %v9446_v48, %v8569_v38  ;;  %v15401_v21 = vadd.f32 %v9446_v48, %v8570_v15  ;;  %v15403_v36 = vadd.f32 %v9446_v48, %v8571_v0 }
 0x53d   : > { %v15405_v10 = vadd.f32 %v9446_v48, %v8572_v51  ;;  %v15407_v16 = vadd.f32 %v9446_v48, %v8573_v13  ;;  %v15409_v25 = vadd.f32 %v9446_v48, %v8574_v61  ;;  %v15411_v3 = vadd.f32 %v9446_v48, %v8575_v35 }
 0x53e   : > { %v15413_v26 = vadd.f32 %v9446_v48, %v8576_v7  ;;  %v15415_v22 = vadd.f32 %v9446_v48, %v8577_v24  ;;  %v15417_v56 = vadd.f32 %v9446_v48, %v8578_v17  ;;  %v15419_v55 = vadd.f32 %v9446_v48, %v8579_v18 }
 0x53f   : > { %v8619_v60 = vmax.f32 %v8587_v46, 0.0  ;;  %v8620_v49 = vmax.f32 %v8588_v30, 0.0  ;;  %v8621_v12 = vmax.f32 %v8589_v62, 0.0  ;;  %v8622_v19 = vmax.f32 %v8590_v59, 0.0 }
 0x540   : > { %v8623_v23 = vmax.f32 %v8591_v40, 0.0  ;;  %v8624_v6 = vmax.f32 %v8592_v39, 0.0  ;;  %v8625_v5 = vmax.f32 %v8593_v31, 0.0  ;;  %v8626_v44 = vmax.f32 %v8594_v57, 0.0 }
 0x541   : > { %v8627_v11 = vmax.f32 %v8595_v45, 0.0  ;;  %v8628_v47 = vmax.f32 %v8596_v28, 0.0  ;;  %v8629_v29 = vmax.f32 %v8597_v9, 0.0  ;;  %v8630_v50 = vmax.f32 %v8598_v37, 0.0  ;;  %8651 = vst [vmem:[%s15421_s15] sm:$0xff] %v8619_v60  ;;  %8652 = vst [vmem:[%s15421_s15 + $0x8] sm:$0xff] %v8620_v49 }
 0x542   : > { %8653 = vst [vmem:[%s15421_s15 + $0x10] sm:$0xff] %v8621_v12  ;;  %8654 = vst [vmem:[%s15421_s15 + $0x18] sm:$0xff] %v8622_v19  ;;  %v8631_v43 = vmax.f32 %v8599_v41, 0.0  ;;  %v8632_v32 = vmax.f32 %v8600_v8, 0.0  ;;  %v8633_v27 = vmax.f32 %v8601_v14, 0.0  ;;  %v8634_v1 = vmax.f32 %v8602_v33, 0.0 }
 0x543   : > { %8655 = vst [vmem:[%s15421_s15 + $0x20] sm:$0xff] %v8623_v23  ;;  %8656 = vst [vmem:[%s15421_s15 + $0x28] sm:$0xff] %v8624_v6  ;;  %v8635_v42 = vmax.f32 %v15389_v54, 0.0  ;;  %v8636_v52 = vmax.f32 %v15391_v34, 0.0  ;;  %v8637_v58 = vmax.f32 %v15393_v20, 0.0  ;;  %v8638_v48 = vmax.f32 %v15395_v2, 0.0 }
 0x544   : > { %8657 = vst [vmem:[%s15421_s15 + $0x30] sm:$0xff] %v8625_v5  ;;  %8658 = vst [vmem:[%s15421_s15 + $0x38] sm:$0xff] %v8626_v44  ;;  %v8639_v63 = vmax.f32 %v15397_v4, 0.0  ;;  %v8640_v38 = vmax.f32 %v15399_v53, 0.0  ;;  %v8641_v15 = vmax.f32 %v15401_v21, 0.0  ;;  %v8642_v0 = vmax.f32 %v15403_v36, 0.0 }
 0x545   : > { %8659 = vst [vmem:[%s15421_s15 + $0x40] sm:$0xff] %v8627_v11  ;;  %8660 = vst [vmem:[%s15421_s15 + $0x48] sm:$0xff] %v8628_v47  ;;  %v8643_v51 = vmax.f32 %v15405_v10, 0.0  ;;  %v8644_v13 = vmax.f32 %v15407_v16, 0.0  ;;  %v8645_v61 = vmax.f32 %v15409_v25, 0.0  ;;  %v8646_v35 = vmax.f32 %v15411_v3, 0.0 }
 0x546   : > { %8661 = vst [vmem:[%s15421_s15 + $0x50] sm:$0xff] %v8629_v29  ;;  %8662 = vst [vmem:[%s15421_s15 + $0x58] sm:$0xff] %v8630_v50  ;;  %v8647_v7 = vmax.f32 %v15413_v26, 0.0  ;;  %v8648_v24 = vmax.f32 %v15415_v22, 0.0  ;;  %v8649_v17 = vmax.f32 %v15417_v56, 0.0  ;;  %v8650_v18 = vmax.f32 %v15419_v55, 0.0 }
 0x547   : > { %8663 = vst [vmem:[%s15421_s15 + $0x60] sm:$0xff] %v8631_v43  ;;  %8664 = vst [vmem:[%s15421_s15 + $0x68] sm:$0xff] %v8632_v32 }
 0x548   : > { %8665 = vst [vmem:[%s15421_s15 + $0x70] sm:$0xff] %v8633_v27  ;;  %8666 = vst [vmem:[%s15421_s15 + $0x78] sm:$0xff] %v8634_v1 }
 0x549   : > { %8667 = vst [vmem:[%s15421_s15 + $0x80] sm:$0xff] %v8635_v42  ;;  %8668 = vst [vmem:[%s15421_s15 + $0x88] sm:$0xff] %v8636_v52 }
 0x54a   : > { %8669 = vst [vmem:[%s15421_s15 + $0x90] sm:$0xff] %v8637_v58  ;;  %8670 = vst [vmem:[%s15421_s15 + $0x98] sm:$0xff] %v8638_v48 }
 0x54b   : > { %8671 = vst [vmem:[%s15421_s15 + $0xa0] sm:$0xff] %v8639_v63  ;;  %8672 = vst [vmem:[%s15421_s15 + $0xa8] sm:$0xff] %v8640_v38 }
 0x54c   : > { %8673 = vst [vmem:[%s15421_s15 + $0xb0] sm:$0xff] %v8641_v15  ;;  %8674 = vst [vmem:[%s15421_s15 + $0xb8] sm:$0xff] %v8642_v0 }
 0x54d   : > { %8675 = vst [vmem:[%s15421_s15 + $0xc0] sm:$0xff] %v8643_v51  ;;  %8676 = vst [vmem:[%s15421_s15 + $0xc8] sm:$0xff] %v8644_v13 }
 0x54e   : > { %8677 = vst [vmem:[%s15421_s15 + $0xd0] sm:$0xff] %v8645_v61  ;;  %8678 = vst [vmem:[%s15421_s15 + $0xd8] sm:$0xff] %v8646_v35 }
 0x54f   : > { %8679 = vst [vmem:[%s15421_s15 + $0xe0] sm:$0xff] %v8647_v7  ;;  %8680 = vst [vmem:[%s15421_s15 + $0xe8] sm:$0xff] %v8648_v24 }
 0x550   : > { %8681 = vst [vmem:[%s15421_s15 + $0xf0] sm:$0xff] %v8649_v17  ;;  %8682 = vst [vmem:[%s15421_s15 + $0xf8] sm:$0xff] %v8650_v18 }
 0x551   : > { %12582 = shalt.err (!%p12579_p3)
}
 0x552   : > { %s12583_s8 = scalar_lea.hbm %s15460_s23, 4096  ;;  %s12587_s14 = scalar_lea.hbm %s15530_s7, 8192 }
 0x553   : > { %p12584_p4 = scmp.ne.s32.totalorder %s15460_s23, %s12583_s8  ;;  %p12588_p9 = scmp.lt.u32.totalorder %s15460_s23, %s15530_s7 }
 0x554   : > { %p12589_p10 = scmp.lt.u32.totalorder %s12587_s14, %s12583_s8  ;;  %p12591_p12 = scmp.lt.u32.totalorder %s12583_s8, %s15460_s23 }
 0x555   : > { %p12585_p7 = pnand %p12584_p4, %p12717_p5 }
 0x556   : > { %p12590_p11 = por %p12589_p10, %p12588_p9 }
 0x557   : > { %p12586_p8 = pneg %p12585_p7 }
 0x558   : > { %p12592_p13 = por %p12591_p12, %p12590_p11 }
 0x55a   : > { %p12593_p0 = pnand %p12592_p13, %p12586_p8 }
 0x55c   : > { %12596 = shalt.err (!%p12593_p0)
}
 0x55d   : > { %s12637_s28 = smov 128   ;;  %s12638_s18 = smov 8  }
 0x55e   : > { %12524 = dma.vmem_to_hbm [thread:$0]  (%p12717_p5), %s15462_s17, 4096, %s15460_s23, %s15482_s19, %s12637_s28, %s12637_s28, %s12638_s18  }
 0x55f PF: > { %p12530_p1 = scmp.ge.s32.totalorder %s12631_s27, 2  ;;  %s8712_s20 = sand.u32 1, %s12619_s24  }
 0x560   : > { %s8713_s21 = scalar_lea.sflag [#allocation4], %s8712_s20 }
 0x561   : > { %p12527_p2 = pnand %p12530_p1, %p12721_p6 }
 0x563   : > { %12614 = dma.done.wait (!%p12527_p2), %s8713_s21, 4096  }
 0x564   : > { %12616 = vsyncadd (!%p12527_p2), %s8713_s21, 4294963200  ;;  %p17_p3 = scmp.ge.s32.totalorder %s12704_s30, 4   ;;  %s15873_s24 = smov %s12623_s25 }
 0x565   : > { %s15874_s25 = smov %s12627_s26  ;;  %s15875_s26 = smov %s12715_s10 }
 0x566   : > { %s15876_s27 = smov %s12704_s30  ;;  %19 = sbr.rel (!%p17_p3) target bundleno = 3 (0x3), region = 104 }
 0x56d   :  { %8718 = vsyncpa [#allocation4], 1 }
 0x56e   :  { %8720 = vsyncpa [#allocation4 + $0x1], 1 }

</bundles_post_ra>
